<compile_context>
chip_gen: v6e
topology: v6e:2x2x1
jax: 0.10.0
libtpu: 0.0.40
codegen_flags: <defaults>
</compile_context>

<pallas_src>
import functools
import math

import jax
import jax.numpy as jnp
from jax.experimental import pallas as pl
from jax.experimental.pallas import tpu as pltpu


def _layernorm(x, gamma, beta, eps=1e-5):
    # x: (R, D); gamma/beta: (1, D). Biased variance, matching torch LayerNorm.
    mean = jnp.mean(x, axis=-1, keepdims=True)
    var = jnp.mean((x - mean) ** 2, axis=-1, keepdims=True)
    nx = (x - mean) * jax.lax.rsqrt(var + eps)      # rsqrt -> EUP slot
    return gamma * nx + beta


def _gelu_exact(x):
    # nn.GELU() default = exact erf form.
    return 0.5 * x * (1.0 + jax.lax.erf(x * (1.0 / math.sqrt(2.0))))


def transformer_layer_kernel(
    x_ref,            # (bb, T, D)  f32
    g1_ref, b1_ref,   # (1, D)      f32  -- norm1 gamma/beta
    wqkv_ref,         # (D, 3*H*dk) compute dtype (1/sqrt(dk) folded into Q cols)
    wo_ref, bo_ref,   # (D, D) cdt, (1, D) f32
    g2_ref, b2_ref,   # (1, D)      f32  -- norm2 gamma/beta
    w1_ref, bb1_ref,  # (D, F) cdt, (1, F) f32
    w2_ref, bb2_ref,  # (F, D) cdt, (1, D) f32
    o_ref,            # (bb, T, D)
    mh_ref,           # VMEM scratch (bb*T, H*dk) f32 (used only by fallback path)
    *, num_heads, head_dim, batched_heads,
):
    bb, T, D = x_ref.shape
    R = bb * T
    H, dk = num_heads, head_dim
    HD = H * dk
    cdt = wqkv_ref.dtype             # matmul compute dtype (bf16)

    # Flatten batch into the row axis for all row-wise matmuls.
    x = x_ref[...].reshape(R, D).astype(jnp.float32)

    # ---- norm1 (f32 elementwise) ----
    nx = _layernorm(x, g1_ref[...], b1_ref[...])

    # ---- fused QKV projection: one MXU call, N = 3*H*dk ----
    qkv = jnp.dot(nx.astype(cdt), wqkv_ref[...],
                  preferred_element_type=jnp.float32)           # (R, 3*HD) f32

    # ---- causal additive bias, built once per program ----
    # NOTE: finite -1e30 is safe only because scores stay f32 through max-subtract.
    row = jax.lax.broadcasted_iota(jnp.int32, (T, T), 0)
    col = jax.lax.broadcasted_iota(jnp.int32, (T, T), 1)
    bias = jnp.where(col > row, jnp.float32(-1e30), jnp.float32(0.0))   # (T, T)

    # Hoisted: one f32->bf16 cast of the fused projection for all heads.
    qkv_c = qkv.astype(cdt)                                     # (R, 3*HD) cdt

    if batched_heads:
        # ---- head-batched attention: two einsums over a (bb*H) leading batch ----
        q = qkv_c[:, :HD].reshape(bb, T, H, dk)
        k = qkv_c[:, HD:2 * HD].reshape(bb, T, H, dk)
        v = qkv_c[:, 2 * HD:].reshape(bb, T, H, dk)
        qh = jnp.transpose(q, (0, 2, 1, 3)).reshape(bb * H, T, dk)   # (bb*H, T, dk)
        kh = jnp.transpose(k, (0, 2, 1, 3)).reshape(bb * H, T, dk)
        vh = jnp.transpose(v, (0, 2, 1, 3)).reshape(bb * H, T, dk)

        s = jnp.einsum('bqd,bkd->bqk', qh, kh,
                       preferred_element_type=jnp.float32)      # (bb*H, T, T) f32
        s = s + bias[None, :, :]
        m = jnp.max(s, axis=-1, keepdims=True)
        p = jnp.exp(s - m)
        denom = jnp.sum(p, axis=-1, keepdims=True)
        p = p * pl.reciprocal(denom, approx=True)               # EUP, ~free

        oh = jnp.einsum('bqk,bkd->bqd', p.astype(cdt), vh,
                        preferred_element_type=jnp.float32)     # (bb*H, T, dk) f32
        # Back to token-major, lane-dense (R, HD) slab (no masked sub-lane stores).
        mh = jnp.transpose(oh.reshape(bb, H, T, dk), (0, 2, 1, 3)).reshape(R, HD)
    else:
        # ---- fallback: per-head loop with hoisted cast + hoisted bias broadcast ----
        bias_b = jnp.broadcast_to(bias[None, :, :], (bb, T, T))  # built once, reused
        for h in range(H):
            lo, hi = h * dk, (h + 1) * dk
            q = qkv_c[:, lo:hi].reshape(bb, T, dk)
            k = qkv_c[:, HD + lo:HD + hi].reshape(bb, T, dk)
            v = qkv_c[:, 2 * HD + lo:2 * HD + hi].reshape(bb, T, dk)

            s = jnp.einsum('bqd,bkd->bqk', q, k,
                           preferred_element_type=jnp.float32)  # (bb, T, T) f32
            s = s + bias_b
            m = jnp.max(s, axis=-1, keepdims=True)
            p = jnp.exp(s - m)
            denom = jnp.sum(p, axis=-1, keepdims=True)
            p = p * pl.reciprocal(denom, approx=True)

            oh = jnp.einsum('bqk,bkd->bqd', p.astype(cdt), v,
                            preferred_element_type=jnp.float32)
            mh_ref[:, lo:hi] = oh.reshape(R, dk)
        mh = mh_ref[...]                                        # (R, HD)

    # ---- output projection + residual ----
    attn = jnp.dot(mh.astype(cdt), wo_ref[...],
                   preferred_element_type=jnp.float32) + bo_ref[...]
    x = x + attn

    # ---- norm2 + feedforward + residual (elementwise math in f32) ----
    nx2 = _layernorm(x, g2_ref[...], b2_ref[...])
    h1 = jnp.dot(nx2.astype(cdt), w1_ref[...],
                 preferred_element_type=jnp.float32) + bb1_ref[...]
    h1 = _gelu_exact(h1)
    ff = jnp.dot(h1.astype(cdt), w2_ref[...],
                 preferred_element_type=jnp.float32) + bb2_ref[...]
    x = x + ff

    o_ref[...] = x.reshape(bb, T, D).astype(o_ref.dtype)


def _pick_batch_block(B, T, target_rows=512, min_grid=2):
    """Largest divisor bb of B with bb*T <= target_rows while keeping at least
    `min_grid` grid steps (so both v7x TensorCores get work)."""
    best = 1
    for bb in range(1, B + 1):
        if B % bb:
            continue
        if bb > 1 and bb * T > target_rows:
            continue
        if bb > 1 and (B // bb) < min(min_grid, B):
            continue
        best = bb
    return best


def _physical_vmem_bytes():
    try:
        info = pltpu.get_tpu_info()
        v = getattr(info, "vmem_capacity_bytes", None)
        if v:
            return int(v)
    except Exception:
        pass
    return 64 * 2 ** 20   # conservative default: v7x per-TensorCore VMEM


def transformer_layer(x, params, *, num_heads, head_dim,
                      compute_dtype=jnp.bfloat16, batch_block=None):
    B, T, D = x.shape
    F = params["w1"].shape[1]
    HD = num_heads * head_dim
    assert D == HD, "input_dim must equal num_heads * head_dim"

    bb = batch_block if batch_block is not None else _pick_batch_block(B, T)
    assert B % bb == 0
    n_blocks = B // bb

    # ---- parameter prep (offline): fuse QKV, fold scale, cast weights ----
    scale = 1.0 / math.sqrt(head_dim)
    wqkv = jnp.concatenate(
        [params["wq"] * scale, params["wk"], params["wv"]], axis=1
    ).astype(compute_dtype)                                     # (D, 3*HD)
    wo = params["wo"].astype(compute_dtype)
    w1 = params["w1"].astype(compute_dtype)
    w2 = params["w2"].astype(compute_dtype)

    args = (x,
            params["g1"], params["b1"],
            wqkv,
            wo, params["bo"],
            params["g2"], params["b2"],
            w1, params["bb1"],
            w2, params["bb2"])

    # ---- advisory cost estimate for XLA's scheduler ----
    Rtot = B * T
    flops = (2 * Rtot * D * (3 * HD) + 2 * Rtot * HD * D
             + 2 * Rtot * D * F + 2 * Rtot * F * D
             + 4 * B * num_heads * T * T * head_dim)            # QK^T + PV
    transcendentals = Rtot * F + B * num_heads * T * T + 2 * Rtot
    bytes_accessed = sum(int(a.size) * a.dtype.itemsize for a in args) \
        + Rtot * D * x.dtype.itemsize
    try:
        cost = pl.CostEstimate(flops=int(flops),
                               transcendentals=int(transcendentals),
                               bytes_accessed=int(bytes_accessed))
    except Exception:
        cost = None

    cap = int(0.75 * _physical_vmem_bytes())
    cbytes = jnp.dtype(compute_dtype).itemsize

    def build(single_buffer_weights, batched_heads):
        # Weights / norm params / biases have constant block indices across the
        # grid; single-buffer them so they are resident once (halves weight VMEM).
        weight_kwargs = (
            dict(pipeline_mode=pl.Buffered(1)) if single_buffer_weights else {}
        )

        def const_spec(shape):
            nd = len(shape)
            return pl.BlockSpec(shape, lambda b, _nd=nd: (0,) * _nd, **weight_kwargs)

        in_specs = [
            pl.BlockSpec((bb, T, D), lambda b: (b, 0, 0)),      # x (pipelined)
            const_spec((1, D)), const_spec((1, D)),             # g1, b1
            const_spec((D, 3 * HD)),                            # wqkv
            const_spec((D, D)), const_spec((1, D)),             # wo, bo
            const_spec((1, D)), const_spec((1, D)),             # g2, b2
            const_spec((D, F)), const_spec((1, F)),             # w1, bb1
            const_spec((F, D)), const_spec((1, D)),             # w2, bb2
        ]
        out_spec = pl.BlockSpec((bb, T, D), lambda b: (b, 0, 0))

        # ---- VMEM budget (no double-hedging), capped per-generation ----
        wbuf = 1 if single_buffer_weights else 2
        weight_bytes = wbuf * ((wqkv.size + wo.size + w1.size + w2.size) * cbytes
                               + 4 * (6 * D + F))               # f32 gammas/betas/biases
        io_bytes = 2 * 2 * bb * T * D * 4                       # x/o blocks, double-buffered
        act_bytes = (bb * T * (3 * HD + F + 6 * D + HD) * 4
                     + 2 * bb * num_heads * T * T * 4)          # qkv/ff/residual + scores
        est = weight_bytes + io_bytes + act_bytes + (4 << 20)   # compiler headroom
        vmem_limit_bytes = int(min(max(est, 16 << 20), cap))

        kernel = functools.partial(
            transformer_layer_kernel, num_heads=num_heads, head_dim=head_dim,
            batched_heads=batched_heads,
        )
        return pl.pallas_call(
            kernel,
            out_shape=jax.ShapeDtypeStruct((B, T, D), x.dtype),
            grid_spec=pltpu.PrefetchScalarGridSpec(
                num_scalar_prefetch=0,
                grid=(n_blocks,),
                in_specs=in_specs,
                out_specs=out_spec,
                scratch_shapes=[pltpu.VMEM((bb * T, HD), jnp.float32)],
            ),
            compiler_params=pltpu.CompilerParams(
                dimension_semantics=("parallel",),
                vmem_limit_bytes=vmem_limit_bytes,
            ),
            cost_estimate=cost,
        )

    # Preferred configuration first; fall back if this jax/Mosaic build rejects
    # pl.Buffered(1) or the head-batched relayout.  Correctness is identical.
    attempts = [(True, True), (True, False), (False, True), (False, False)]
    last_err = None
    for single_buf, batched in attempts:
        try:
            out = build(single_buf, batched)(*args)
            return jax.block_until_ready(out)
        except Exception as e:      # lowering / API availability fallback
            last_err = e
    raise last_err


def reference_forward(x, params, *, num_heads, head_dim):
    """Pure-JAX reference mirroring the PyTorch forward (eval mode), f32."""
    def ln(v, g, b, eps=1e-5):
        m = jnp.mean(v, axis=-1, keepdims=True)
        var = jnp.mean((v - m) ** 2, axis=-1, keepdims=True)
        return g * ((v - m) / jnp.sqrt(var + eps)) + b

    B, T, D = x.shape
    nx = ln(x, params["g1"], params["b1"])
    q = nx @ params["wq"]
    k = nx @ params["wk"]
    v = nx @ params["wv"]
    mask = jnp.triu(jnp.ones((T, T), bool), 1)
    outs = []
    for h in range(num_heads):
        sl = slice(h * head_dim, (h + 1) * head_dim)
        qs = q[..., sl] / math.sqrt(head_dim)
        sc = jnp.einsum("btd,bsd->bts", qs, k[..., sl])
        sc = jnp.where(mask, -jnp.inf, sc)
        w = jax.nn.softmax(sc, axis=-1)
        outs.append(jnp.einsum("bts,bsd->btd", w, v[..., sl]))
    mh = jnp.concatenate(outs, axis=-1)
    attn = mh @ params["wo"] + params["bo"]
    x = x + attn
    nx2 = ln(x, params["g2"], params["b2"])
    h1 = jax.nn.gelu(nx2 @ params["w1"] + params["bb1"], approximate=False)
    ff = h1 @ params["w2"] + params["bb2"]
    return x + ff


if __name__ == "__main__":
    # Small shapes: batch=2, seq=8, input_dim = num_heads * 16 = 32, ff = 4*D = 128.
    B, T = 2, 8
    num_heads, head_dim = 2, 16
    D = num_heads * head_dim           # 32
    F = 4 * D                          # 128

    key = jax.random.PRNGKey(0)
    ks = jax.random.split(key, 12)

    def init(k, shape, scale=0.1):
        return (scale * jax.random.normal(k, shape)).astype(jnp.float32)

    params = {
        "g1":  jnp.ones((1, D), jnp.float32),
        "b1":  jnp.zeros((1, D), jnp.float32),
        "wq":  init(ks[0], (D, num_heads * head_dim)),
        "wk":  init(ks[1], (D, num_heads * head_dim)),
        "wv":  init(ks[2], (D, num_heads * head_dim)),
        "wo":  init(ks[3], (D, D)),
        "bo":  init(ks[4], (1, D)),
        "g2":  jnp.ones((1, D), jnp.float32),
        "b2":  jnp.zeros((1, D), jnp.float32),
        "w1":  init(ks[5], (D, F)),
        "bb1": init(ks[6], (1, F)),
        "w2":  init(ks[7], (F, D)),
        "bb2": init(ks[8], (1, D)),
    }

    x = jax.random.normal(ks[9], (B, T, D), dtype=jnp.float32)

    out = transformer_layer(x, params, num_heads=num_heads, head_dim=head_dim)
    out = jax.block_until_ready(out)

    ref = reference_forward(x, params, num_heads=num_heads, head_dim=head_dim)
    # bf16 matmul inputs with f32 accumulation -> loosened tolerance vs f32 reference.
    assert out.shape == ref.shape
    assert jnp.allclose(out, ref, atol=5e-2, rtol=5e-2), "mismatch vs reference"

    print("KERNEL_OK")
</pallas_src>

<mosaic_0001>
module attributes {stable_mosaic.version = 11 : i64} {
  func.func @transformer_layer_kernel(%arg0: i32, %arg1: memref<1x8x32xf32, #tpu.memory_space<vmem>>, %arg2: memref<1x32xf32, #tpu.memory_space<vmem>>, %arg3: memref<1x32xf32, #tpu.memory_space<vmem>>, %arg4: memref<32x96xbf16, #tpu.memory_space<vmem>>, %arg5: memref<32x32xbf16, #tpu.memory_space<vmem>>, %arg6: memref<1x32xf32, #tpu.memory_space<vmem>>, %arg7: memref<1x32xf32, #tpu.memory_space<vmem>>, %arg8: memref<1x32xf32, #tpu.memory_space<vmem>>, %arg9: memref<32x128xbf16, #tpu.memory_space<vmem>>, %arg10: memref<1x128xf32, #tpu.memory_space<vmem>>, %arg11: memref<128x32xbf16, #tpu.memory_space<vmem>>, %arg12: memref<1x32xf32, #tpu.memory_space<vmem>>, %arg13: memref<1x8x32xf32, #tpu.memory_space<vmem>>, %arg14: memref<8x32xf32, #tpu.memory_space<vmem>>) attributes {dimension_semantics = [#tpu.dimension_semantics<parallel>], iteration_bounds = array<i64: 2>, scalar_prefetch = 0 : i64, scratch_operands = 1 : i64, tpu.core_type = #tpu.core_type<tc>, window_params = [{transform_indices = @transform_0, window_bounds = array<i64: 1, 8, 32>}, {pipeline_mode = #tpu.pipeline_mode<synchronous>, transform_indices = @transform_1, window_bounds = array<i64: 1, 32>}, {pipeline_mode = #tpu.pipeline_mode<synchronous>, transform_indices = @transform_2, window_bounds = array<i64: 1, 32>}, {pipeline_mode = #tpu.pipeline_mode<synchronous>, transform_indices = @transform_3, window_bounds = array<i64: 32, 96>}, {pipeline_mode = #tpu.pipeline_mode<synchronous>, transform_indices = @transform_4, window_bounds = array<i64: 32, 32>}, {pipeline_mode = #tpu.pipeline_mode<synchronous>, transform_indices = @transform_5, window_bounds = array<i64: 1, 32>}, {pipeline_mode = #tpu.pipeline_mode<synchronous>, transform_indices = @transform_6, window_bounds = array<i64: 1, 32>}, {pipeline_mode = #tpu.pipeline_mode<synchronous>, transform_indices = @transform_7, window_bounds = array<i64: 1, 32>}, {pipeline_mode = #tpu.pipeline_mode<synchronous>, transform_indices = @transform_8, window_bounds = array<i64: 32, 128>}, {pipeline_mode = #tpu.pipeline_mode<synchronous>, transform_indices = @transform_9, window_bounds = array<i64: 1, 128>}, {pipeline_mode = #tpu.pipeline_mode<synchronous>, transform_indices = @transform_10, window_bounds = array<i64: 128, 32>}, {pipeline_mode = #tpu.pipeline_mode<synchronous>, transform_indices = @transform_11, window_bounds = array<i64: 1, 32>}, {transform_indices = @transform_12, window_bounds = array<i64: 1, 8, 32>}]} {
    %c0 = arith.constant 0 : index
    %c0_0 = arith.constant 0 : index
    %c0_1 = arith.constant 0 : index
    %0 = vector.load %arg1[%c0, %c0_0, %c0_1] : memref<1x8x32xf32, #tpu.memory_space<vmem>>, vector<1x8x32xf32>
    %1 = vector.shape_cast %0 : vector<1x8x32xf32> to vector<8x32xf32>
    %c0_2 = arith.constant 0 : index
    %c0_3 = arith.constant 0 : index
    %2 = vector.load %arg2[%c0_2, %c0_3] : memref<1x32xf32, #tpu.memory_space<vmem>>, vector<1x32xf32>
    %c0_4 = arith.constant 0 : index
    %c0_5 = arith.constant 0 : index
    %3 = vector.load %arg3[%c0_4, %c0_5] : memref<1x32xf32, #tpu.memory_space<vmem>>, vector<1x32xf32>
    %cst = arith.constant dense<0.000000e+00> : vector<8xf32>
    %4 = vector.multi_reduction <add>, %1, %cst [1] : vector<8x32xf32> to vector<8xf32>
    %5 = vector.shape_cast %4 : vector<8xf32> to vector<8x1xf32>
    %cst_6 = arith.constant 3.200000e+01 : f32
    %6 = vector.broadcast %cst_6 : f32 to vector<8x1xf32>
    %7 = arith.divf %5, %6 : vector<8x1xf32>
    %8 = vector.broadcast %7 : vector<8x1xf32> to vector<8x32xf32>
    %9 = arith.subf %1, %8 : vector<8x32xf32>
    %10 = arith.mulf %9, %9 : vector<8x32xf32>
    %cst_7 = arith.constant dense<0.000000e+00> : vector<8xf32>
    %11 = vector.multi_reduction <add>, %10, %cst_7 [1] : vector<8x32xf32> to vector<8xf32>
    %12 = vector.shape_cast %11 : vector<8xf32> to vector<8x1xf32>
    %cst_8 = arith.constant 3.200000e+01 : f32
    %13 = vector.broadcast %cst_8 : f32 to vector<8x1xf32>
    %14 = arith.divf %12, %13 : vector<8x1xf32>
    %15 = vector.broadcast %7 : vector<8x1xf32> to vector<8x32xf32>
    %16 = arith.subf %1, %15 : vector<8x32xf32>
    %cst_9 = arith.constant 9.99999974E-6 : f32
    %17 = vector.broadcast %cst_9 : f32 to vector<8x1xf32>
    %18 = arith.addf %14, %17 : vector<8x1xf32>
    %19 = math.rsqrt %18 : vector<8x1xf32>
    %20 = vector.broadcast %19 : vector<8x1xf32> to vector<8x32xf32>
    %21 = arith.mulf %16, %20 : vector<8x32xf32>
    %22 = vector.broadcast %2 : vector<1x32xf32> to vector<8x32xf32>
    %23 = arith.mulf %22, %21 : vector<8x32xf32>
    %24 = vector.broadcast %3 : vector<1x32xf32> to vector<8x32xf32>
    %25 = arith.addf %23, %24 : vector<8x32xf32>
    %26 = arith.truncf %25 : vector<8x32xf32> to vector<8x32xbf16>
    %c0_10 = arith.constant 0 : index
    %c0_11 = arith.constant 0 : index
    %27 = vector.load %arg4[%c0_10, %c0_11] : memref<32x96xbf16, #tpu.memory_space<vmem>>, vector<32x96xbf16>
    %cst_12 = arith.constant dense<0.000000e+00> : vector<8x96xf32>
    %28 = tpu.matmul %26, %27, %cst_12 {dimension_numbers = #tpu.dot_dimension_numbers<[1], [0], [0], [1], [0, 0, 1, 1], [], []>} : vector<8x32xbf16>, vector<32x96xbf16>, vector<8x96xf32> -> vector<8x96xf32>
    %29 = tpu.iota {dimensions = array<i32: 0>} : vector<8x8xi32>
    %30 = tpu.iota {dimensions = array<i32: 1>} : vector<8x8xi32>
    %31 = arith.cmpi sgt, %30, %29 : vector<8x8xi32>
    %cst_13 = arith.constant -1.000000e+30 : f32
    %cst_14 = arith.constant 0.000000e+00 : f32
    %32 = vector.broadcast %cst_13 : f32 to vector<8x8xf32>
    %33 = vector.broadcast %cst_14 : f32 to vector<8x8xf32>
    %34 = arith.select %31, %32, %33 : vector<8x8xi1>, vector<8x8xf32>
    %35 = arith.truncf %28 : vector<8x96xf32> to vector<8x96xbf16>
    %36 = vector.extract_strided_slice %35 {offsets = [0, 0], sizes = [8, 32], strides = [1, 1]} : vector<8x96xbf16> to vector<8x32xbf16>
    %37 = vector.shape_cast %36 : vector<8x32xbf16> to vector<1x8x2x16xbf16>
    %38 = vector.extract_strided_slice %35 {offsets = [0, 32], sizes = [8, 32], strides = [1, 1]} : vector<8x96xbf16> to vector<8x32xbf16>
    %39 = vector.shape_cast %38 : vector<8x32xbf16> to vector<1x8x2x16xbf16>
    %40 = vector.extract_strided_slice %35 {offsets = [0, 64], sizes = [8, 32], strides = [1, 1]} : vector<8x96xbf16> to vector<8x32xbf16>
    %41 = vector.shape_cast %40 : vector<8x32xbf16> to vector<1x8x2x16xbf16>
    %42 = tpu.transpose %37, [0, 2, 1, 3] : vector<1x8x2x16xbf16> -> vector<1x2x8x16xbf16>
    %43 = vector.shape_cast %42 : vector<1x2x8x16xbf16> to vector<2x8x16xbf16>
    %44 = tpu.transpose %39, [0, 2, 1, 3] : vector<1x8x2x16xbf16> -> vector<1x2x8x16xbf16>
    %45 = vector.shape_cast %44 : vector<1x2x8x16xbf16> to vector<2x8x16xbf16>
    %46 = tpu.transpose %41, [0, 2, 1, 3] : vector<1x8x2x16xbf16> -> vector<1x2x8x16xbf16>
    %47 = vector.shape_cast %46 : vector<1x2x8x16xbf16> to vector<2x8x16xbf16>
    "tpu.trace_start"() <{level = 10 : i32, message = "bqd,bkd->bqk"}> : () -> ()
    %cst_15 = arith.constant dense<0.000000e+00> : vector<2x8x8xf32>
    %48 = tpu.matmul %43, %45, %cst_15 {dimension_numbers = #tpu.dot_dimension_numbers<[2], [2], [1], [1], [0, 0, 0, 1, 1, 1], [0], [0]>} : vector<2x8x16xbf16>, vector<2x8x16xbf16>, vector<2x8x8xf32> -> vector<2x8x8xf32>
    "tpu.trace_stop"() : () -> ()
    %49 = vector.shape_cast %34 : vector<8x8xf32> to vector<1x8x8xf32>
    %50 = vector.broadcast %49 : vector<1x8x8xf32> to vector<2x8x8xf32>
    %51 = arith.addf %48, %50 : vector<2x8x8xf32>
    %cst_16 = arith.constant dense<0xFF800000> : vector<2x8xf32>
    %52 = vector.multi_reduction <maximumf>, %51, %cst_16 [2] : vector<2x8x8xf32> to vector<2x8xf32>
    %53 = vector.shape_cast %52 : vector<2x8xf32> to vector<2x8x1xf32>
    %54 = vector.broadcast %53 : vector<2x8x1xf32> to vector<2x8x8xf32>
    %55 = arith.subf %51, %54 : vector<2x8x8xf32>
    %56 = math.exp %55 : vector<2x8x8xf32>
    %cst_17 = arith.constant dense<0.000000e+00> : vector<2x8xf32>
    %57 = vector.multi_reduction <add>, %56, %cst_17 [2] : vector<2x8x8xf32> to vector<2x8xf32>
    %58 = vector.shape_cast %57 : vector<2x8xf32> to vector<2x8x1xf32>
    %59 = tpu.reciprocal %58 {approx = true} : vector<2x8x1xf32> -> vector<2x8x1xf32>
    %60 = vector.broadcast %59 : vector<2x8x1xf32> to vector<2x8x8xf32>
    %61 = arith.mulf %56, %60 : vector<2x8x8xf32>
    %62 = arith.truncf %61 : vector<2x8x8xf32> to vector<2x8x8xbf16>
    "tpu.trace_start"() <{level = 10 : i32, message = "bqk,bkd->bqd"}> : () -> ()
    %cst_18 = arith.constant dense<0.000000e+00> : vector<2x8x16xf32>
    %63 = tpu.matmul %62, %47, %cst_18 {dimension_numbers = #tpu.dot_dimension_numbers<[2], [1], [1], [2], [0, 0, 0, 1, 1, 2], [0], [0]>} : vector<2x8x8xbf16>, vector<2x8x16xbf16>, vector<2x8x16xf32> -> vector<2x8x16xf32>
    "tpu.trace_stop"() : () -> ()
    %64 = vector.shape_cast %63 : vector<2x8x16xf32> to vector<1x2x8x16xf32>
    %65 = tpu.transpose %64, [0, 2, 1, 3] : vector<1x2x8x16xf32> -> vector<1x8x2x16xf32>
    %66 = vector.shape_cast %65 : vector<1x8x2x16xf32> to vector<8x32xf32>
    %67 = arith.truncf %66 : vector<8x32xf32> to vector<8x32xbf16>
    %c0_19 = arith.constant 0 : index
    %c0_20 = arith.constant 0 : index
    %68 = vector.load %arg5[%c0_19, %c0_20] : memref<32x32xbf16, #tpu.memory_space<vmem>>, vector<32x32xbf16>
    %cst_21 = arith.constant dense<0.000000e+00> : vector<8x32xf32>
    %69 = tpu.matmul %67, %68, %cst_21 {dimension_numbers = #tpu.dot_dimension_numbers<[1], [0], [0], [1], [0, 0, 1, 1], [], []>} : vector<8x32xbf16>, vector<32x32xbf16>, vector<8x32xf32> -> vector<8x32xf32>
    %c0_22 = arith.constant 0 : index
    %c0_23 = arith.constant 0 : index
    %70 = vector.load %arg6[%c0_22, %c0_23] : memref<1x32xf32, #tpu.memory_space<vmem>>, vector<1x32xf32>
    %71 = vector.broadcast %70 : vector<1x32xf32> to vector<8x32xf32>
    %72 = arith.addf %69, %71 : vector<8x32xf32>
    %73 = arith.addf %1, %72 : vector<8x32xf32>
    %c0_24 = arith.constant 0 : index
    %c0_25 = arith.constant 0 : index
    %74 = vector.load %arg7[%c0_24, %c0_25] : memref<1x32xf32, #tpu.memory_space<vmem>>, vector<1x32xf32>
    %c0_26 = arith.constant 0 : index
    %c0_27 = arith.constant 0 : index
    %75 = vector.load %arg8[%c0_26, %c0_27] : memref<1x32xf32, #tpu.memory_space<vmem>>, vector<1x32xf32>
    %cst_28 = arith.constant dense<0.000000e+00> : vector<8xf32>
    %76 = vector.multi_reduction <add>, %73, %cst_28 [1] : vector<8x32xf32> to vector<8xf32>
    %77 = vector.shape_cast %76 : vector<8xf32> to vector<8x1xf32>
    %cst_29 = arith.constant 3.200000e+01 : f32
    %78 = vector.broadcast %cst_29 : f32 to vector<8x1xf32>
    %79 = arith.divf %77, %78 : vector<8x1xf32>
    %80 = vector.broadcast %79 : vector<8x1xf32> to vector<8x32xf32>
    %81 = arith.subf %73, %80 : vector<8x32xf32>
    %82 = arith.mulf %81, %81 : vector<8x32xf32>
    %cst_30 = arith.constant dense<0.000000e+00> : vector<8xf32>
    %83 = vector.multi_reduction <add>, %82, %cst_30 [1] : vector<8x32xf32> to vector<8xf32>
    %84 = vector.shape_cast %83 : vector<8xf32> to vector<8x1xf32>
    %cst_31 = arith.constant 3.200000e+01 : f32
    %85 = vector.broadcast %cst_31 : f32 to vector<8x1xf32>
    %86 = arith.divf %84, %85 : vector<8x1xf32>
    %87 = vector.broadcast %79 : vector<8x1xf32> to vector<8x32xf32>
    %88 = arith.subf %73, %87 : vector<8x32xf32>
    %cst_32 = arith.constant 9.99999974E-6 : f32
    %89 = vector.broadcast %cst_32 : f32 to vector<8x1xf32>
    %90 = arith.addf %86, %89 : vector<8x1xf32>
    %91 = math.rsqrt %90 : vector<8x1xf32>
    %92 = vector.broadcast %91 : vector<8x1xf32> to vector<8x32xf32>
    %93 = arith.mulf %88, %92 : vector<8x32xf32>
    %94 = vector.broadcast %74 : vector<1x32xf32> to vector<8x32xf32>
    %95 = arith.mulf %94, %93 : vector<8x32xf32>
    %96 = vector.broadcast %75 : vector<1x32xf32> to vector<8x32xf32>
    %97 = arith.addf %95, %96 : vector<8x32xf32>
    %98 = arith.truncf %97 : vector<8x32xf32> to vector<8x32xbf16>
    %c0_33 = arith.constant 0 : index
    %c0_34 = arith.constant 0 : index
    %99 = vector.load %arg9[%c0_33, %c0_34] : memref<32x128xbf16, #tpu.memory_space<vmem>>, vector<32x128xbf16>
    %cst_35 = arith.constant dense<0.000000e+00> : vector<8x128xf32>
    %100 = tpu.matmul %98, %99, %cst_35 {dimension_numbers = #tpu.dot_dimension_numbers<[1], [0], [0], [1], [0, 0, 1, 1], [], []>} : vector<8x32xbf16>, vector<32x128xbf16>, vector<8x128xf32> -> vector<8x128xf32>
    %c0_36 = arith.constant 0 : index
    %c0_37 = arith.constant 0 : index
    %101 = vector.load %arg10[%c0_36, %c0_37] : memref<1x128xf32, #tpu.memory_space<vmem>>, vector<1x128xf32>
    %102 = vector.broadcast %101 : vector<1x128xf32> to vector<8x128xf32>
    %103 = arith.addf %100, %102 : vector<8x128xf32>
    %cst_38 = arith.constant 5.000000e-01 : f32
    %104 = vector.broadcast %cst_38 : f32 to vector<8x128xf32>
    %105 = arith.mulf %104, %103 : vector<8x128xf32>
    %cst_39 = arith.constant 0.707106769 : f32
    %106 = vector.broadcast %cst_39 : f32 to vector<8x128xf32>
    %107 = arith.mulf %103, %106 : vector<8x128xf32>
    %108 = math.erf %107 : vector<8x128xf32>
    %cst_40 = arith.constant 1.000000e+00 : f32
    %109 = vector.broadcast %cst_40 : f32 to vector<8x128xf32>
    %110 = arith.addf %109, %108 : vector<8x128xf32>
    %111 = arith.mulf %105, %110 : vector<8x128xf32>
    %112 = arith.truncf %111 : vector<8x128xf32> to vector<8x128xbf16>
    %c0_41 = arith.constant 0 : index
    %c0_42 = arith.constant 0 : index
    %113 = vector.load %arg11[%c0_41, %c0_42] : memref<128x32xbf16, #tpu.memory_space<vmem>>, vector<128x32xbf16>
    %cst_43 = arith.constant dense<0.000000e+00> : vector<8x32xf32>
    %114 = tpu.matmul %112, %113, %cst_43 {dimension_numbers = #tpu.dot_dimension_numbers<[1], [0], [0], [1], [0, 0, 1, 1], [], []>} : vector<8x128xbf16>, vector<128x32xbf16>, vector<8x32xf32> -> vector<8x32xf32>
    %c0_44 = arith.constant 0 : index
    %c0_45 = arith.constant 0 : index
    %115 = vector.load %arg12[%c0_44, %c0_45] : memref<1x32xf32, #tpu.memory_space<vmem>>, vector<1x32xf32>
    %116 = vector.broadcast %115 : vector<1x32xf32> to vector<8x32xf32>
    %117 = arith.addf %114, %116 : vector<8x32xf32>
    %118 = arith.addf %73, %117 : vector<8x32xf32>
    %119 = vector.shape_cast %118 : vector<8x32xf32> to vector<1x8x32xf32>
    %c0_46 = arith.constant 0 : index
    %c0_47 = arith.constant 0 : index
    %c0_48 = arith.constant 0 : index
    %120 = vector.load %arg13[%c0_46, %c0_47, %c0_48] : memref<1x8x32xf32, #tpu.memory_space<vmem>>, vector<1x8x32xf32>
    tpu.vector_store %arg13[%c0_46, %c0_47, %c0_48], %119 {strides = array<i32>} : memref<1x8x32xf32, #tpu.memory_space<vmem>>, vector<1x8x32xf32>,
    return
  }
  func.func @transform_0(%arg0: i32) -> (i32, i32, i32) {
    %c0_i32 = arith.constant 0 : i32
    %c0_i32_0 = arith.constant 0 : i32
    %c0_i32_1 = arith.constant 0 : i32
    return %arg0, %c0_i32, %c0_i32_0 : i32, i32, i32
  }
  func.func @transform_1(%arg0: i32) -> (i32, i32) {
    %c0_i32 = arith.constant 0 : i32
    %c0_i32_0 = arith.constant 0 : i32
    %c0_i32_1 = arith.constant 0 : i32
    return %c0_i32, %c0_i32_0 : i32, i32
  }
  func.func @transform_2(%arg0: i32) -> (i32, i32) {
    %c0_i32 = arith.constant 0 : i32
    %c0_i32_0 = arith.constant 0 : i32
    %c0_i32_1 = arith.constant 0 : i32
    return %c0_i32, %c0_i32_0 : i32, i32
  }
  func.func @transform_3(%arg0: i32) -> (i32, i32) {
    %c0_i32 = arith.constant 0 : i32
    %c0_i32_0 = arith.constant 0 : i32
    %c0_i32_1 = arith.constant 0 : i32
    return %c0_i32, %c0_i32_0 : i32, i32
  }
  func.func @transform_4(%arg0: i32) -> (i32, i32) {
    %c0_i32 = arith.constant 0 : i32
    %c0_i32_0 = arith.constant 0 : i32
    %c0_i32_1 = arith.constant 0 : i32
    return %c0_i32, %c0_i32_0 : i32, i32
  }
  func.func @transform_5(%arg0: i32) -> (i32, i32) {
    %c0_i32 = arith.constant 0 : i32
    %c0_i32_0 = arith.constant 0 : i32
    %c0_i32_1 = arith.constant 0 : i32
    return %c0_i32, %c0_i32_0 : i32, i32
  }
  func.func @transform_6(%arg0: i32) -> (i32, i32) {
    %c0_i32 = arith.constant 0 : i32
    %c0_i32_0 = arith.constant 0 : i32
    %c0_i32_1 = arith.constant 0 : i32
    return %c0_i32, %c0_i32_0 : i32, i32
  }
  func.func @transform_7(%arg0: i32) -> (i32, i32) {
    %c0_i32 = arith.constant 0 : i32
    %c0_i32_0 = arith.constant 0 : i32
    %c0_i32_1 = arith.constant 0 : i32
    return %c0_i32, %c0_i32_0 : i32, i32
  }
  func.func @transform_8(%arg0: i32) -> (i32, i32) {
    %c0_i32 = arith.constant 0 : i32
    %c0_i32_0 = arith.constant 0 : i32
    %c0_i32_1 = arith.constant 0 : i32
    return %c0_i32, %c0_i32_0 : i32, i32
  }
  func.func @transform_9(%arg0: i32) -> (i32, i32) {
    %c0_i32 = arith.constant 0 : i32
    %c0_i32_0 = arith.constant 0 : i32
    %c0_i32_1 = arith.constant 0 : i32
    return %c0_i32, %c0_i32_0 : i32, i32
  }
  func.func @transform_10(%arg0: i32) -> (i32, i32) {
    %c0_i32 = arith.constant 0 : i32
    %c0_i32_0 = arith.constant 0 : i32
    %c0_i32_1 = arith.constant 0 : i32
    return %c0_i32, %c0_i32_0 : i32, i32
  }
  func.func @transform_11(%arg0: i32) -> (i32, i32) {
    %c0_i32 = arith.constant 0 : i32
    %c0_i32_0 = arith.constant 0 : i32
    %c0_i32_1 = arith.constant 0 : i32
    return %c0_i32, %c0_i32_0 : i32, i32
  }
  func.func @transform_12(%arg0: i32) -> (i32, i32, i32) {
    %c0_i32 = arith.constant 0 : i32
    %c0_i32_0 = arith.constant 0 : i32
    %c0_i32_1 = arith.constant 0 : i32
    return %arg0, %c0_i32, %c0_i32_0 : i32, i32, i32
  }
}

module attributes {stable_mosaic.version = 11 : i64} {
  func.func @transformer_layer_kernel(%arg0: i32, %arg1: memref<1x8x32xf32, #tpu.memory_space<vmem>>, %arg2: memref<1x32xf32, #tpu.memory_space<vmem>>, %arg3: memref<1x32xf32, #tpu.memory_space<vmem>>, %arg4: memref<32x96xbf16, #tpu.memory_space<vmem>>, %arg5: memref<32x32xbf16, #tpu.memory_space<vmem>>, %arg6: memref<1x32xf32, #tpu.memory_space<vmem>>, %arg7: memref<1x32xf32, #tpu.memory_space<vmem>>, %arg8: memref<1x32xf32, #tpu.memory_space<vmem>>, %arg9: memref<32x128xbf16, #tpu.memory_space<vmem>>, %arg10: memref<1x128xf32, #tpu.memory_space<vmem>>, %arg11: memref<128x32xbf16, #tpu.memory_space<vmem>>, %arg12: memref<1x32xf32, #tpu.memory_space<vmem>>, %arg13: memref<1x8x32xf32, #tpu.memory_space<vmem>>, %arg14: memref<8x32xf32, #tpu.memory_space<vmem>>) attributes {dimension_semantics = [#tpu.dimension_semantics<parallel>], iteration_bounds = array<i64: 2>, scalar_prefetch = 0 : i64, scratch_operands = 1 : i64, tpu.core_type = #tpu.core_type<tc>, window_params = [{transform_indices = @transform_0, window_bounds = array<i64: 1, 8, 32>}, {pipeline_mode = #tpu.pipeline_mode<synchronous>, transform_indices = @transform_1, window_bounds = array<i64: 1, 32>}, {pipeline_mode = #tpu.pipeline_mode<synchronous>, transform_indices = @transform_2, window_bounds = array<i64: 1, 32>}, {pipeline_mode = #tpu.pipeline_mode<synchronous>, transform_indices = @transform_3, window_bounds = array<i64: 32, 96>}, {pipeline_mode = #tpu.pipeline_mode<synchronous>, transform_indices = @transform_4, window_bounds = array<i64: 32, 32>}, {pipeline_mode = #tpu.pipeline_mode<synchronous>, transform_indices = @transform_5, window_bounds = array<i64: 1, 32>}, {pipeline_mode = #tpu.pipeline_mode<synchronous>, transform_indices = @transform_6, window_bounds = array<i64: 1, 32>}, {pipeline_mode = #tpu.pipeline_mode<synchronous>, transform_indices = @transform_7, window_bounds = array<i64: 1, 32>}, {pipeline_mode = #tpu.pipeline_mode<synchronous>, transform_indices = @transform_8, window_bounds = array<i64: 32, 128>}, {pipeline_mode = #tpu.pipeline_mode<synchronous>, transform_indices = @transform_9, window_bounds = array<i64: 1, 128>}, {pipeline_mode = #tpu.pipeline_mode<synchronous>, transform_indices = @transform_10, window_bounds = array<i64: 128, 32>}, {pipeline_mode = #tpu.pipeline_mode<synchronous>, transform_indices = @transform_11, window_bounds = array<i64: 1, 32>}, {transform_indices = @transform_12, window_bounds = array<i64: 1, 8, 32>}]} {
    %c0 = arith.constant 0 : index
    %c0_0 = arith.constant 0 : index
    %c0_1 = arith.constant 0 : index
    %0 = vector.load %arg1[%c0, %c0_0, %c0_1] : memref<1x8x32xf32, #tpu.memory_space<vmem>>, vector<1x8x32xf32>
    %1 = vector.shape_cast %0 : vector<1x8x32xf32> to vector<8x32xf32>
    %c0_2 = arith.constant 0 : index
    %c0_3 = arith.constant 0 : index
    %2 = vector.load %arg2[%c0_2, %c0_3] : memref<1x32xf32, #tpu.memory_space<vmem>>, vector<1x32xf32>
    %c0_4 = arith.constant 0 : index
    %c0_5 = arith.constant 0 : index
    %3 = vector.load %arg3[%c0_4, %c0_5] : memref<1x32xf32, #tpu.memory_space<vmem>>, vector<1x32xf32>
    %cst = arith.constant dense<0.000000e+00> : vector<8xf32>
    %4 = vector.multi_reduction <add>, %1, %cst [1] : vector<8x32xf32> to vector<8xf32>
    %5 = vector.shape_cast %4 : vector<8xf32> to vector<8x1xf32>
    %cst_6 = arith.constant 3.200000e+01 : f32
    %6 = vector.broadcast %cst_6 : f32 to vector<8x1xf32>
    %7 = arith.divf %5, %6 : vector<8x1xf32>
    %8 = vector.broadcast %7 : vector<8x1xf32> to vector<8x32xf32>
    %9 = arith.subf %1, %8 : vector<8x32xf32>
    %10 = arith.mulf %9, %9 : vector<8x32xf32>
    %cst_7 = arith.constant dense<0.000000e+00> : vector<8xf32>
    %11 = vector.multi_reduction <add>, %10, %cst_7 [1] : vector<8x32xf32> to vector<8xf32>
    %12 = vector.shape_cast %11 : vector<8xf32> to vector<8x1xf32>
    %cst_8 = arith.constant 3.200000e+01 : f32
    %13 = vector.broadcast %cst_8 : f32 to vector<8x1xf32>
    %14 = arith.divf %12, %13 : vector<8x1xf32>
    %15 = vector.broadcast %7 : vector<8x1xf32> to vector<8x32xf32>
    %16 = arith.subf %1, %15 : vector<8x32xf32>
    %cst_9 = arith.constant 9.99999974E-6 : f32
    %17 = vector.broadcast %cst_9 : f32 to vector<8x1xf32>
    %18 = arith.addf %14, %17 : vector<8x1xf32>
    %19 = math.rsqrt %18 : vector<8x1xf32>
    %20 = vector.broadcast %19 : vector<8x1xf32> to vector<8x32xf32>
    %21 = arith.mulf %16, %20 : vector<8x32xf32>
    %22 = vector.broadcast %2 : vector<1x32xf32> to vector<8x32xf32>
    %23 = arith.mulf %22, %21 : vector<8x32xf32>
    %24 = vector.broadcast %3 : vector<1x32xf32> to vector<8x32xf32>
    %25 = arith.addf %23, %24 : vector<8x32xf32>
    %26 = arith.truncf %25 : vector<8x32xf32> to vector<8x32xbf16>
    %c0_10 = arith.constant 0 : index
    %c0_11 = arith.constant 0 : index
    %27 = vector.load %arg4[%c0_10, %c0_11] : memref<32x96xbf16, #tpu.memory_space<vmem>>, vector<32x96xbf16>
    %cst_12 = arith.constant dense<0.000000e+00> : vector<8x96xf32>
    %28 = tpu.matmul %26, %27, %cst_12 {dimension_numbers = #tpu.dot_dimension_numbers<[1], [0], [0], [1], [0, 0, 1, 1], [], []>} : vector<8x32xbf16>, vector<32x96xbf16>, vector<8x96xf32> -> vector<8x96xf32>
    %29 = tpu.iota {dimensions = array<i32: 0>} : vector<8x8xi32>
    %30 = tpu.iota {dimensions = array<i32: 1>} : vector<8x8xi32>
    %31 = arith.cmpi sgt, %30, %29 : vector<8x8xi32>
    %cst_13 = arith.constant -1.000000e+30 : f32
    %cst_14 = arith.constant 0.000000e+00 : f32
    %32 = vector.broadcast %cst_13 : f32 to vector<8x8xf32>
    %33 = vector.broadcast %cst_14 : f32 to vector<8x8xf32>
    %34 = arith.select %31, %32, %33 : vector<8x8xi1>, vector<8x8xf32>
    %35 = arith.truncf %28 : vector<8x96xf32> to vector<8x96xbf16>
    %36 = vector.shape_cast %34 : vector<8x8xf32> to vector<1x8x8xf32>
    %37 = vector.extract_strided_slice %35 {offsets = [0, 0], sizes = [8, 16], strides = [1, 1]} : vector<8x96xbf16> to vector<8x16xbf16>
    %38 = vector.shape_cast %37 : vector<8x16xbf16> to vector<1x8x16xbf16>
    %39 = vector.extract_strided_slice %35 {offsets = [0, 32], sizes = [8, 16], strides = [1, 1]} : vector<8x96xbf16> to vector<8x16xbf16>
    %40 = vector.shape_cast %39 : vector<8x16xbf16> to vector<1x8x16xbf16>
    %41 = vector.extract_strided_slice %35 {offsets = [0, 64], sizes = [8, 16], strides = [1, 1]} : vector<8x96xbf16> to vector<8x16xbf16>
    %42 = vector.shape_cast %41 : vector<8x16xbf16> to vector<1x8x16xbf16>
    "tpu.trace_start"() <{level = 10 : i32, message = "bqd,bkd->bqk"}> : () -> ()
    %cst_15 = arith.constant dense<0.000000e+00> : vector<1x8x8xf32>
    %43 = tpu.matmul %38, %40, %cst_15 {dimension_numbers = #tpu.dot_dimension_numbers<[2], [2], [1], [1], [0, 0, 0, 1, 1, 1], [0], [0]>} : vector<1x8x16xbf16>, vector<1x8x16xbf16>, vector<1x8x8xf32> -> vector<1x8x8xf32>
    "tpu.trace_stop"() : () -> ()
    %44 = arith.addf %43, %36 : vector<1x8x8xf32>
    %cst_16 = arith.constant dense<0xFF800000> : vector<1x8xf32>
    %45 = vector.multi_reduction <maximumf>, %44, %cst_16 [2] : vector<1x8x8xf32> to vector<1x8xf32>
    %46 = vector.shape_cast %45 : vector<1x8xf32> to vector<1x8x1xf32>
    %47 = vector.broadcast %46 : vector<1x8x1xf32> to vector<1x8x8xf32>
    %48 = arith.subf %44, %47 : vector<1x8x8xf32>
    %49 = math.exp %48 : vector<1x8x8xf32>
    %cst_17 = arith.constant dense<0.000000e+00> : vector<1x8xf32>
    %50 = vector.multi_reduction <add>, %49, %cst_17 [2] : vector<1x8x8xf32> to vector<1x8xf32>
    %51 = vector.shape_cast %50 : vector<1x8xf32> to vector<1x8x1xf32>
    %52 = tpu.reciprocal %51 {approx = true} : vector<1x8x1xf32> -> vector<1x8x1xf32>
    %53 = vector.broadcast %52 : vector<1x8x1xf32> to vector<1x8x8xf32>
    %54 = arith.mulf %49, %53 : vector<1x8x8xf32>
    %55 = arith.truncf %54 : vector<1x8x8xf32> to vector<1x8x8xbf16>
    "tpu.trace_start"() <{level = 10 : i32, message = "bqk,bkd->bqd"}> : () -> ()
    %cst_18 = arith.constant dense<0.000000e+00> : vector<1x8x16xf32>
    %56 = tpu.matmul %55, %42, %cst_18 {dimension_numbers = #tpu.dot_dimension_numbers<[2], [1], [1], [2], [0, 0, 0, 1, 1, 2], [0], [0]>} : vector<1x8x8xbf16>, vector<1x8x16xbf16>, vector<1x8x16xf32> -> vector<1x8x16xf32>
    "tpu.trace_stop"() : () -> ()
    %57 = vector.shape_cast %56 : vector<1x8x16xf32> to vector<8x16xf32>
    %c0_19 = arith.constant 0 : index
    %c0_20 = arith.constant 0 : index
    %58 = vector.load %arg14[%c0_19, %c0_20] : memref<8x32xf32, #tpu.memory_space<vmem>>, vector<8x16xf32>
    tpu.vector_store %arg14[%c0_19, %c0_20], %57 {strides = array<i32>} : memref<8x32xf32, #tpu.memory_space<vmem>>, vector<8x16xf32>,
    %59 = vector.extract_strided_slice %35 {offsets = [0, 16], sizes = [8, 16], strides = [1, 1]} : vector<8x96xbf16> to vector<8x16xbf16>
    %60 = vector.shape_cast %59 : vector<8x16xbf16> to vector<1x8x16xbf16>
    %61 = vector.extract_strided_slice %35 {offsets = [0, 48], sizes = [8, 16], strides = [1, 1]} : vector<8x96xbf16> to vector<8x16xbf16>
    %62 = vector.shape_cast %61 : vector<8x16xbf16> to vector<1x8x16xbf16>
    %63 = vector.extract_strided_slice %35 {offsets = [0, 80], sizes = [8, 16], strides = [1, 1]} : vector<8x96xbf16> to vector<8x16xbf16>
    %64 = vector.shape_cast %63 : vector<8x16xbf16> to vector<1x8x16xbf16>
    "tpu.trace_start"() <{level = 10 : i32, message = "bqd,bkd->bqk"}> : () -> ()
    %cst_21 = arith.constant dense<0.000000e+00> : vector<1x8x8xf32>
    %65 = tpu.matmul %60, %62, %cst_21 {dimension_numbers = #tpu.dot_dimension_numbers<[2], [2], [1], [1], [0, 0, 0, 1, 1, 1], [0], [0]>} : vector<1x8x16xbf16>, vector<1x8x16xbf16>, vector<1x8x8xf32> -> vector<1x8x8xf32>
    "tpu.trace_stop"() : () -> ()
    %66 = arith.addf %65, %36 : vector<1x8x8xf32>
    %cst_22 = arith.constant dense<0xFF800000> : vector<1x8xf32>
    %67 = vector.multi_reduction <maximumf>, %66, %cst_22 [2] : vector<1x8x8xf32> to vector<1x8xf32>
    %68 = vector.shape_cast %67 : vector<1x8xf32> to vector<1x8x1xf32>
    %69 = vector.broadcast %68 : vector<1x8x1xf32> to vector<1x8x8xf32>
    %70 = arith.subf %66, %69 : vector<1x8x8xf32>
    %71 = math.exp %70 : vector<1x8x8xf32>
    %cst_23 = arith.constant dense<0.000000e+00> : vector<1x8xf32>
    %72 = vector.multi_reduction <add>, %71, %cst_23 [2] : vector<1x8x8xf32> to vector<1x8xf32>
    %73 = vector.shape_cast %72 : vector<1x8xf32> to vector<1x8x1xf32>
    %74 = tpu.reciprocal %73 {approx = true} : vector<1x8x1xf32> -> vector<1x8x1xf32>
    %75 = vector.broadcast %74 : vector<1x8x1xf32> to vector<1x8x8xf32>
    %76 = arith.mulf %71, %75 : vector<1x8x8xf32>
    %77 = arith.truncf %76 : vector<1x8x8xf32> to vector<1x8x8xbf16>
    "tpu.trace_start"() <{level = 10 : i32, message = "bqk,bkd->bqd"}> : () -> ()
    %cst_24 = arith.constant dense<0.000000e+00> : vector<1x8x16xf32>
    %78 = tpu.matmul %77, %64, %cst_24 {dimension_numbers = #tpu.dot_dimension_numbers<[2], [1], [1], [2], [0, 0, 0, 1, 1, 2], [0], [0]>} : vector<1x8x8xbf16>, vector<1x8x16xbf16>, vector<1x8x16xf32> -> vector<1x8x16xf32>
    "tpu.trace_stop"() : () -> ()
    %79 = vector.shape_cast %78 : vector<1x8x16xf32> to vector<8x16xf32>
    %c0_25 = arith.constant 0 : index
    %c16 = arith.constant 16 : index
    %80 = vector.load %arg14[%c0_25, %c16] : memref<8x32xf32, #tpu.memory_space<vmem>>, vector<8x16xf32>
    tpu.vector_store %arg14[%c0_25, %c16], %79 {strides = array<i32>} : memref<8x32xf32, #tpu.memory_space<vmem>>, vector<8x16xf32>,
    %c0_26 = arith.constant 0 : index
    %c0_27 = arith.constant 0 : index
    %81 = vector.load %arg14[%c0_26, %c0_27] : memref<8x32xf32, #tpu.memory_space<vmem>>, vector<8x32xf32>
    %82 = arith.truncf %81 : vector<8x32xf32> to vector<8x32xbf16>
    %c0_28 = arith.constant 0 : index
    %c0_29 = arith.constant 0 : index
    %83 = vector.load %arg5[%c0_28, %c0_29] : memref<32x32xbf16, #tpu.memory_space<vmem>>, vector<32x32xbf16>
    %cst_30 = arith.constant dense<0.000000e+00> : vector<8x32xf32>
    %84 = tpu.matmul %82, %83, %cst_30 {dimension_numbers = #tpu.dot_dimension_numbers<[1], [0], [0], [1], [0, 0, 1, 1], [], []>} : vector<8x32xbf16>, vector<32x32xbf16>, vector<8x32xf32> -> vector<8x32xf32>
    %c0_31 = arith.constant 0 : index
    %c0_32 = arith.constant 0 : index
    %85 = vector.load %arg6[%c0_31, %c0_32] : memref<1x32xf32, #tpu.memory_space<vmem>>, vector<1x32xf32>
    %86 = vector.broadcast %85 : vector<1x32xf32> to vector<8x32xf32>
    %87 = arith.addf %84, %86 : vector<8x32xf32>
    %88 = arith.addf %1, %87 : vector<8x32xf32>
    %c0_33 = arith.constant 0 : index
    %c0_34 = arith.constant 0 : index
    %89 = vector.load %arg7[%c0_33, %c0_34] : memref<1x32xf32, #tpu.memory_space<vmem>>, vector<1x32xf32>
    %c0_35 = arith.constant 0 : index
    %c0_36 = arith.constant 0 : index
    %90 = vector.load %arg8[%c0_35, %c0_36] : memref<1x32xf32, #tpu.memory_space<vmem>>, vector<1x32xf32>
    %cst_37 = arith.constant dense<0.000000e+00> : vector<8xf32>
    %91 = vector.multi_reduction <add>, %88, %cst_37 [1] : vector<8x32xf32> to vector<8xf32>
    %92 = vector.shape_cast %91 : vector<8xf32> to vector<8x1xf32>
    %cst_38 = arith.constant 3.200000e+01 : f32
    %93 = vector.broadcast %cst_38 : f32 to vector<8x1xf32>
    %94 = arith.divf %92, %93 : vector<8x1xf32>
    %95 = vector.broadcast %94 : vector<8x1xf32> to vector<8x32xf32>
    %96 = arith.subf %88, %95 : vector<8x32xf32>
    %97 = arith.mulf %96, %96 : vector<8x32xf32>
    %cst_39 = arith.constant dense<0.000000e+00> : vector<8xf32>
    %98 = vector.multi_reduction <add>, %97, %cst_39 [1] : vector<8x32xf32> to vector<8xf32>
    %99 = vector.shape_cast %98 : vector<8xf32> to vector<8x1xf32>
    %cst_40 = arith.constant 3.200000e+01 : f32
    %100 = vector.broadcast %cst_40 : f32 to vector<8x1xf32>
    %101 = arith.divf %99, %100 : vector<8x1xf32>
    %102 = vector.broadcast %94 : vector<8x1xf32> to vector<8x32xf32>
    %103 = arith.subf %88, %102 : vector<8x32xf32>
    %cst_41 = arith.constant 9.99999974E-6 : f32
    %104 = vector.broadcast %cst_41 : f32 to vector<8x1xf32>
    %105 = arith.addf %101, %104 : vector<8x1xf32>
    %106 = math.rsqrt %105 : vector<8x1xf32>
    %107 = vector.broadcast %106 : vector<8x1xf32> to vector<8x32xf32>
    %108 = arith.mulf %103, %107 : vector<8x32xf32>
    %109 = vector.broadcast %89 : vector<1x32xf32> to vector<8x32xf32>
    %110 = arith.mulf %109, %108 : vector<8x32xf32>
    %111 = vector.broadcast %90 : vector<1x32xf32> to vector<8x32xf32>
    %112 = arith.addf %110, %111 : vector<8x32xf32>
    %113 = arith.truncf %112 : vector<8x32xf32> to vector<8x32xbf16>
    %c0_42 = arith.constant 0 : index
    %c0_43 = arith.constant 0 : index
    %114 = vector.load %arg9[%c0_42, %c0_43] : memref<32x128xbf16, #tpu.memory_space<vmem>>, vector<32x128xbf16>
    %cst_44 = arith.constant dense<0.000000e+00> : vector<8x128xf32>
    %115 = tpu.matmul %113, %114, %cst_44 {dimension_numbers = #tpu.dot_dimension_numbers<[1], [0], [0], [1], [0, 0, 1, 1], [], []>} : vector<8x32xbf16>, vector<32x128xbf16>, vector<8x128xf32> -> vector<8x128xf32>
    %c0_45 = arith.constant 0 : index
    %c0_46 = arith.constant 0 : index
    %116 = vector.load %arg10[%c0_45, %c0_46] : memref<1x128xf32, #tpu.memory_space<vmem>>, vector<1x128xf32>
    %117 = vector.broadcast %116 : vector<1x128xf32> to vector<8x128xf32>
    %118 = arith.addf %115, %117 : vector<8x128xf32>
    %cst_47 = arith.constant 5.000000e-01 : f32
    %119 = vector.broadcast %cst_47 : f32 to vector<8x128xf32>
    %120 = arith.mulf %119, %118 : vector<8x128xf32>
    %cst_48 = arith.constant 0.707106769 : f32
    %121 = vector.broadcast %cst_48 : f32 to vector<8x128xf32>
    %122 = arith.mulf %118, %121 : vector<8x128xf32>
    %123 = math.erf %122 : vector<8x128xf32>
    %cst_49 = arith.constant 1.000000e+00 : f32
    %124 = vector.broadcast %cst_49 : f32 to vector<8x128xf32>
    %125 = arith.addf %124, %123 : vector<8x128xf32>
    %126 = arith.mulf %120, %125 : vector<8x128xf32>
    %127 = arith.truncf %126 : vector<8x128xf32> to vector<8x128xbf16>
    %c0_50 = arith.constant 0 : index
    %c0_51 = arith.constant 0 : index
    %128 = vector.load %arg11[%c0_50, %c0_51] : memref<128x32xbf16, #tpu.memory_space<vmem>>, vector<128x32xbf16>
    %cst_52 = arith.constant dense<0.000000e+00> : vector<8x32xf32>
    %129 = tpu.matmul %127, %128, %cst_52 {dimension_numbers = #tpu.dot_dimension_numbers<[1], [0], [0], [1], [0, 0, 1, 1], [], []>} : vector<8x128xbf16>, vector<128x32xbf16>, vector<8x32xf32> -> vector<8x32xf32>
    %c0_53 = arith.constant 0 : index
    %c0_54 = arith.constant 0 : index
    %130 = vector.load %arg12[%c0_53, %c0_54] : memref<1x32xf32, #tpu.memory_space<vmem>>, vector<1x32xf32>
    %131 = vector.broadcast %130 : vector<1x32xf32> to vector<8x32xf32>
    %132 = arith.addf %129, %131 : vector<8x32xf32>
    %133 = arith.addf %88, %132 : vector<8x32xf32>
    %134 = vector.shape_cast %133 : vector<8x32xf32> to vector<1x8x32xf32>
    %c0_55 = arith.constant 0 : index
    %c0_56 = arith.constant 0 : index
    %c0_57 = arith.constant 0 : index
    %135 = vector.load %arg13[%c0_55, %c0_56, %c0_57] : memref<1x8x32xf32, #tpu.memory_space<vmem>>, vector<1x8x32xf32>
    tpu.vector_store %arg13[%c0_55, %c0_56, %c0_57], %134 {strides = array<i32>} : memref<1x8x32xf32, #tpu.memory_space<vmem>>, vector<1x8x32xf32>,
    return
  }
  func.func @transform_0(%arg0: i32) -> (i32, i32, i32) {
    %c0_i32 = arith.constant 0 : i32
    %c0_i32_0 = arith.constant 0 : i32
    %c0_i32_1 = arith.constant 0 : i32
    return %arg0, %c0_i32, %c0_i32_0 : i32, i32, i32
  }
  func.func @transform_1(%arg0: i32) -> (i32, i32) {
    %c0_i32 = arith.constant 0 : i32
    %c0_i32_0 = arith.constant 0 : i32
    %c0_i32_1 = arith.constant 0 : i32
    return %c0_i32, %c0_i32_0 : i32, i32
  }
  func.func @transform_2(%arg0: i32) -> (i32, i32) {
    %c0_i32 = arith.constant 0 : i32
    %c0_i32_0 = arith.constant 0 : i32
    %c0_i32_1 = arith.constant 0 : i32
    return %c0_i32, %c0_i32_0 : i32, i32
  }
  func.func @transform_3(%arg0: i32) -> (i32, i32) {
    %c0_i32 = arith.constant 0 : i32
    %c0_i32_0 = arith.constant 0 : i32
    %c0_i32_1 = arith.constant 0 : i32
    return %c0_i32, %c0_i32_0 : i32, i32
  }
  func.func @transform_4(%arg0: i32) -> (i32, i32) {
    %c0_i32 = arith.constant 0 : i32
    %c0_i32_0 = arith.constant 0 : i32
    %c0_i32_1 = arith.constant 0 : i32
    return %c0_i32, %c0_i32_0 : i32, i32
  }
  func.func @transform_5(%arg0: i32) -> (i32, i32) {
    %c0_i32 = arith.constant 0 : i32
    %c0_i32_0 = arith.constant 0 : i32
    %c0_i32_1 = arith.constant 0 : i32
    return %c0_i32, %c0_i32_0 : i32, i32
  }
  func.func @transform_6(%arg0: i32) -> (i32, i32) {
    %c0_i32 = arith.constant 0 : i32
    %c0_i32_0 = arith.constant 0 : i32
    %c0_i32_1 = arith.constant 0 : i32
    return %c0_i32, %c0_i32_0 : i32, i32
  }
  func.func @transform_7(%arg0: i32) -> (i32, i32) {
    %c0_i32 = arith.constant 0 : i32
    %c0_i32_0 = arith.constant 0 : i32
    %c0_i32_1 = arith.constant 0 : i32
    return %c0_i32, %c0_i32_0 : i32, i32
  }
  func.func @transform_8(%arg0: i32) -> (i32, i32) {
    %c0_i32 = arith.constant 0 : i32
    %c0_i32_0 = arith.constant 0 : i32
    %c0_i32_1 = arith.constant 0 : i32
    return %c0_i32, %c0_i32_0 : i32, i32
  }
  func.func @transform_9(%arg0: i32) -> (i32, i32) {
    %c0_i32 = arith.constant 0 : i32
    %c0_i32_0 = arith.constant 0 : i32
    %c0_i32_1 = arith.constant 0 : i32
    return %c0_i32, %c0_i32_0 : i32, i32
  }
  func.func @transform_10(%arg0: i32) -> (i32, i32) {
    %c0_i32 = arith.constant 0 : i32
    %c0_i32_0 = arith.constant 0 : i32
    %c0_i32_1 = arith.constant 0 : i32
    return %c0_i32, %c0_i32_0 : i32, i32
  }
  func.func @transform_11(%arg0: i32) -> (i32, i32) {
    %c0_i32 = arith.constant 0 : i32
    %c0_i32_0 = arith.constant 0 : i32
    %c0_i32_1 = arith.constant 0 : i32
    return %c0_i32, %c0_i32_0 : i32, i32
  }
  func.func @transform_12(%arg0: i32) -> (i32, i32, i32) {
    %c0_i32 = arith.constant 0 : i32
    %c0_i32_0 = arith.constant 0 : i32
    %c0_i32_1 = arith.constant 0 : i32
    return %arg0, %c0_i32, %c0_i32_0 : i32, i32, i32
  }
}

module attributes {stable_mosaic.version = 11 : i64} {
  func.func @transformer_layer_kernel(%arg0: i32, %arg1: memref<1x8x32xf32, #tpu.memory_space<vmem>>, %arg2: memref<1x32xf32, #tpu.memory_space<vmem>>, %arg3: memref<1x32xf32, #tpu.memory_space<vmem>>, %arg4: memref<32x96xbf16, #tpu.memory_space<vmem>>, %arg5: memref<32x32xbf16, #tpu.memory_space<vmem>>, %arg6: memref<1x32xf32, #tpu.memory_space<vmem>>, %arg7: memref<1x32xf32, #tpu.memory_space<vmem>>, %arg8: memref<1x32xf32, #tpu.memory_space<vmem>>, %arg9: memref<32x128xbf16, #tpu.memory_space<vmem>>, %arg10: memref<1x128xf32, #tpu.memory_space<vmem>>, %arg11: memref<128x32xbf16, #tpu.memory_space<vmem>>, %arg12: memref<1x32xf32, #tpu.memory_space<vmem>>, %arg13: memref<1x8x32xf32, #tpu.memory_space<vmem>>, %arg14: memref<8x32xf32, #tpu.memory_space<vmem>>) attributes {dimension_semantics = [#tpu.dimension_semantics<parallel>], iteration_bounds = array<i64: 2>, scalar_prefetch = 0 : i64, scratch_operands = 1 : i64, tpu.core_type = #tpu.core_type<tc>, window_params = [{transform_indices = @transform_0, window_bounds = array<i64: 1, 8, 32>}, {pipeline_mode = #tpu.pipeline_mode<synchronous>, transform_indices = @transform_1, window_bounds = array<i64: 1, 32>}, {pipeline_mode = #tpu.pipeline_mode<synchronous>, transform_indices = @transform_2, window_bounds = array<i64: 1, 32>}, {pipeline_mode = #tpu.pipeline_mode<synchronous>, transform_indices = @transform_3, window_bounds = array<i64: 32, 96>}, {pipeline_mode = #tpu.pipeline_mode<synchronous>, transform_indices = @transform_4, window_bounds = array<i64: 32, 32>}, {pipeline_mode = #tpu.pipeline_mode<synchronous>, transform_indices = @transform_5, window_bounds = array<i64: 1, 32>}, {pipeline_mode = #tpu.pipeline_mode<synchronous>, transform_indices = @transform_6, window_bounds = array<i64: 1, 32>}, {pipeline_mode = #tpu.pipeline_mode<synchronous>, transform_indices = @transform_7, window_bounds = array<i64: 1, 32>}, {pipeline_mode = #tpu.pipeline_mode<synchronous>, transform_indices = @transform_8, window_bounds = array<i64: 32, 128>}, {pipeline_mode = #tpu.pipeline_mode<synchronous>, transform_indices = @transform_9, window_bounds = array<i64: 1, 128>}, {pipeline_mode = #tpu.pipeline_mode<synchronous>, transform_indices = @transform_10, window_bounds = array<i64: 128, 32>}, {pipeline_mode = #tpu.pipeline_mode<synchronous>, transform_indices = @transform_11, window_bounds = array<i64: 1, 32>}, {transform_indices = @transform_12, window_bounds = array<i64: 1, 8, 32>}]} {
    %c0 = arith.constant 0 : index
    %c0_0 = arith.constant 0 : index
    %c0_1 = arith.constant 0 : index
    %0 = vector.load %arg1[%c0, %c0_0, %c0_1] : memref<1x8x32xf32, #tpu.memory_space<vmem>>, vector<1x8x32xf32>
    %1 = vector.shape_cast %0 : vector<1x8x32xf32> to vector<8x32xf32>
    %c0_2 = arith.constant 0 : index
    %c0_3 = arith.constant 0 : index
    %2 = vector.load %arg2[%c0_2, %c0_3] : memref<1x32xf32, #tpu.memory_space<vmem>>, vector<1x32xf32>
    %c0_4 = arith.constant 0 : index
    %c0_5 = arith.constant 0 : index
    %3 = vector.load %arg3[%c0_4, %c0_5] : memref<1x32xf32, #tpu.memory_space<vmem>>, vector<1x32xf32>
    %cst = arith.constant dense<0.000000e+00> : vector<8xf32>
    %4 = vector.multi_reduction <add>, %1, %cst [1] : vector<8x32xf32> to vector<8xf32>
    %5 = vector.shape_cast %4 : vector<8xf32> to vector<8x1xf32>
    %cst_6 = arith.constant 3.200000e+01 : f32
    %6 = vector.broadcast %cst_6 : f32 to vector<8x1xf32>
    %7 = arith.divf %5, %6 : vector<8x1xf32>
    %8 = vector.broadcast %7 : vector<8x1xf32> to vector<8x32xf32>
    %9 = arith.subf %1, %8 : vector<8x32xf32>
    %10 = arith.mulf %9, %9 : vector<8x32xf32>
    %cst_7 = arith.constant dense<0.000000e+00> : vector<8xf32>
    %11 = vector.multi_reduction <add>, %10, %cst_7 [1] : vector<8x32xf32> to vector<8xf32>
    %12 = vector.shape_cast %11 : vector<8xf32> to vector<8x1xf32>
    %cst_8 = arith.constant 3.200000e+01 : f32
    %13 = vector.broadcast %cst_8 : f32 to vector<8x1xf32>
    %14 = arith.divf %12, %13 : vector<8x1xf32>
    %15 = vector.broadcast %7 : vector<8x1xf32> to vector<8x32xf32>
    %16 = arith.subf %1, %15 : vector<8x32xf32>
    %cst_9 = arith.constant 9.99999974E-6 : f32
    %17 = vector.broadcast %cst_9 : f32 to vector<8x1xf32>
    %18 = arith.addf %14, %17 : vector<8x1xf32>
    %19 = math.rsqrt %18 : vector<8x1xf32>
    %20 = vector.broadcast %19 : vector<8x1xf32> to vector<8x32xf32>
    %21 = arith.mulf %16, %20 : vector<8x32xf32>
    %22 = vector.broadcast %2 : vector<1x32xf32> to vector<8x32xf32>
    %23 = arith.mulf %22, %21 : vector<8x32xf32>
    %24 = vector.broadcast %3 : vector<1x32xf32> to vector<8x32xf32>
    %25 = arith.addf %23, %24 : vector<8x32xf32>
    %26 = arith.truncf %25 : vector<8x32xf32> to vector<8x32xbf16>
    %c0_10 = arith.constant 0 : index
    %c0_11 = arith.constant 0 : index
    %27 = vector.load %arg4[%c0_10, %c0_11] : memref<32x96xbf16, #tpu.memory_space<vmem>>, vector<32x96xbf16>
    %cst_12 = arith.constant dense<0.000000e+00> : vector<8x96xf32>
    %28 = tpu.matmul %26, %27, %cst_12 {dimension_numbers = #tpu.dot_dimension_numbers<[1], [0], [0], [1], [0, 0, 1, 1], [], []>} : vector<8x32xbf16>, vector<32x96xbf16>, vector<8x96xf32> -> vector<8x96xf32>
    %29 = tpu.iota {dimensions = array<i32: 0>} : vector<8x8xi32>
    %30 = tpu.iota {dimensions = array<i32: 1>} : vector<8x8xi32>
    %31 = arith.cmpi sgt, %30, %29 : vector<8x8xi32>
    %cst_13 = arith.constant -1.000000e+30 : f32
    %cst_14 = arith.constant 0.000000e+00 : f32
    %32 = vector.broadcast %cst_13 : f32 to vector<8x8xf32>
    %33 = vector.broadcast %cst_14 : f32 to vector<8x8xf32>
    %34 = arith.select %31, %32, %33 : vector<8x8xi1>, vector<8x8xf32>
    %35 = arith.truncf %28 : vector<8x96xf32> to vector<8x96xbf16>
    %36 = vector.extract_strided_slice %35 {offsets = [0, 0], sizes = [8, 32], strides = [1, 1]} : vector<8x96xbf16> to vector<8x32xbf16>
    %37 = vector.shape_cast %36 : vector<8x32xbf16> to vector<1x8x2x16xbf16>
    %38 = vector.extract_strided_slice %35 {offsets = [0, 32], sizes = [8, 32], strides = [1, 1]} : vector<8x96xbf16> to vector<8x32xbf16>
    %39 = vector.shape_cast %38 : vector<8x32xbf16> to vector<1x8x2x16xbf16>
    %40 = vector.extract_strided_slice %35 {offsets = [0, 64], sizes = [8, 32], strides = [1, 1]} : vector<8x96xbf16> to vector<8x32xbf16>
    %41 = vector.shape_cast %40 : vector<8x32xbf16> to vector<1x8x2x16xbf16>
    %42 = tpu.transpose %37, [0, 2, 1, 3] : vector<1x8x2x16xbf16> -> vector<1x2x8x16xbf16>
    %43 = vector.shape_cast %42 : vector<1x2x8x16xbf16> to vector<2x8x16xbf16>
    %44 = tpu.transpose %39, [0, 2, 1, 3] : vector<1x8x2x16xbf16> -> vector<1x2x8x16xbf16>
    %45 = vector.shape_cast %44 : vector<1x2x8x16xbf16> to vector<2x8x16xbf16>
    %46 = tpu.transpose %41, [0, 2, 1, 3] : vector<1x8x2x16xbf16> -> vector<1x2x8x16xbf16>
    %47 = vector.shape_cast %46 : vector<1x2x8x16xbf16> to vector<2x8x16xbf16>
    "tpu.trace_start"() <{level = 10 : i32, message = "bqd,bkd->bqk"}> : () -> ()
    %cst_15 = arith.constant dense<0.000000e+00> : vector<2x8x8xf32>
    %48 = tpu.matmul %43, %45, %cst_15 {dimension_numbers = #tpu.dot_dimension_numbers<[2], [2], [1], [1], [0, 0, 0, 1, 1, 1], [0], [0]>} : vector<2x8x16xbf16>, vector<2x8x16xbf16>, vector<2x8x8xf32> -> vector<2x8x8xf32>
    "tpu.trace_stop"() : () -> ()
    %49 = vector.shape_cast %34 : vector<8x8xf32> to vector<1x8x8xf32>
    %50 = vector.broadcast %49 : vector<1x8x8xf32> to vector<2x8x8xf32>
    %51 = arith.addf %48, %50 : vector<2x8x8xf32>
    %cst_16 = arith.constant dense<0xFF800000> : vector<2x8xf32>
    %52 = vector.multi_reduction <maximumf>, %51, %cst_16 [2] : vector<2x8x8xf32> to vector<2x8xf32>
    %53 = vector.shape_cast %52 : vector<2x8xf32> to vector<2x8x1xf32>
    %54 = vector.broadcast %53 : vector<2x8x1xf32> to vector<2x8x8xf32>
    %55 = arith.subf %51, %54 : vector<2x8x8xf32>
    %56 = math.exp %55 : vector<2x8x8xf32>
    %cst_17 = arith.constant dense<0.000000e+00> : vector<2x8xf32>
    %57 = vector.multi_reduction <add>, %56, %cst_17 [2] : vector<2x8x8xf32> to vector<2x8xf32>
    %58 = vector.shape_cast %57 : vector<2x8xf32> to vector<2x8x1xf32>
    %59 = tpu.reciprocal %58 {approx = true} : vector<2x8x1xf32> -> vector<2x8x1xf32>
    %60 = vector.broadcast %59 : vector<2x8x1xf32> to vector<2x8x8xf32>
    %61 = arith.mulf %56, %60 : vector<2x8x8xf32>
    %62 = arith.truncf %61 : vector<2x8x8xf32> to vector<2x8x8xbf16>
    "tpu.trace_start"() <{level = 10 : i32, message = "bqk,bkd->bqd"}> : () -> ()
    %cst_18 = arith.constant dense<0.000000e+00> : vector<2x8x16xf32>
    %63 = tpu.matmul %62, %47, %cst_18 {dimension_numbers = #tpu.dot_dimension_numbers<[2], [1], [1], [2], [0, 0, 0, 1, 1, 2], [0], [0]>} : vector<2x8x8xbf16>, vector<2x8x16xbf16>, vector<2x8x16xf32> -> vector<2x8x16xf32>
    "tpu.trace_stop"() : () -> ()
    %64 = vector.shape_cast %63 : vector<2x8x16xf32> to vector<1x2x8x16xf32>
    %65 = tpu.transpose %64, [0, 2, 1, 3] : vector<1x2x8x16xf32> -> vector<1x8x2x16xf32>
    %66 = vector.shape_cast %65 : vector<1x8x2x16xf32> to vector<8x32xf32>
    %67 = arith.truncf %66 : vector<8x32xf32> to vector<8x32xbf16>
    %c0_19 = arith.constant 0 : index
    %c0_20 = arith.constant 0 : index
    %68 = vector.load %arg5[%c0_19, %c0_20] : memref<32x32xbf16, #tpu.memory_space<vmem>>, vector<32x32xbf16>
    %cst_21 = arith.constant dense<0.000000e+00> : vector<8x32xf32>
    %69 = tpu.matmul %67, %68, %cst_21 {dimension_numbers = #tpu.dot_dimension_numbers<[1], [0], [0], [1], [0, 0, 1, 1], [], []>} : vector<8x32xbf16>, vector<32x32xbf16>, vector<8x32xf32> -> vector<8x32xf32>
    %c0_22 = arith.constant 0 : index
    %c0_23 = arith.constant 0 : index
    %70 = vector.load %arg6[%c0_22, %c0_23] : memref<1x32xf32, #tpu.memory_space<vmem>>, vector<1x32xf32>
    %71 = vector.broadcast %70 : vector<1x32xf32> to vector<8x32xf32>
    %72 = arith.addf %69, %71 : vector<8x32xf32>
    %73 = arith.addf %1, %72 : vector<8x32xf32>
    %c0_24 = arith.constant 0 : index
    %c0_25 = arith.constant 0 : index
    %74 = vector.load %arg7[%c0_24, %c0_25] : memref<1x32xf32, #tpu.memory_space<vmem>>, vector<1x32xf32>
    %c0_26 = arith.constant 0 : index
    %c0_27 = arith.constant 0 : index
    %75 = vector.load %arg8[%c0_26, %c0_27] : memref<1x32xf32, #tpu.memory_space<vmem>>, vector<1x32xf32>
    %cst_28 = arith.constant dense<0.000000e+00> : vector<8xf32>
    %76 = vector.multi_reduction <add>, %73, %cst_28 [1] : vector<8x32xf32> to vector<8xf32>
    %77 = vector.shape_cast %76 : vector<8xf32> to vector<8x1xf32>
    %cst_29 = arith.constant 3.200000e+01 : f32
    %78 = vector.broadcast %cst_29 : f32 to vector<8x1xf32>
    %79 = arith.divf %77, %78 : vector<8x1xf32>
    %80 = vector.broadcast %79 : vector<8x1xf32> to vector<8x32xf32>
    %81 = arith.subf %73, %80 : vector<8x32xf32>
    %82 = arith.mulf %81, %81 : vector<8x32xf32>
    %cst_30 = arith.constant dense<0.000000e+00> : vector<8xf32>
    %83 = vector.multi_reduction <add>, %82, %cst_30 [1] : vector<8x32xf32> to vector<8xf32>
    %84 = vector.shape_cast %83 : vector<8xf32> to vector<8x1xf32>
    %cst_31 = arith.constant 3.200000e+01 : f32
    %85 = vector.broadcast %cst_31 : f32 to vector<8x1xf32>
    %86 = arith.divf %84, %85 : vector<8x1xf32>
    %87 = vector.broadcast %79 : vector<8x1xf32> to vector<8x32xf32>
    %88 = arith.subf %73, %87 : vector<8x32xf32>
    %cst_32 = arith.constant 9.99999974E-6 : f32
    %89 = vector.broadcast %cst_32 : f32 to vector<8x1xf32>
    %90 = arith.addf %86, %89 : vector<8x1xf32>
    %91 = math.rsqrt %90 : vector<8x1xf32>
    %92 = vector.broadcast %91 : vector<8x1xf32> to vector<8x32xf32>
    %93 = arith.mulf %88, %92 : vector<8x32xf32>
    %94 = vector.broadcast %74 : vector<1x32xf32> to vector<8x32xf32>
    %95 = arith.mulf %94, %93 : vector<8x32xf32>
    %96 = vector.broadcast %75 : vector<1x32xf32> to vector<8x32xf32>
    %97 = arith.addf %95, %96 : vector<8x32xf32>
    %98 = arith.truncf %97 : vector<8x32xf32> to vector<8x32xbf16>
    %c0_33 = arith.constant 0 : index
    %c0_34 = arith.constant 0 : index
    %99 = vector.load %arg9[%c0_33, %c0_34] : memref<32x128xbf16, #tpu.memory_space<vmem>>, vector<32x128xbf16>
    %cst_35 = arith.constant dense<0.000000e+00> : vector<8x128xf32>
    %100 = tpu.matmul %98, %99, %cst_35 {dimension_numbers = #tpu.dot_dimension_numbers<[1], [0], [0], [1], [0, 0, 1, 1], [], []>} : vector<8x32xbf16>, vector<32x128xbf16>, vector<8x128xf32> -> vector<8x128xf32>
    %c0_36 = arith.constant 0 : index
    %c0_37 = arith.constant 0 : index
    %101 = vector.load %arg10[%c0_36, %c0_37] : memref<1x128xf32, #tpu.memory_space<vmem>>, vector<1x128xf32>
    %102 = vector.broadcast %101 : vector<1x128xf32> to vector<8x128xf32>
    %103 = arith.addf %100, %102 : vector<8x128xf32>
    %cst_38 = arith.constant 5.000000e-01 : f32
    %104 = vector.broadcast %cst_38 : f32 to vector<8x128xf32>
    %105 = arith.mulf %104, %103 : vector<8x128xf32>
    %cst_39 = arith.constant 0.707106769 : f32
    %106 = vector.broadcast %cst_39 : f32 to vector<8x128xf32>
    %107 = arith.mulf %103, %106 : vector<8x128xf32>
    %108 = math.erf %107 : vector<8x128xf32>
    %cst_40 = arith.constant 1.000000e+00 : f32
    %109 = vector.broadcast %cst_40 : f32 to vector<8x128xf32>
    %110 = arith.addf %109, %108 : vector<8x128xf32>
    %111 = arith.mulf %105, %110 : vector<8x128xf32>
    %112 = arith.truncf %111 : vector<8x128xf32> to vector<8x128xbf16>
    %c0_41 = arith.constant 0 : index
    %c0_42 = arith.constant 0 : index
    %113 = vector.load %arg11[%c0_41, %c0_42] : memref<128x32xbf16, #tpu.memory_space<vmem>>, vector<128x32xbf16>
    %cst_43 = arith.constant dense<0.000000e+00> : vector<8x32xf32>
    %114 = tpu.matmul %112, %113, %cst_43 {dimension_numbers = #tpu.dot_dimension_numbers<[1], [0], [0], [1], [0, 0, 1, 1], [], []>} : vector<8x128xbf16>, vector<128x32xbf16>, vector<8x32xf32> -> vector<8x32xf32>
    %c0_44 = arith.constant 0 : index
    %c0_45 = arith.constant 0 : index
    %115 = vector.load %arg12[%c0_44, %c0_45] : memref<1x32xf32, #tpu.memory_space<vmem>>, vector<1x32xf32>
    %116 = vector.broadcast %115 : vector<1x32xf32> to vector<8x32xf32>
    %117 = arith.addf %114, %116 : vector<8x32xf32>
    %118 = arith.addf %73, %117 : vector<8x32xf32>
    %119 = vector.shape_cast %118 : vector<8x32xf32> to vector<1x8x32xf32>
    %c0_46 = arith.constant 0 : index
    %c0_47 = arith.constant 0 : index
    %c0_48 = arith.constant 0 : index
    %120 = vector.load %arg13[%c0_46, %c0_47, %c0_48] : memref<1x8x32xf32, #tpu.memory_space<vmem>>, vector<1x8x32xf32>
    tpu.vector_store %arg13[%c0_46, %c0_47, %c0_48], %119 {strides = array<i32>} : memref<1x8x32xf32, #tpu.memory_space<vmem>>, vector<1x8x32xf32>,
    return
  }
  func.func @transform_0(%arg0: i32) -> (i32, i32, i32) {
    %c0_i32 = arith.constant 0 : i32
    %c0_i32_0 = arith.constant 0 : i32
    %c0_i32_1 = arith.constant 0 : i32
    return %arg0, %c0_i32, %c0_i32_0 : i32, i32, i32
  }
  func.func @transform_1(%arg0: i32) -> (i32, i32) {
    %c0_i32 = arith.constant 0 : i32
    %c0_i32_0 = arith.constant 0 : i32
    %c0_i32_1 = arith.constant 0 : i32
    return %c0_i32, %c0_i32_0 : i32, i32
  }
  func.func @transform_2(%arg0: i32) -> (i32, i32) {
    %c0_i32 = arith.constant 0 : i32
    %c0_i32_0 = arith.constant 0 : i32
    %c0_i32_1 = arith.constant 0 : i32
    return %c0_i32, %c0_i32_0 : i32, i32
  }
  func.func @transform_3(%arg0: i32) -> (i32, i32) {
    %c0_i32 = arith.constant 0 : i32
    %c0_i32_0 = arith.constant 0 : i32
    %c0_i32_1 = arith.constant 0 : i32
    return %c0_i32, %c0_i32_0 : i32, i32
  }
  func.func @transform_4(%arg0: i32) -> (i32, i32) {
    %c0_i32 = arith.constant 0 : i32
    %c0_i32_0 = arith.constant 0 : i32
    %c0_i32_1 = arith.constant 0 : i32
    return %c0_i32, %c0_i32_0 : i32, i32
  }
  func.func @transform_5(%arg0: i32) -> (i32, i32) {
    %c0_i32 = arith.constant 0 : i32
    %c0_i32_0 = arith.constant 0 : i32
    %c0_i32_1 = arith.constant 0 : i32
    return %c0_i32, %c0_i32_0 : i32, i32
  }
  func.func @transform_6(%arg0: i32) -> (i32, i32) {
    %c0_i32 = arith.constant 0 : i32
    %c0_i32_0 = arith.constant 0 : i32
    %c0_i32_1 = arith.constant 0 : i32
    return %c0_i32, %c0_i32_0 : i32, i32
  }
  func.func @transform_7(%arg0: i32) -> (i32, i32) {
    %c0_i32 = arith.constant 0 : i32
    %c0_i32_0 = arith.constant 0 : i32
    %c0_i32_1 = arith.constant 0 : i32
    return %c0_i32, %c0_i32_0 : i32, i32
  }
  func.func @transform_8(%arg0: i32) -> (i32, i32) {
    %c0_i32 = arith.constant 0 : i32
    %c0_i32_0 = arith.constant 0 : i32
    %c0_i32_1 = arith.constant 0 : i32
    return %c0_i32, %c0_i32_0 : i32, i32
  }
  func.func @transform_9(%arg0: i32) -> (i32, i32) {
    %c0_i32 = arith.constant 0 : i32
    %c0_i32_0 = arith.constant 0 : i32
    %c0_i32_1 = arith.constant 0 : i32
    return %c0_i32, %c0_i32_0 : i32, i32
  }
  func.func @transform_10(%arg0: i32) -> (i32, i32) {
    %c0_i32 = arith.constant 0 : i32
    %c0_i32_0 = arith.constant 0 : i32
    %c0_i32_1 = arith.constant 0 : i32
    return %c0_i32, %c0_i32_0 : i32, i32
  }
  func.func @transform_11(%arg0: i32) -> (i32, i32) {
    %c0_i32 = arith.constant 0 : i32
    %c0_i32_0 = arith.constant 0 : i32
    %c0_i32_1 = arith.constant 0 : i32
    return %c0_i32, %c0_i32_0 : i32, i32
  }
  func.func @transform_12(%arg0: i32) -> (i32, i32, i32) {
    %c0_i32 = arith.constant 0 : i32
    %c0_i32_0 = arith.constant 0 : i32
    %c0_i32_1 = arith.constant 0 : i32
    return %arg0, %c0_i32, %c0_i32_0 : i32, i32, i32
  }
}

module attributes {stable_mosaic.version = 11 : i64} {
  func.func @transformer_layer_kernel(%arg0: i32, %arg1: memref<1x8x32xf32, #tpu.memory_space<vmem>>, %arg2: memref<1x32xf32, #tpu.memory_space<vmem>>, %arg3: memref<1x32xf32, #tpu.memory_space<vmem>>, %arg4: memref<32x96xbf16, #tpu.memory_space<vmem>>, %arg5: memref<32x32xbf16, #tpu.memory_space<vmem>>, %arg6: memref<1x32xf32, #tpu.memory_space<vmem>>, %arg7: memref<1x32xf32, #tpu.memory_space<vmem>>, %arg8: memref<1x32xf32, #tpu.memory_space<vmem>>, %arg9: memref<32x128xbf16, #tpu.memory_space<vmem>>, %arg10: memref<1x128xf32, #tpu.memory_space<vmem>>, %arg11: memref<128x32xbf16, #tpu.memory_space<vmem>>, %arg12: memref<1x32xf32, #tpu.memory_space<vmem>>, %arg13: memref<1x8x32xf32, #tpu.memory_space<vmem>>, %arg14: memref<8x32xf32, #tpu.memory_space<vmem>>) attributes {dimension_semantics = [#tpu.dimension_semantics<parallel>], iteration_bounds = array<i64: 2>, scalar_prefetch = 0 : i64, scratch_operands = 1 : i64, tpu.core_type = #tpu.core_type<tc>, window_params = [{transform_indices = @transform_0, window_bounds = array<i64: 1, 8, 32>}, {pipeline_mode = #tpu.pipeline_mode<synchronous>, transform_indices = @transform_1, window_bounds = array<i64: 1, 32>}, {pipeline_mode = #tpu.pipeline_mode<synchronous>, transform_indices = @transform_2, window_bounds = array<i64: 1, 32>}, {pipeline_mode = #tpu.pipeline_mode<synchronous>, transform_indices = @transform_3, window_bounds = array<i64: 32, 96>}, {pipeline_mode = #tpu.pipeline_mode<synchronous>, transform_indices = @transform_4, window_bounds = array<i64: 32, 32>}, {pipeline_mode = #tpu.pipeline_mode<synchronous>, transform_indices = @transform_5, window_bounds = array<i64: 1, 32>}, {pipeline_mode = #tpu.pipeline_mode<synchronous>, transform_indices = @transform_6, window_bounds = array<i64: 1, 32>}, {pipeline_mode = #tpu.pipeline_mode<synchronous>, transform_indices = @transform_7, window_bounds = array<i64: 1, 32>}, {pipeline_mode = #tpu.pipeline_mode<synchronous>, transform_indices = @transform_8, window_bounds = array<i64: 32, 128>}, {pipeline_mode = #tpu.pipeline_mode<synchronous>, transform_indices = @transform_9, window_bounds = array<i64: 1, 128>}, {pipeline_mode = #tpu.pipeline_mode<synchronous>, transform_indices = @transform_10, window_bounds = array<i64: 128, 32>}, {pipeline_mode = #tpu.pipeline_mode<synchronous>, transform_indices = @transform_11, window_bounds = array<i64: 1, 32>}, {transform_indices = @transform_12, window_bounds = array<i64: 1, 8, 32>}]} {
    %c0 = arith.constant 0 : index
    %c0_0 = arith.constant 0 : index
    %c0_1 = arith.constant 0 : index
    %0 = vector.load %arg1[%c0, %c0_0, %c0_1] : memref<1x8x32xf32, #tpu.memory_space<vmem>>, vector<1x8x32xf32>
    %1 = vector.shape_cast %0 : vector<1x8x32xf32> to vector<8x32xf32>
    %c0_2 = arith.constant 0 : index
    %c0_3 = arith.constant 0 : index
    %2 = vector.load %arg2[%c0_2, %c0_3] : memref<1x32xf32, #tpu.memory_space<vmem>>, vector<1x32xf32>
    %c0_4 = arith.constant 0 : index
    %c0_5 = arith.constant 0 : index
    %3 = vector.load %arg3[%c0_4, %c0_5] : memref<1x32xf32, #tpu.memory_space<vmem>>, vector<1x32xf32>
    %cst = arith.constant dense<0.000000e+00> : vector<8xf32>
    %4 = vector.multi_reduction <add>, %1, %cst [1] : vector<8x32xf32> to vector<8xf32>
    %5 = vector.shape_cast %4 : vector<8xf32> to vector<8x1xf32>
    %cst_6 = arith.constant 3.200000e+01 : f32
    %6 = vector.broadcast %cst_6 : f32 to vector<8x1xf32>
    %7 = arith.divf %5, %6 : vector<8x1xf32>
    %8 = vector.broadcast %7 : vector<8x1xf32> to vector<8x32xf32>
    %9 = arith.subf %1, %8 : vector<8x32xf32>
    %10 = arith.mulf %9, %9 : vector<8x32xf32>
    %cst_7 = arith.constant dense<0.000000e+00> : vector<8xf32>
    %11 = vector.multi_reduction <add>, %10, %cst_7 [1] : vector<8x32xf32> to vector<8xf32>
    %12 = vector.shape_cast %11 : vector<8xf32> to vector<8x1xf32>
    %cst_8 = arith.constant 3.200000e+01 : f32
    %13 = vector.broadcast %cst_8 : f32 to vector<8x1xf32>
    %14 = arith.divf %12, %13 : vector<8x1xf32>
    %15 = vector.broadcast %7 : vector<8x1xf32> to vector<8x32xf32>
    %16 = arith.subf %1, %15 : vector<8x32xf32>
    %cst_9 = arith.constant 9.99999974E-6 : f32
    %17 = vector.broadcast %cst_9 : f32 to vector<8x1xf32>
    %18 = arith.addf %14, %17 : vector<8x1xf32>
    %19 = math.rsqrt %18 : vector<8x1xf32>
    %20 = vector.broadcast %19 : vector<8x1xf32> to vector<8x32xf32>
    %21 = arith.mulf %16, %20 : vector<8x32xf32>
    %22 = vector.broadcast %2 : vector<1x32xf32> to vector<8x32xf32>
    %23 = arith.mulf %22, %21 : vector<8x32xf32>
    %24 = vector.broadcast %3 : vector<1x32xf32> to vector<8x32xf32>
    %25 = arith.addf %23, %24 : vector<8x32xf32>
    %26 = arith.truncf %25 : vector<8x32xf32> to vector<8x32xbf16>
    %c0_10 = arith.constant 0 : index
    %c0_11 = arith.constant 0 : index
    %27 = vector.load %arg4[%c0_10, %c0_11] : memref<32x96xbf16, #tpu.memory_space<vmem>>, vector<32x96xbf16>
    %cst_12 = arith.constant dense<0.000000e+00> : vector<8x96xf32>
    %28 = tpu.matmul %26, %27, %cst_12 {dimension_numbers = #tpu.dot_dimension_numbers<[1], [0], [0], [1], [0, 0, 1, 1], [], []>} : vector<8x32xbf16>, vector<32x96xbf16>, vector<8x96xf32> -> vector<8x96xf32>
    %29 = tpu.iota {dimensions = array<i32: 0>} : vector<8x8xi32>
    %30 = tpu.iota {dimensions = array<i32: 1>} : vector<8x8xi32>
    %31 = arith.cmpi sgt, %30, %29 : vector<8x8xi32>
    %cst_13 = arith.constant -1.000000e+30 : f32
    %cst_14 = arith.constant 0.000000e+00 : f32
    %32 = vector.broadcast %cst_13 : f32 to vector<8x8xf32>
    %33 = vector.broadcast %cst_14 : f32 to vector<8x8xf32>
    %34 = arith.select %31, %32, %33 : vector<8x8xi1>, vector<8x8xf32>
    %35 = arith.truncf %28 : vector<8x96xf32> to vector<8x96xbf16>
    %36 = vector.shape_cast %34 : vector<8x8xf32> to vector<1x8x8xf32>
    %37 = vector.extract_strided_slice %35 {offsets = [0, 0], sizes = [8, 16], strides = [1, 1]} : vector<8x96xbf16> to vector<8x16xbf16>
    %38 = vector.shape_cast %37 : vector<8x16xbf16> to vector<1x8x16xbf16>
    %39 = vector.extract_strided_slice %35 {offsets = [0, 32], sizes = [8, 16], strides = [1, 1]} : vector<8x96xbf16> to vector<8x16xbf16>
    %40 = vector.shape_cast %39 : vector<8x16xbf16> to vector<1x8x16xbf16>
    %41 = vector.extract_strided_slice %35 {offsets = [0, 64], sizes = [8, 16], strides = [1, 1]} : vector<8x96xbf16> to vector<8x16xbf16>
    %42 = vector.shape_cast %41 : vector<8x16xbf16> to vector<1x8x16xbf16>
    "tpu.trace_start"() <{level = 10 : i32, message = "bqd,bkd->bqk"}> : () -> ()
    %cst_15 = arith.constant dense<0.000000e+00> : vector<1x8x8xf32>
    %43 = tpu.matmul %38, %40, %cst_15 {dimension_numbers = #tpu.dot_dimension_numbers<[2], [2], [1], [1], [0, 0, 0, 1, 1, 1], [0], [0]>} : vector<1x8x16xbf16>, vector<1x8x16xbf16>, vector<1x8x8xf32> -> vector<1x8x8xf32>
    "tpu.trace_stop"() : () -> ()
    %44 = arith.addf %43, %36 : vector<1x8x8xf32>
    %cst_16 = arith.constant dense<0xFF800000> : vector<1x8xf32>
    %45 = vector.multi_reduction <maximumf>, %44, %cst_16 [2] : vector<1x8x8xf32> to vector<1x8xf32>
    %46 = vector.shape_cast %45 : vector<1x8xf32> to vector<1x8x1xf32>
    %47 = vector.broadcast %46 : vector<1x8x1xf32> to vector<1x8x8xf32>
    %48 = arith.subf %44, %47 : vector<1x8x8xf32>
    %49 = math.exp %48 : vector<1x8x8xf32>
    %cst_17 = arith.constant dense<0.000000e+00> : vector<1x8xf32>
    %50 = vector.multi_reduction <add>, %49, %cst_17 [2] : vector<1x8x8xf32> to vector<1x8xf32>
    %51 = vector.shape_cast %50 : vector<1x8xf32> to vector<1x8x1xf32>
    %52 = tpu.reciprocal %51 {approx = true} : vector<1x8x1xf32> -> vector<1x8x1xf32>
    %53 = vector.broadcast %52 : vector<1x8x1xf32> to vector<1x8x8xf32>
    %54 = arith.mulf %49, %53 : vector<1x8x8xf32>
    %55 = arith.truncf %54 : vector<1x8x8xf32> to vector<1x8x8xbf16>
    "tpu.trace_start"() <{level = 10 : i32, message = "bqk,bkd->bqd"}> : () -> ()
    %cst_18 = arith.constant dense<0.000000e+00> : vector<1x8x16xf32>
    %56 = tpu.matmul %55, %42, %cst_18 {dimension_numbers = #tpu.dot_dimension_numbers<[2], [1], [1], [2], [0, 0, 0, 1, 1, 2], [0], [0]>} : vector<1x8x8xbf16>, vector<1x8x16xbf16>, vector<1x8x16xf32> -> vector<1x8x16xf32>
    "tpu.trace_stop"() : () -> ()
    %57 = vector.shape_cast %56 : vector<1x8x16xf32> to vector<8x16xf32>
    %c0_19 = arith.constant 0 : index
    %c0_20 = arith.constant 0 : index
    %58 = vector.load %arg14[%c0_19, %c0_20] : memref<8x32xf32, #tpu.memory_space<vmem>>, vector<8x16xf32>
    tpu.vector_store %arg14[%c0_19, %c0_20], %57 {strides = array<i32>} : memref<8x32xf32, #tpu.memory_space<vmem>>, vector<8x16xf32>,
    %59 = vector.extract_strided_slice %35 {offsets = [0, 16], sizes = [8, 16], strides = [1, 1]} : vector<8x96xbf16> to vector<8x16xbf16>
    %60 = vector.shape_cast %59 : vector<8x16xbf16> to vector<1x8x16xbf16>
    %61 = vector.extract_strided_slice %35 {offsets = [0, 48], sizes = [8, 16], strides = [1, 1]} : vector<8x96xbf16> to vector<8x16xbf16>
    %62 = vector.shape_cast %61 : vector<8x16xbf16> to vector<1x8x16xbf16>
    %63 = vector.extract_strided_slice %35 {offsets = [0, 80], sizes = [8, 16], strides = [1, 1]} : vector<8x96xbf16> to vector<8x16xbf16>
    %64 = vector.shape_cast %63 : vector<8x16xbf16> to vector<1x8x16xbf16>
    "tpu.trace_start"() <{level = 10 : i32, message = "bqd,bkd->bqk"}> : () -> ()
    %cst_21 = arith.constant dense<0.000000e+00> : vector<1x8x8xf32>
    %65 = tpu.matmul %60, %62, %cst_21 {dimension_numbers = #tpu.dot_dimension_numbers<[2], [2], [1], [1], [0, 0, 0, 1, 1, 1], [0], [0]>} : vector<1x8x16xbf16>, vector<1x8x16xbf16>, vector<1x8x8xf32> -> vector<1x8x8xf32>
    "tpu.trace_stop"() : () -> ()
    %66 = arith.addf %65, %36 : vector<1x8x8xf32>
    %cst_22 = arith.constant dense<0xFF800000> : vector<1x8xf32>
    %67 = vector.multi_reduction <maximumf>, %66, %cst_22 [2] : vector<1x8x8xf32> to vector<1x8xf32>
    %68 = vector.shape_cast %67 : vector<1x8xf32> to vector<1x8x1xf32>
    %69 = vector.broadcast %68 : vector<1x8x1xf32> to vector<1x8x8xf32>
    %70 = arith.subf %66, %69 : vector<1x8x8xf32>
    %71 = math.exp %70 : vector<1x8x8xf32>
    %cst_23 = arith.constant dense<0.000000e+00> : vector<1x8xf32>
    %72 = vector.multi_reduction <add>, %71, %cst_23 [2] : vector<1x8x8xf32> to vector<1x8xf32>
    %73 = vector.shape_cast %72 : vector<1x8xf32> to vector<1x8x1xf32>
    %74 = tpu.reciprocal %73 {approx = true} : vector<1x8x1xf32> -> vector<1x8x1xf32>
    %75 = vector.broadcast %74 : vector<1x8x1xf32> to vector<1x8x8xf32>
    %76 = arith.mulf %71, %75 : vector<1x8x8xf32>
    %77 = arith.truncf %76 : vector<1x8x8xf32> to vector<1x8x8xbf16>
    "tpu.trace_start"() <{level = 10 : i32, message = "bqk,bkd->bqd"}> : () -> ()
    %cst_24 = arith.constant dense<0.000000e+00> : vector<1x8x16xf32>
    %78 = tpu.matmul %77, %64, %cst_24 {dimension_numbers = #tpu.dot_dimension_numbers<[2], [1], [1], [2], [0, 0, 0, 1, 1, 2], [0], [0]>} : vector<1x8x8xbf16>, vector<1x8x16xbf16>, vector<1x8x16xf32> -> vector<1x8x16xf32>
    "tpu.trace_stop"() : () -> ()
    %79 = vector.shape_cast %78 : vector<1x8x16xf32> to vector<8x16xf32>
    %c0_25 = arith.constant 0 : index
    %c16 = arith.constant 16 : index
    %80 = vector.load %arg14[%c0_25, %c16] : memref<8x32xf32, #tpu.memory_space<vmem>>, vector<8x16xf32>
    tpu.vector_store %arg14[%c0_25, %c16], %79 {strides = array<i32>} : memref<8x32xf32, #tpu.memory_space<vmem>>, vector<8x16xf32>,
    %c0_26 = arith.constant 0 : index
    %c0_27 = arith.constant 0 : index
    %81 = vector.load %arg14[%c0_26, %c0_27] : memref<8x32xf32, #tpu.memory_space<vmem>>, vector<8x32xf32>
    %82 = arith.truncf %81 : vector<8x32xf32> to vector<8x32xbf16>
    %c0_28 = arith.constant 0 : index
    %c0_29 = arith.constant 0 : index
    %83 = vector.load %arg5[%c0_28, %c0_29] : memref<32x32xbf16, #tpu.memory_space<vmem>>, vector<32x32xbf16>
    %cst_30 = arith.constant dense<0.000000e+00> : vector<8x32xf32>
    %84 = tpu.matmul %82, %83, %cst_30 {dimension_numbers = #tpu.dot_dimension_numbers<[1], [0], [0], [1], [0, 0, 1, 1], [], []>} : vector<8x32xbf16>, vector<32x32xbf16>, vector<8x32xf32> -> vector<8x32xf32>
    %c0_31 = arith.constant 0 : index
    %c0_32 = arith.constant 0 : index
    %85 = vector.load %arg6[%c0_31, %c0_32] : memref<1x32xf32, #tpu.memory_space<vmem>>, vector<1x32xf32>
    %86 = vector.broadcast %85 : vector<1x32xf32> to vector<8x32xf32>
    %87 = arith.addf %84, %86 : vector<8x32xf32>
    %88 = arith.addf %1, %87 : vector<8x32xf32>
    %c0_33 = arith.constant 0 : index
    %c0_34 = arith.constant 0 : index
    %89 = vector.load %arg7[%c0_33, %c0_34] : memref<1x32xf32, #tpu.memory_space<vmem>>, vector<1x32xf32>
    %c0_35 = arith.constant 0 : index
    %c0_36 = arith.constant 0 : index
    %90 = vector.load %arg8[%c0_35, %c0_36] : memref<1x32xf32, #tpu.memory_space<vmem>>, vector<1x32xf32>
    %cst_37 = arith.constant dense<0.000000e+00> : vector<8xf32>
    %91 = vector.multi_reduction <add>, %88, %cst_37 [1] : vector<8x32xf32> to vector<8xf32>
    %92 = vector.shape_cast %91 : vector<8xf32> to vector<8x1xf32>
    %cst_38 = arith.constant 3.200000e+01 : f32
    %93 = vector.broadcast %cst_38 : f32 to vector<8x1xf32>
    %94 = arith.divf %92, %93 : vector<8x1xf32>
    %95 = vector.broadcast %94 : vector<8x1xf32> to vector<8x32xf32>
    %96 = arith.subf %88, %95 : vector<8x32xf32>
    %97 = arith.mulf %96, %96 : vector<8x32xf32>
    %cst_39 = arith.constant dense<0.000000e+00> : vector<8xf32>
    %98 = vector.multi_reduction <add>, %97, %cst_39 [1] : vector<8x32xf32> to vector<8xf32>
    %99 = vector.shape_cast %98 : vector<8xf32> to vector<8x1xf32>
    %cst_40 = arith.constant 3.200000e+01 : f32
    %100 = vector.broadcast %cst_40 : f32 to vector<8x1xf32>
    %101 = arith.divf %99, %100 : vector<8x1xf32>
    %102 = vector.broadcast %94 : vector<8x1xf32> to vector<8x32xf32>
    %103 = arith.subf %88, %102 : vector<8x32xf32>
    %cst_41 = arith.constant 9.99999974E-6 : f32
    %104 = vector.broadcast %cst_41 : f32 to vector<8x1xf32>
    %105 = arith.addf %101, %104 : vector<8x1xf32>
    %106 = math.rsqrt %105 : vector<8x1xf32>
    %107 = vector.broadcast %106 : vector<8x1xf32> to vector<8x32xf32>
    %108 = arith.mulf %103, %107 : vector<8x32xf32>
    %109 = vector.broadcast %89 : vector<1x32xf32> to vector<8x32xf32>
    %110 = arith.mulf %109, %108 : vector<8x32xf32>
    %111 = vector.broadcast %90 : vector<1x32xf32> to vector<8x32xf32>
    %112 = arith.addf %110, %111 : vector<8x32xf32>
    %113 = arith.truncf %112 : vector<8x32xf32> to vector<8x32xbf16>
    %c0_42 = arith.constant 0 : index
    %c0_43 = arith.constant 0 : index
    %114 = vector.load %arg9[%c0_42, %c0_43] : memref<32x128xbf16, #tpu.memory_space<vmem>>, vector<32x128xbf16>
    %cst_44 = arith.constant dense<0.000000e+00> : vector<8x128xf32>
    %115 = tpu.matmul %113, %114, %cst_44 {dimension_numbers = #tpu.dot_dimension_numbers<[1], [0], [0], [1], [0, 0, 1, 1], [], []>} : vector<8x32xbf16>, vector<32x128xbf16>, vector<8x128xf32> -> vector<8x128xf32>
    %c0_45 = arith.constant 0 : index
    %c0_46 = arith.constant 0 : index
    %116 = vector.load %arg10[%c0_45, %c0_46] : memref<1x128xf32, #tpu.memory_space<vmem>>, vector<1x128xf32>
    %117 = vector.broadcast %116 : vector<1x128xf32> to vector<8x128xf32>
    %118 = arith.addf %115, %117 : vector<8x128xf32>
    %cst_47 = arith.constant 5.000000e-01 : f32
    %119 = vector.broadcast %cst_47 : f32 to vector<8x128xf32>
    %120 = arith.mulf %119, %118 : vector<8x128xf32>
    %cst_48 = arith.constant 0.707106769 : f32
    %121 = vector.broadcast %cst_48 : f32 to vector<8x128xf32>
    %122 = arith.mulf %118, %121 : vector<8x128xf32>
    %123 = math.erf %122 : vector<8x128xf32>
    %cst_49 = arith.constant 1.000000e+00 : f32
    %124 = vector.broadcast %cst_49 : f32 to vector<8x128xf32>
    %125 = arith.addf %124, %123 : vector<8x128xf32>
    %126 = arith.mulf %120, %125 : vector<8x128xf32>
    %127 = arith.truncf %126 : vector<8x128xf32> to vector<8x128xbf16>
    %c0_50 = arith.constant 0 : index
    %c0_51 = arith.constant 0 : index
    %128 = vector.load %arg11[%c0_50, %c0_51] : memref<128x32xbf16, #tpu.memory_space<vmem>>, vector<128x32xbf16>
    %cst_52 = arith.constant dense<0.000000e+00> : vector<8x32xf32>
    %129 = tpu.matmul %127, %128, %cst_52 {dimension_numbers = #tpu.dot_dimension_numbers<[1], [0], [0], [1], [0, 0, 1, 1], [], []>} : vector<8x128xbf16>, vector<128x32xbf16>, vector<8x32xf32> -> vector<8x32xf32>
    %c0_53 = arith.constant 0 : index
    %c0_54 = arith.constant 0 : index
    %130 = vector.load %arg12[%c0_53, %c0_54] : memref<1x32xf32, #tpu.memory_space<vmem>>, vector<1x32xf32>
    %131 = vector.broadcast %130 : vector<1x32xf32> to vector<8x32xf32>
    %132 = arith.addf %129, %131 : vector<8x32xf32>
    %133 = arith.addf %88, %132 : vector<8x32xf32>
    %134 = vector.shape_cast %133 : vector<8x32xf32> to vector<1x8x32xf32>
    %c0_55 = arith.constant 0 : index
    %c0_56 = arith.constant 0 : index
    %c0_57 = arith.constant 0 : index
    %135 = vector.load %arg13[%c0_55, %c0_56, %c0_57] : memref<1x8x32xf32, #tpu.memory_space<vmem>>, vector<1x8x32xf32>
    tpu.vector_store %arg13[%c0_55, %c0_56, %c0_57], %134 {strides = array<i32>} : memref<1x8x32xf32, #tpu.memory_space<vmem>>, vector<1x8x32xf32>,
    return
  }
  func.func @transform_0(%arg0: i32) -> (i32, i32, i32) {
    %c0_i32 = arith.constant 0 : i32
    %c0_i32_0 = arith.constant 0 : i32
    %c0_i32_1 = arith.constant 0 : i32
    return %arg0, %c0_i32, %c0_i32_0 : i32, i32, i32
  }
  func.func @transform_1(%arg0: i32) -> (i32, i32) {
    %c0_i32 = arith.constant 0 : i32
    %c0_i32_0 = arith.constant 0 : i32
    %c0_i32_1 = arith.constant 0 : i32
    return %c0_i32, %c0_i32_0 : i32, i32
  }
  func.func @transform_2(%arg0: i32) -> (i32, i32) {
    %c0_i32 = arith.constant 0 : i32
    %c0_i32_0 = arith.constant 0 : i32
    %c0_i32_1 = arith.constant 0 : i32
    return %c0_i32, %c0_i32_0 : i32, i32
  }
  func.func @transform_3(%arg0: i32) -> (i32, i32) {
    %c0_i32 = arith.constant 0 : i32
    %c0_i32_0 = arith.constant 0 : i32
    %c0_i32_1 = arith.constant 0 : i32
    return %c0_i32, %c0_i32_0 : i32, i32
  }
  func.func @transform_4(%arg0: i32) -> (i32, i32) {
    %c0_i32 = arith.constant 0 : i32
    %c0_i32_0 = arith.constant 0 : i32
    %c0_i32_1 = arith.constant 0 : i32
    return %c0_i32, %c0_i32_0 : i32, i32
  }
  func.func @transform_5(%arg0: i32) -> (i32, i32) {
    %c0_i32 = arith.constant 0 : i32
    %c0_i32_0 = arith.constant 0 : i32
    %c0_i32_1 = arith.constant 0 : i32
    return %c0_i32, %c0_i32_0 : i32, i32
  }
  func.func @transform_6(%arg0: i32) -> (i32, i32) {
    %c0_i32 = arith.constant 0 : i32
    %c0_i32_0 = arith.constant 0 : i32
    %c0_i32_1 = arith.constant 0 : i32
    return %c0_i32, %c0_i32_0 : i32, i32
  }
  func.func @transform_7(%arg0: i32) -> (i32, i32) {
    %c0_i32 = arith.constant 0 : i32
    %c0_i32_0 = arith.constant 0 : i32
    %c0_i32_1 = arith.constant 0 : i32
    return %c0_i32, %c0_i32_0 : i32, i32
  }
  func.func @transform_8(%arg0: i32) -> (i32, i32) {
    %c0_i32 = arith.constant 0 : i32
    %c0_i32_0 = arith.constant 0 : i32
    %c0_i32_1 = arith.constant 0 : i32
    return %c0_i32, %c0_i32_0 : i32, i32
  }
  func.func @transform_9(%arg0: i32) -> (i32, i32) {
    %c0_i32 = arith.constant 0 : i32
    %c0_i32_0 = arith.constant 0 : i32
    %c0_i32_1 = arith.constant 0 : i32
    return %c0_i32, %c0_i32_0 : i32, i32
  }
  func.func @transform_10(%arg0: i32) -> (i32, i32) {
    %c0_i32 = arith.constant 0 : i32
    %c0_i32_0 = arith.constant 0 : i32
    %c0_i32_1 = arith.constant 0 : i32
    return %c0_i32, %c0_i32_0 : i32, i32
  }
  func.func @transform_11(%arg0: i32) -> (i32, i32) {
    %c0_i32 = arith.constant 0 : i32
    %c0_i32_0 = arith.constant 0 : i32
    %c0_i32_1 = arith.constant 0 : i32
    return %c0_i32, %c0_i32_0 : i32, i32
  }
  func.func @transform_12(%arg0: i32) -> (i32, i32, i32) {
    %c0_i32 = arith.constant 0 : i32
    %c0_i32_0 = arith.constant 0 : i32
    %c0_i32_1 = arith.constant 0 : i32
    return %arg0, %c0_i32, %c0_i32_0 : i32, i32, i32
  }
}

</mosaic_0001>

<bundles_post_ra>
// kernel: tpu_custom_call.1
= control target key start
LH: loop header
LB: loop body
LE: loop exit
PB: predicated region body
PF: predicated region fallthrough
CT: control target
= control target key end

     0   :  { %s2295_s0 = inlined_call_operand.vmem [shape: f32[2,8,32], index: 0, kind: input, shape index: {}]   ;;  %s2296_s1 = inlined_call_operand.vmem [shape: f32[1,32], index: 1, kind: input, shape index: {}]   ;;  %s2297_s2 = inlined_call_operand.vmem [shape: f32[1,32], index: 2, kind: input, shape index: {}]   ;;  %s2298_s3 = inlined_call_operand.vmem [shape: bf16[32,96], index: 3, kind: input, shape index: {}]   ;;  %s2299_s4 = inlined_call_operand.vmem [shape: bf16[32,32], index: 4, kind: input, shape index: {}]   ;;  %s2300_s5 = inlined_call_operand.vmem [shape: f32[1,32], index: 5, kind: input, shape index: {}]   ;;  %s2301_s6 = inlined_call_operand.vmem [shape: f32[1,32], index: 6, kind: input, shape index: {}]   ;;  %s2302_s7 = inlined_call_operand.vmem [shape: f32[1,32], index: 7, kind: input, shape index: {}]   ;;  %s2303_s8 = inlined_call_operand.vmem [shape: bf16[32,128], index: 8, kind: input, shape index: {}]   ;;  %s2304_s9 = inlined_call_operand.vmem [shape: f32[1,128], index: 9, kind: input, shape index: {}]   ;;  %s2305_s10 = inlined_call_operand.vmem [shape: bf16[128,32], index: 10, kind: input, shape index: {}]   ;;  %s2306_s11 = inlined_call_operand.vmem [shape: f32[1,32], index: 11, kind: input, shape index: {}]   ;;  %s2307_s12 = inlined_call_operand.hbm [shape: f32[2,8,32], index: 12, kind: output, shape index: {}]  }
   0x1   :  { %2308 = sst [smem:[#allocation6_spill]] %s2295_s0 }
   0x2   :  { %2309 = sst [smem:[#allocation7_spill]] %s2296_s1 }
   0x3   :  { %17 = vsyncpa [#allocation4], 0 }
   0x4   :  { %19 = vsyncpa [#allocation4 + $0x1], 0  ;;  %s1962_s21 = smov 0   ;;  %s1964_s22 = smov 0  }
   0x5   :  { %s1966_s23 = smov 0   ;;  %s1968_s24 = smov 0  }
   0x6 LB: > { %s1983_s25 = sadd.s32 4294967295, %s1885_s24   ;;  %s1615_s26 = sadd.s32 4294967294, %s1885_s24   ;;  %s1885_s24 = sphi %s1968_s24, %s2317_s24   ;;  %s1881_s23 = sphi %s1966_s23, %s2316_s23   ;;  %s1877_s22 = sphi %s1964_s22, %s2315_s22   ;;  %s1873_s21 = sphi %s1962_s21, %s2314_s21  }
   0x7   : > { %s1987_s27 = sadd.s32 1, %s1885_s24   ;;  %s289_s28 = sadd.s32 1, %s1881_s23 }
   0x8   : > { %s286_s29 = ssub.s32 %s1885_s24, %s1987_s27  ;;  %p299_p0 = scmp.ne.s32.totalorder %s1881_s23, %s1877_s22 }
   0x9   : > { %p287_p1 = scmp.eq.s32.totalorder %s286_s29, 0  ;;  %p300_p2 = scmp.eq.s32.totalorder %s1983_s25, 1 }
   0xa   : > { %p305_p3 = scmp.ne.s32.totalorder %s1877_s22, %s1873_s21  ;;  %p306_p4 = scmp.eq.s32.totalorder %s1615_s26, 1 }
   0xb   : > { %s1998_s30 = scalar_select %p287_p1, %s1881_s23, %s289_s28  }
   0xc   : > { %p2000_p5 = por %p300_p2, %p299_p0  ;;  %p2004_p6 = por %p306_p4, %p305_p3 }
   0xd   : > { %p1618_p7 = scmp.ge.s32.totalorder %s1885_s24, 1  ;;  %p364_p8 = scmp.lt.s32.totalorder %s1885_s24, 3 }
   0xf   : > { %p365_p9 = pnand %p1618_p7, %p364_p8 }
  0x10   : > { %p405_p10 = scmp.lt.s32.totalorder (!%p365_p9), %s1983_s25, 1  ;;  %s2312_s0 = sld [smem:[#allocation6_spill]] (!%p365_p9) }
  0x11   : > { %368 = sbr.rel (%p365_p9) target bundleno = 2587 (0xa1b), region = 68  ;;  %s2313_s1 = sld [smem:[#allocation7_spill]] (!%p365_p9) }
  0x12   : > { %s1890_s20 = smov (!%p365_p9), 96   ;;  %s1894_s26 = smov (!%p365_p9), 64  }
  0x13   : > { %s1895_s17 = smov (!%p365_p9), 16   ;;  %s1652_s29 = sshll.u32 (!%p365_p9), %s1983_s25, 7 }
  0x16   : > { %s406_s15 = scalar_select %p405_p10, %s1983_s25, 1  ;;  %vm413_vm0 = vcmask 261120   ;;  %v1797_v7 = vld [vmem:[%s2298_s3 + $0x8] sm:$0xff]   ;;  %v1887_v8 = vmov 0.0   ;;  %vm1888_vm1 = vmmov 0   ;;  %v1798_v9 = vld [vmem:[%s2298_s3] sm:$0xff]   ;;  %v502_v26 = vlaneseq }
  0x17   : > { %1681 = vmatprep.subr.bf16.mxu0 %v1887_v8  ;;  %1685 = vmatprep.mubr.msk.bf16.mxu0 %vm1888_vm1, %v1887_v8  ;;  %v1621_v14 = vld [vmem:[%s2313_s1] ss:$0 sm:$0xff]  ;;  %v1891_v27 = vmov 1983009808   ;;  %v1892_v32 = vmov 1934713408  }
  0x18   : > { %s1620_s16 = sshll.u32 %s406_s15, 3  ;;  %1682 = vmatpush3.bf16.msra.mxu0 %v1797_v7  ;;  %1701 = vmatprep.subr.bf16.mxu1 %v1887_v8  ;;  %v1622_v16 = vld [vmem:[%s2297_s2] ss:$0 sm:$0xff]  ;;  %v513_v28 = vunpack.c.l.s4 %v1891_v27  ;;  %v2052_v29 = vshrl.u32 %v502_v26, 7  ;;  %v521_v33 = vunpack.c.l.s4 %v1892_v32  ;;  %v1893_v37 = vmov 0  }
  0x19   : > { %s408_s19 = scalar_lea.vmem %s2312_s0, %s1620_s16  ;;  %1683 = vmatprep.subr.bf16.mxu0 %v1887_v8  ;;  %1703 = vmatprep.mubr.msk.bf16.mxu1 %vm1888_vm1, %v1887_v8  ;;  %vm927_vm2 = vcmask 130048   ;;  %vm1020_vm4 = vcmask 64512   ;;  %vm1048_vm5 = vcmask 1043456   ;;  %s2253_s0 = scalar_lea.hbm %s2307_s12, %s1652_s29 }
  0x1a   : > { %v2015_v0 = vld [vmem:[%s408_s19] sm:$0xff]  ;;  %s1889_s19 = smov 112   ;;  %v514_v30 = vunpack.c.0.s8 %v513_v28  ;;  %v522_v36 = vunpack.c.0.s8 %v521_v33 }
  0x1b   : > { %v414_v1 = vsel %vm413_vm0, %v2015_v0, 0.0 }
  0x1c   : > { %415 = vadd.xlane.f32.xlu0 %v414_v1  ;;  %1684 = vmatpush3.bf16.msra.mxu0 %v1798_v9  ;;  %v2055_v31 = vsub.s32 %v514_v30, %v2052_v29  ;;  %v2064_v41 = vsub.s32 %v522_v36, %v2052_v29 }
  0x1d   : > { %1689 = vmatprep.subr.bf16.mxu0 %v1887_v8 }
  0xa5   : > { %v416_v2 = vpop.xlane.xlu0 %415 }
  0xa6   : > { %v418_v3 = vmul.f32 0.03125, %v416_v2 }
  0xa8   : > { %v419_v4 = vsub.f32 %v2015_v0, %v418_v3 }
  0xaa   : > { %v420_v5 = vmul.f32 %v419_v4, %v419_v4 }
  0xac   : > { %v421_v6 = vsel %vm413_vm0, %v420_v5, 0.0 }
  0xad   : > { %422 = vadd.xlane.f32.xlu0 %v421_v6 }
 0x136   : > { %v423_v10 = vpop.xlane.xlu0 %422 }
 0x137   : > { %v424_v11 = vmul.f32 0.03125, %v423_v10 }
 0x139   : > { %v425_v12 = vadd.f32 1e-05, %v424_v11 }
 0x13b   : > { %1811 = vrsqrt.f32 %v425_v12 }
 0x148   : > { %v1812_v13 = vpop.eup %1811 }
 0x149   : > { %v427_v15 = vmul.f32 %v1812_v13, %v419_v4 }
 0x14b   : > { %v434_v17 = vmul.f32 %v1621_v14, %v427_v15 }
 0x14d   : > { %v441_v18 = vadd.f32 %v1622_v16, %v434_v17 }
 0x14f   : > { %v442_v19 = vpack.c.bf16 %v441_v18, %v441_v18 }
 0x151   : > { %1686 = vmatmul.mubr.msk.bf16.vlgmr.msra.gmra.mxu0 %vm413_vm0, %v442_v19 }
 0x152   : > { %1691 = vmatprep.mubr.msk.bf16.mxu0 %vm1888_vm1, %v1887_v8 }
 0x211   : > { %v496_v20 = vpop.f32.mrf.mxu0 }
 0x212   : > { %v2044_v21 = vpack.c.bf16 %v496_v20, %v496_v20 }
 0x213   : > { %v1687_v22 = vpop.f32.mrf.mxu0 }
 0x214   : > { %510 = vrot.lane.b32.xlu1 %v2044_v21, %s1889_s19  ;;  %v518_v35 = vrot.slane %v2044_v21, %v2055_v31  ;;  %s402_s19 = sand.u32 1, %s1877_s22  }
 0x215   : > { %v499_v23 = vpop.f32.mrf.mxu0  ;;  %s1543_s25 = scalar_lea.sflag [#allocation4], %s402_s19 }
 0x216   : > { %v519_v40 = vcombine.high %v518_v35, %v1893_v37  ;;  %v2074_v45 = vrot.slane %v518_v35, %v2064_v41 }
 0x217   : > { %v1688_v24 = vpop.f32.mrf.mxu0 }
 0x218   : > { %593 = vrot.lane.b32.xlu1 %v2044_v21, %s1890_s20  ;;  %v533_v46 = vrot.slane %v519_v40, %v2064_v41  ;;  %v534_v51 = vcombine.high %v2074_v45, %v1893_v37  ;;  %v565_v61 = vshrl.u32 %v2074_v45, 16 }
 0x21a   : > { %v535_v52 = vcombine.high %v533_v46, %v1893_v37  ;;  %v573_v62 = vshrl.u32 %v534_v51, 16  ;;  %v581_v63 = vshrl.u32 %v533_v46, 16 }
 0x21c   : > { %v589_v1 = vshrl.u32 %v535_v52, 16 }
 0x286   : > { %v2048_v25 = vpop.permute.xlu1 %510 }
 0x287   : > { %595 = vrot.lane.b32.xlu0 %v2048_v25, %s1890_s20  ;;  %v543_v34 = vrot.slane %v2048_v25, %v2055_v31  ;;  %s1619_s20 = sshll.u32 %s402_s19, 3 }
 0x288   : > { %s404_s15 = scalar_lea.vmem [#allocation3], %s1619_s20 }
 0x289   : > { %v544_v38 = vcombine.high %v543_v34, %v1893_v37  ;;  %v2068_v43 = vrot.slane %v543_v34, %v2064_v41  ;;  %s1556_s16 = sshll.u32 %s404_s15, 4  ;;  %s2255_s16 = int_to_ptr.vmem [resolvable:$true] %s1556_s16 }
 0x28a   : > { %v594_v39 = vpop.permute.xlu1 %593  ;;  %s1825_s20 = scalar_lea.vmem %s2255_s16, 128 }
 0x28b   : > { %v604_v42 = vrot.slane %v594_v39, %v2055_v31  ;;  %v2071_v44 = vrot.slane %v544_v38, %v2064_v41  ;;  %v559_v48 = vcombine.high %v2068_v43, %v1893_v37  ;;  %v566_v2 = vshrl.u32 %v2068_v43, 16  ;;  %p1826_p11 = scmp.ne.s32.totalorder %s2255_s16, %s1825_s20 }
 0x28d   : > { %v605_v47 = vcombine.high %v604_v42, %v1893_v37  ;;  %v560_v49 = vcombine.high %v2071_v44, %v1893_v37  ;;  %v612_v50 = vrot.slane %v604_v42, %v2064_v41  ;;  %v574_v56 = vshrl.u32 %v559_v48, 16  ;;  %p1827_p12 = pnand %p1826_p11, %p2000_p5 }
 0x28e   : > { %v582_v7 = vshrl.u32 %v2071_v44, 16  ;;  %v567_v36 = vpack.i.b16 %v566_v2, %v565_v61  ;;  %v571_v38 = vpack.i.b16 %v559_v48, %v534_v51  ;;  %v579_v39 = vpack.i.b16 %v2071_v44, %v533_v46 }
 0x28f   : > { %v619_v54 = vrot.slane %v605_v47, %v2064_v41  ;;  %v590_v57 = vshrl.u32 %v560_v49, 16  ;;  %v620_v58 = vcombine.high %v612_v50, %v1893_v37  ;;  %v575_v6 = vpack.i.b16 %v574_v56, %v573_v62  ;;  %p1828_p13 = pneg %p1827_p12 }
 0x290   : > { %v651_v11 = vshrl.u32 %v612_v50, 16  ;;  %v587_v24 = vpack.i.b16 %v560_v49, %v535_v52  ;;  %v583_v32 = vpack.i.b16 %v582_v7, %v581_v63  ;;  %v563_v49 = vpack.i.b16 %v2068_v43, %v2074_v45 }
 0x291   : > { %v621_v3 = vcombine.high %v619_v54, %v1893_v37  ;;  %v591_v9 = vpack.i.b16 %v590_v57, %v589_v1  ;;  %v659_v12 = vshrl.u32 %v620_v58, 16  ;;  %v667_v15 = vshrl.u32 %v619_v54, 16 }
 0x292   : > { %v773_v52 = vcombine.low %v571_v38, %v587_v24  ;;  %v765_v48 = vcombine.low %v563_v49, %v579_v39 }
 0x293   : > { %v675_v19 = vshrl.u32 %v621_v3, 16  ;;  %v797_v42 = vcombine.low %v575_v6, %v591_v9 }
 0x294   : > { %v780_v46 = vrot.slane %v773_v52, %v2055_v31  ;;  %v772_v43 = vrot.slane %v765_v48, %v2055_v31 }
 0x295   : > { %v804_v44 = vrot.slane %v797_v42, %v2055_v31 }
 0x296   : > { %v781_v63 = vcombine.low %v772_v43, %v780_v46 }
 0x2f9   : > { %v596_v53 = vpop.permute.xlu0 %595 }
 0x2fa   : > { %v629_v55 = vrot.slane %v596_v53, %v2055_v31 }
 0x2fc   : > { %v630_v59 = vcombine.high %v629_v55, %v1893_v37  ;;  %v637_v60 = vrot.slane %v629_v55, %v2064_v41 }
 0x2fe   : > { %v644_v4 = vrot.slane %v630_v59, %v2064_v41  ;;  %v645_v5 = vcombine.high %v637_v60, %v1893_v37  ;;  %v652_v10 = vshrl.u32 %v637_v60, 16  ;;  %v649_v16 = vpack.i.b16 %v637_v60, %v612_v50 }
 0x300   : > { %v646_v13 = vcombine.high %v644_v4, %v1893_v37  ;;  %v660_v14 = vshrl.u32 %v645_v5, 16  ;;  %v665_v17 = vpack.i.b16 %v644_v4, %v619_v54  ;;  %v668_v18 = vshrl.u32 %v644_v4, 16 }
 0x301   : > { %v657_v20 = vpack.i.b16 %v645_v5, %v620_v58  ;;  %v653_v27 = vpack.i.b16 %v652_v10, %v651_v11  ;;  %v789_v54 = vcombine.low %v567_v36, %v583_v32  ;;  %v788_v4 = vrot.slane %v781_v63, %v2064_v41 }
 0x302   : > { %v673_v22 = vpack.i.b16 %v646_v13, %v621_v3  ;;  %v676_v23 = vshrl.u32 %v646_v13, 16  ;;  %v669_v28 = vpack.i.b16 %v668_v18, %v667_v15  ;;  %v819_v30 = vcombine.low %v649_v16, %v665_v17 }
 0x303   : > { %v661_v33 = vpack.i.b16 %v660_v14, %v659_v12  ;;  %v796_v58 = vrot.slane %v789_v54, %v2055_v31  ;;  %v816_v10 = vshrl.u32 %v788_v4, 16  ;;  %v505_v12 = vand.u32 127, %v502_v26 }
 0x304   : > { %v677_v34 = vpack.i.b16 %v676_v23, %v675_v19  ;;  %v827_v35 = vcombine.low %v657_v20, %v673_v22  ;;  %v843_v40 = vcombine.low %v653_v27, %v669_v28  ;;  %v826_v47 = vrot.slane %v819_v30, %v2055_v31 }
 0x305   : > { %v805_v61 = vcombine.low %v796_v58, %v804_v44  ;;  %vm506_vm3 = vcmp.gt.s32.totalorder %v505_v12, %v2052_v29 }
 0x306   : > { %v851_v50 = vcombine.low %v661_v33, %v677_v34  ;;  %v834_v53 = vrot.slane %v827_v35, %v2055_v31  ;;  %v850_v56 = vrot.slane %v843_v40, %v2055_v31  ;;  %v507_v13 = vsel %vm506_vm3, -1e+30, %v1887_v8 }
 0x307   : > { %v812_v2 = vrot.slane %v805_v61, %v2064_v41 }
 0x308   : > { %v835_v55 = vcombine.low %v826_v47, %v834_v53  ;;  %v858_v57 = vrot.slane %v851_v50, %v2055_v31 }
 0x309   : > { %v815_v6 = vpack.i.b16 %v812_v2, %v788_v4  ;;  %v817_v9 = vshrl.u32 %v812_v2, 16 }
 0x30a   : > { %v859_v51 = vcombine.low %v850_v56, %v858_v57  ;;  %v842_v59 = vrot.slane %v835_v55, %v2064_v41 }
 0x30b   : > { %v818_v11 = vpack.i.b16 %v817_v9, %v816_v10 }
 0x30c   : > { %v866_v60 = vrot.slane %v859_v51, %v2064_v41  ;;  %v870_v3 = vshrl.u32 %v842_v59, 16 }
 0x30e   : > { %v869_v45 = vpack.i.b16 %v866_v60, %v842_v59  ;;  %v871_v1 = vshrl.u32 %v866_v60, 16 }
 0x310   : > { %v932_v62 = vsel %vm927_vm2, %v869_v45, 0  ;;  %v872_v5 = vpack.i.b16 %v871_v1, %v870_v3 }
 0x311   : > { %1690 = vmatpush3.bf16.xpose.msra.mxu0 %v932_v62 }
 0x312   : > { %1695 = vmatprep.subr.bf16.mxu0 %v1887_v8  ;;  %v978_v7 = vsel %vm927_vm2, %v872_v5, 0 }
 0x318   : > { %1692 = vmatmul.mubr.msk.bf16.vlgmr.msra.gmra.mxu0 %vm927_vm2, %v815_v6 }
 0x319   : > { %1696 = vmatpush3.bf16.xpose.msra.mxu0 %v978_v7  ;;  %1697 = vmatprep.mubr.msk.bf16.mxu0 %vm1888_vm1, %v1887_v8 }
 0x31a   : > { %1707 = vmatprep.subr.bf16.mxu0 %v1887_v8 }
 0x320   : > { %1698 = vmatmul.mubr.msk.bf16.vlgmr.msra.gmra.mxu0 %vm927_vm2, %v818_v11 }
 0x321   : > { %1709 = vmatprep.mubr.msk.bf16.mxu0 %vm1888_vm1, %v1887_v8 }
 0x3d8   : > { %v968_v14 = vpop.f32.mrf.mxu0 }
 0x3d9   : > { %v969_v15 = vadd.f32 %v968_v14, %v507_v13 }
 0x3da   : > { %v1693_v16 = vpop.f32.mrf.mxu0 }
 0x3db   : > { %v1021_v17 = vsel %vm1020_vm4, %v969_v15, -inf }
 0x3dc   : > { %1022 = vmax.xlane.f32.xlu1 %v1021_v17  ;;  %v971_v18 = vpop.f32.mrf.mxu0 }
 0x3de   : > { %v1694_v19 = vpop.f32.mrf.mxu0 }
 0x3e0   : > { %v1014_v20 = vpop.f32.mrf.mxu0 }
 0x3e1   : > { %v1015_v22 = vadd.f32 %v1014_v20, %v507_v13 }
 0x3e2   : > { %v1699_v23 = vpop.f32.mrf.mxu0 }
 0x3e3   : > { %v1024_v24 = vsel %vm1020_vm4, %v1015_v22, -inf }
 0x3e4   : > { %1025 = vmax.xlane.f32.xlu0 %v1024_v24  ;;  %v1017_v26 = vpop.f32.mrf.mxu0 }
 0x3e6   : > { %v1700_v27 = vpop.f32.mrf.mxu0 }
 0x3fa   : > { %681 = vrot.lane.b32.xlu0 %v2048_v25, %s1894_s26 }
 0x465   : > { %v1023_v29 = vpop.xlane.xlu1 %1022 }
 0x466   : > { %v1027_v28 = vsub.f32 %v969_v15, %v1023_v29 }
 0x468   : > { %v1029_v30 = vmul.f32 1.442695, %v1027_v28 }
 0x46a   : > { %1813 = vpow2.f32 %v1029_v30 }
 0x46d   : > { %v1026_v32 = vpop.xlane.xlu0 %1025 }
 0x46e   : > { %v1028_v33 = vsub.f32 %v1015_v22, %v1026_v32 }
 0x470   : > { %v1031_v34 = vmul.f32 1.442695, %v1028_v33 }
 0x471   : > { %v682_v40 = vpop.permute.xlu0 %681 }
 0x472   : > { %1815 = vpow2.f32 %v1031_v34  ;;  %v715_v42 = vrot.slane %v682_v40, %v2055_v31 }
 0x474   : > { %v716_v50 = vcombine.high %v715_v42, %v1893_v37  ;;  %v723_v53 = vrot.slane %v715_v42, %v2064_v41 }
 0x476   : > { %v730_v52 = vrot.slane %v716_v50, %v2064_v41  ;;  %v731_v55 = vcombine.high %v723_v53, %v1893_v37  ;;  %v738_v44 = vshrl.u32 %v723_v53, 16 }
 0x477   : > { %v1814_v35 = vpop.eup %1813 }
 0x478   : > { %v1033_v36 = vsel %vm1020_vm4, %v1814_v35, 0.0  ;;  %v732_v57 = vcombine.high %v730_v52, %v1893_v37  ;;  %v746_v58 = vshrl.u32 %v731_v55, 16  ;;  %v754_v43 = vshrl.u32 %v730_v52, 16 }
 0x479   : > { %1034 = vadd.xlane.f32.xlu1 %v1033_v36 }
 0x47a   : > { %v762_v63 = vshrl.u32 %v732_v57, 16 }
 0x47f   : > { %v1816_v38 = vpop.eup %1815 }
 0x480   : > { %v1036_v39 = vsel %vm1020_vm4, %v1816_v38, 0.0 }
 0x481   : > { %1037 = vadd.xlane.f32.xlu1 %v1036_v39 }
 0x492   : > { %679 = vrot.lane.b32.xlu1 %v2044_v21, %s1894_s26  ;;  %s1896_s26 = smov [#allocation3]  }
 0x493   : > { %s1829_s28 = sshll.u32 %s1896_s26, 4  ;;  %s1830_s28 = int_to_ptr.vmem [resolvable:$false] %s1829_s28 }
 0x494   : > { %s1831_s29 = scalar_lea.vmem %s1830_s28, 256  ;;  %p1832_p0 = scmp.lt.s32.totalorder %s2255_s16, %s1830_s28 }
 0x495   : > { %p1833_p1 = scmp.lt.s32.totalorder %s1831_s29, %s1825_s20 }
 0x497   : > { %p1834_p2 = por %p1833_p1, %p1832_p0 }
 0x499   : > { %p1835_p3 = pnand %p1834_p2, %p1828_p13 }
 0x502   : > { %v1035_v25 = vpop.xlane.xlu1 %1034 }
 0x503   : > { %1817 = vrcp.f32 %v1035_v25 }
 0x50a   : > { %v1038_v47 = vpop.xlane.xlu1 %1037 }
 0x50b   : > { %1819 = vrcp.f32 %v1038_v47 }
 0x50e   : > { %v680_v49 = vpop.permute.xlu1 %679 }
 0x50f   : > { %v690_v54 = vrot.slane %v680_v49, %v2055_v31 }
 0x510   : > { %v1818_v19 = vpop.eup %1817 }
 0x511   : > { %v691_v56 = vcombine.high %v690_v54, %v1893_v37  ;;  %v698_v21 = vrot.slane %v690_v54, %v2064_v41  ;;  %v1041_v27 = vmul.f32 %v1818_v19, %v1814_v35  ;;  %v1799_v35 = vld [vmem:[%s2299_s4 + $0x8] sm:$0xff]  }
 0x513   : > { %v705_v48 = vrot.slane %v691_v56, %v2064_v41  ;;  %v706_v51 = vcombine.high %v698_v21, %v1893_v37  ;;  %v737_v46 = vshrl.u32 %v698_v21, 16  ;;  %v735_v45 = vpack.i.b16 %v723_v53, %v698_v21 }
 0x514   : > { %v1043_v33 = vpack.c.bf16 %v1041_v27, %v1041_v27  ;;  %v1803_v27 = vld [vmem:[%s2305_s10 + $0x38] sm:$0xff]  }
 0x515   : > { %v707_v59 = vcombine.high %v705_v48, %v1893_v37  ;;  %v745_v60 = vshrl.u32 %v706_v51, 16  ;;  %v751_v61 = vpack.i.b16 %v730_v52, %v705_v48  ;;  %v753_v62 = vshrl.u32 %v705_v48, 16 }
 0x516   : > { %v743_v1 = vpack.i.b16 %v731_v55, %v706_v51  ;;  %v739_v4 = vpack.i.b16 %v738_v44, %v737_v46 }
 0x517   : > { %v759_v2 = vpack.i.b16 %v732_v57, %v707_v59  ;;  %v761_v3 = vshrl.u32 %v707_v59, 16  ;;  %v755_v5 = vpack.i.b16 %v754_v43, %v753_v62  ;;  %v873_v6 = vcombine.low %v735_v45, %v751_v61 }
 0x518   : > { %v747_v7 = vpack.i.b16 %v746_v58, %v745_v60  ;;  %v1820_v22 = vpop.eup %1819  ;;  %v1800_v58 = vld [vmem:[%s2299_s4] sm:$0xff]  }
 0x519   : > { %v763_v9 = vpack.i.b16 %v762_v63, %v761_v3  ;;  %v881_v10 = vcombine.low %v743_v1, %v759_v2  ;;  %v897_v11 = vcombine.low %v739_v4, %v755_v5  ;;  %v880_v12 = vrot.slane %v873_v6, %v2055_v31 }
 0x51a   : > { %v1042_v30 = vmul.f32 %v1820_v22, %v1816_v38 }
 0x51b   : > { %v888_v37 = vrot.slane %v881_v10, %v2055_v31  ;;  %v905_v13 = vcombine.low %v747_v7, %v763_v9  ;;  %v904_v15 = vrot.slane %v897_v11, %v2055_v31 }
 0x51c   : > { %v1044_v34 = vpack.c.bf16 %v1042_v30, %v1042_v30 }
 0x51d   : > { %v889_v14 = vcombine.low %v880_v12, %v888_v37  ;;  %v912_v16 = vrot.slane %v905_v13, %v2055_v31 }
 0x51f   : > { %v896_v17 = vrot.slane %v889_v14, %v2064_v41  ;;  %v913_v18 = vcombine.low %v904_v15, %v912_v16 }
 0x521   : > { %v920_v20 = vrot.slane %v913_v18, %v2064_v41  ;;  %v924_v24 = vshrl.u32 %v896_v17, 16 }
 0x523   : > { %v923_v23 = vpack.i.b16 %v920_v20, %v896_v17  ;;  %v925_v26 = vshrl.u32 %v920_v20, 16 }
 0x525   : > { %v926_v29 = vpack.i.b16 %v925_v26, %v924_v24  ;;  %v1050_v28 = vsel %vm1048_vm5, %v923_v23, 0  ;;  %v1801_v26 = vld [vmem:[%s2303_s8 + $0x8] sm:$0xff]  }
 0x526   : > { %1702 = vmatpush3.bf16.msra.mxu1 %v1050_v28 }
 0x527   : > { %v1096_v32 = vsel %vm1048_vm5, %v926_v29, 0  ;;  %1713 = vmatprep.subr.bf16.mxu1 %v1887_v8  ;;  %v1804_v29 = vld [vmem:[%s2305_s10 + $0x30] sm:$0xff]  }
 0x528   : > { %1708 = vmatpush3.bf16.msra.mxu0 %v1096_v32 }
 0x529   : > { %1704 = vmatmul.mubr.msk.bf16.vlgmr.msra.gmra.mxu1 %vm1020_vm4, %v1043_v33  ;;  %1721 = vmatprep.subr.bf16.mxu0 %v1887_v8 }
 0x52a   : > { %1717 = vmatprep.mubr.msk.bf16.mxu1 %vm1888_vm1, %v1887_v8  ;;  %1714 = vmatpush3.bf16.msra.mxu1 %v1799_v35 }
 0x52b   : > { %1710 = vmatmul.mubr.msk.bf16.vlgmr.msra.gmra.mxu0 %vm1020_vm4, %v1044_v34  ;;  %1715 = vmatprep.subr.bf16.mxu1 %v1887_v8  ;;  %v1636_v34 = vld [vmem:[%s2301_s6] ss:$0 sm:$0xff] }
 0x52c   : > { %1725 = vmatprep.mubr.msk.bf16.mxu0 %vm1888_vm1, %v1887_v8  ;;  %1722 = vmatpush3.bf16.msra.mxu0 %v1801_v26 }
 0x52d   : > { %1723 = vmatprep.subr.bf16.mxu0 %v1887_v8 }
 0x52e   : > { %1716 = vmatpush3.bf16.msra.mxu1 %v1800_v58 }
 0x52f   : > { %1729 = vmatprep.subr.bf16.mxu1 %v1887_v8 }
 0x5e9   : > { %v1086_v36 = vpop.f32.mrf.mxu1 }
 0x5ea   : > { %v1138_v38 = vcombine.high %v1086_v36, %v1887_v8  ;;  %v1145_v25 = vrot.slane %v1086_v36, %v2055_v31  ;;  %v1637_v36 = vld [vmem:[%s2302_s7] ss:$0 sm:$0xff] }
 0x5eb   : > { %v1705_v39 = vpop.f32.mrf.mxu1  ;;  %v1132_v40 = vpop.f32.mrf.mxu0 }
 0x5ec   : > { %v1153_v42 = vcombine.high %v1132_v40, %v1887_v8  ;;  %v1160_v47 = vrot.slane %v1132_v40, %v2055_v31  ;;  %v1152_v49 = vrot.slane %v1138_v38, %v2055_v31 }
 0x5ed   : > { %v1089_v50 = vpop.f32.mrf.mxu1  ;;  %v1711_v53 = vpop.f32.mrf.mxu0 }
 0x5ee   : > { %v1167_v52 = vrot.slane %v1153_v42, %v2055_v31  ;;  %v1168_v54 = vcombine.low %v1145_v25, %v1160_v47  ;;  %v1169_v55 = vcombine.high %v1145_v25, %v1160_v47  ;;  %v1805_v25 = vld [vmem:[%s2305_s10 + $0x28] sm:$0xff]   ;;  %v1806_v42 = vld [vmem:[%s2305_s10 + $0x20] sm:$0xff]   ;;  %v1807_v47 = vld [vmem:[%s2305_s10 + $0x18] sm:$0xff]  }
 0x5ef   : > { %v1706_v56 = vpop.f32.mrf.mxu1  ;;  %v1135_v21 = vpop.f32.mrf.mxu0  ;;  %v1808_v50 = vld [vmem:[%s2305_s10 + $0x10] sm:$0xff]   ;;  %v1809_v53 = vld [vmem:[%s2305_s10 + $0x8] sm:$0xff]  }
 0x5f0   : > { %v1176_v57 = vrot.slane %v1168_v54, %v2064_v41  ;;  %v1183_v48 = vrot.slane %v1169_v55, %v2064_v41  ;;  %v1184_v51 = vcombine.low %v1152_v49, %v1167_v52  ;;  %v1185_v44 = vcombine.high %v1152_v49, %v1167_v52  ;;  %v1810_v49 = vld [vmem:[%s2305_s10] sm:$0xff]  }
 0x5f1   : > { %v1712_v46 = vpop.f32.mrf.mxu0  ;;  %v1638_v52 = vld [vmem:[%s2304_s9] ss:$0 sm:$0xff] }
 0x5f2   : > { %v1192_v59 = vrot.slane %v1184_v51, %v2064_v41  ;;  %v1199_v60 = vrot.slane %v1185_v44, %v2064_v41  ;;  %v1204_v43 = vcombine.low %v1176_v57, %v1183_v48  ;;  %v1630_v45 = vcombine.high %v1176_v57, %v1183_v48 }
 0x5f4   : > { %v1211_v61 = vrot.slane %v1204_v43, %v2055_v31  ;;  %v1219_v62 = vrot.slane %v1630_v45, %v2055_v31  ;;  %v1220_v63 = vcombine.low %v1192_v59, %v1199_v60  ;;  %v1631_v1 = vcombine.high %v1192_v59, %v1199_v60  ;;  %v1642_v59 = vld [vmem:[%s2306_s11] ss:$0 sm:$0xff] }
 0x5f6   : > { %v1227_v2 = vrot.slane %v1220_v63, %v2055_v31  ;;  %v1235_v3 = vrot.slane %v1631_v1, %v2055_v31  ;;  %v1236_v4 = vcombine.low %v1211_v61, %v1219_v62  ;;  %v1632_v31 = vld [vmem:[%s2300_s5] ss:$0 sm:$0xff] }
 0x5f8   : > { %v1244_v5 = vcombine.low %v1227_v2, %v1235_v3  ;;  %v1243_v6 = vrot.slane %v1236_v4, %v2064_v41 }
 0x5fa   : > { %v1251_v7 = vrot.slane %v1244_v5, %v2064_v41 }
 0x5fc   : > { %v1253_v9 = vcombine.high %v1243_v6, %v1251_v7  ;;  %v1252_v10 = vcombine.low %v1243_v6, %v1251_v7 }
 0x5fe   : > { %1255 = vrot.lane.b32.xlu1 %v1253_v9, %s1895_s17 }
 0x670   : > { %v1256_v11 = vpop.permute.xlu1 %1255 }
 0x671   : > { %v1258_v12 = vsel %vm927_vm2, %v1252_v10, %v1256_v11 }
 0x672   : > { %v1259_v37 = vpack.c.bf16 %v1258_v12, %v1258_v12 }
 0x674   : > { %1718 = vmatmul.mubr.msk.bf16.vlgmr.msra.gmra.mxu1 %vm413_vm0, %v1259_v37 }
 0x675   : > { %1745 = vmatprep.mubr.msk.bf16.mxu1 %vm1888_vm1, %v1887_v8  ;;  %1730 = vmatpush3.bf16.msra.mxu1 %v1803_v27 }
 0x676   : > { %1731 = vmatprep.subr.bf16.mxu1 %v1887_v8 }
 0x679   : > { %1732 = vmatpush3.bf16.msra.mxu1 %v1804_v29 }
 0x67a   : > { %1733 = vmatprep.subr.bf16.mxu1 %v1887_v8 }
 0x67d   : > { %1734 = vmatpush3.bf16.msra.mxu1 %v1805_v25 }
 0x67e   : > { %1735 = vmatprep.subr.bf16.mxu1 %v1887_v8 }
 0x681   : > { %1736 = vmatpush3.bf16.msra.mxu1 %v1806_v42 }
 0x682   : > { %1737 = vmatprep.subr.bf16.mxu1 %v1887_v8 }
 0x685   : > { %1738 = vmatpush3.bf16.msra.mxu1 %v1807_v47 }
 0x686   : > { %1739 = vmatprep.subr.bf16.mxu1 %v1887_v8 }
 0x689   : > { %1740 = vmatpush3.bf16.msra.mxu1 %v1808_v50 }
 0x68a   : > { %1741 = vmatprep.subr.bf16.mxu1 %v1887_v8 }
 0x68d   : > { %1742 = vmatpush3.bf16.msra.mxu1 %v1809_v53 }
 0x68e   : > { %1743 = vmatprep.subr.bf16.mxu1 %v1887_v8 }
 0x691   : > { %1744 = vmatpush3.bf16.msra.mxu1 %v1810_v49 }
 0x734   : > { %v1320_v13 = vpop.f32.mrf.mxu1 }
 0x735   : > { %v1321_v14 = vadd.f32 %v1632_v31, %v1320_v13 }
 0x736   : > { %v1719_v41 = vpop.f32.mrf.mxu1 }
 0x737   : > { %v2190_v15 = vadd.f32 %v1321_v14, %v2015_v0  ;;  %v1802_v0 = vld [vmem:[%s2303_s8] sm:$0xff]  }
 0x738   : > { %v1323_v16 = vpop.f32.mrf.mxu1  ;;  %1724 = vmatpush3.bf16.msra.mxu0 %v1802_v0 }
 0x739   : > { %v1329_v17 = vsel %vm413_vm0, %v2190_v15, 0.0 }
 0x73a   : > { %1330 = vadd.xlane.f32.xlu1 %v1329_v17  ;;  %v1720_v18 = vpop.f32.mrf.mxu1 }
 0x7c3   : > { %v1331_v19 = vpop.xlane.xlu1 %1330 }
 0x7c4   : > { %v1332_v20 = vmul.f32 0.03125, %v1331_v19 }
 0x7c6   : > { %v1333_v22 = vsub.f32 %v2190_v15, %v1332_v20 }
 0x7c8   : > { %v1334_v23 = vmul.f32 %v1333_v22, %v1333_v22 }
 0x7ca   : > { %v1335_v24 = vsel %vm413_vm0, %v1334_v23, 0.0 }
 0x7cb   : > { %1336 = vadd.xlane.f32.xlu0 %v1335_v24 }
 0x854   : > { %v1337_v28 = vpop.xlane.xlu0 %1336 }
 0x855   : > { %v1338_v30 = vmul.f32 0.03125, %v1337_v28 }
 0x857   : > { %v1339_v32 = vadd.f32 1e-05, %v1338_v30 }
 0x859   : > { %1821 = vrsqrt.f32 %v1339_v32 }
 0x866   : > { %v1822_v33 = vpop.eup %1821 }
 0x867   : > { %v1341_v35 = vmul.f32 %v1822_v33, %v1333_v22 }
 0x869   : > { %v1348_v38 = vmul.f32 %v1636_v34, %v1341_v35 }
 0x86b   : > { %v1355_v39 = vadd.f32 %v1637_v36, %v1348_v38 }
 0x86d   : > { %v1356_v40 = vpack.c.bf16 %v1355_v39, %v1355_v39 }
 0x86f   : > { %1726 = vmatmul.mubr.msk.bf16.vlgmr.msra.gmra.mxu0 %vm413_vm0, %v1356_v40 }
 0x92f   : > { %v1417_v54 = vpop.f32.mrf.mxu0 }
 0x930   : > { %v1418_v55 = vadd.f32 %v1638_v52, %v1417_v54 }
 0x931   : > { %v1727_v56 = vpop.f32.mrf.mxu0 }
 0x932   : > { %v1424_v21 = vmul.f32 0.70710677, %v1418_v55  ;;  %v1423_v8 = vmul.f32 0.5, %v1418_v55 }
 0x933   : > { %v1420_v57 = vpop.f32.mrf.mxu0 }
 0x934   : > { %1823 = verf.f32 %v1424_v21 }
 0x935   : > { %v1728_v48 = vpop.f32.mrf.mxu0 }
 0x941   : > { %v1824_v51 = vpop.eup %1823 }
 0x942   : > { %v1426_v44 = vadd.f32 1.0, %v1824_v51 }
 0x944   : > { %v1427_v46 = vmul.f32 %v1426_v44, %v1423_v8 }
 0x946   : > { %v1428_v58 = vpack.c.bf16 %v1427_v46, %v1427_v46 }
 0x948   : > { %1746 = vmatmul.mubr.bf16.vlgmr.msra.gmra.mxu1 %v1428_v58 }
 0xa08   : > { %v1534_v60 = vpop.f32.mrf.mxu1 }
 0xa09   : > { %v1535_v43 = vadd.f32 %v1642_v59, %v1534_v60 }
 0xa0a   : > { %v1747_v45 = vpop.f32.mrf.mxu1 }
 0xa0b   : > { %v1540_v61 = vadd.f32 %v1535_v43, %v2190_v15 }
 0xa0c   : > { %v1537_v62 = vpop.f32.mrf.mxu1 }
 0xa0d   : > { %1541 = vst.msk [vmem:[%s404_s15] sm:$0xff] %vm413_vm0, %v1540_v61 }
 0xa0e   : > { %v1748_v63 = vpop.f32.mrf.mxu1 }
 0xa0f   : > { %1838 = shalt.err (!%p1835_p3)
}
 0xa10   : > { %s1839_s15 = scalar_lea.hbm %s2253_s0, 128  ;;  %s1843_s18 = scalar_lea.hbm %s2307_s12, 256 }
 0xa11   : > { %p1840_p4 = scmp.ne.s32.totalorder %s2253_s0, %s1839_s15  ;;  %p1844_p9 = scmp.lt.s32.totalorder %s2253_s0, %s2307_s12 }
 0xa12   : > { %p1845_p10 = scmp.lt.s32.totalorder %s1843_s18, %s1839_s15 }
 0xa13   : > { %p1841_p7 = pnand %p1840_p4, %p2000_p5 }
 0xa14   : > { %p1846_p11 = por %p1845_p10, %p1844_p9 }
 0xa15   : > { %p1842_p8 = pneg %p1841_p7 }
 0xa17   : > { %p1847_p12 = pnand %p1846_p11, %p1842_p8 }
 0xa19   : > { %1850 = shalt.err (!%p1847_p12)
}
 0xa1a   : > { %1749 = dma.vmem_to_hbm [thread:$0]  (%p2000_p5), %s2255_s16, 128, %s2253_s0, %s1543_s25  }
 0xa1b PF: > { %p1755_p13 = scmp.ge.s32.totalorder %s1885_s24, 2  ;;  %s1568_s20 = sand.u32 1, %s1873_s21  }
 0xa1c   : > { %s1569_s1 = scalar_lea.sflag [#allocation4], %s1568_s20 }
 0xa1d   : > { %p1752_p0 = pnand %p1755_p13, %p2004_p6 }
 0xa1f   : > { %p1753_p1 = pneg %p1752_p0 }
 0xa21   : > { %1868 = dma.done.wait (%p1753_p1), %s1569_s1, 128  }
 0xa22   : > { %1870 = vsyncadd (%p1753_p1), %s1569_s1, 4294967168  ;;  %p22_p2 = scmp.ge.s32.totalorder %s1987_s27, 4   ;;  %s2314_s21 = smov %s1877_s22 }
 0xa23   : > { %s2315_s22 = smov %s1881_s23  ;;  %s2316_s23 = smov %s1998_s30 }
 0xa24   : > { %s2317_s24 = smov %s1987_s27  ;;  %24 = sbr.rel (!%p22_p2) target bundleno = 6 (0x6), region = 103 }
 0xa29   :  { %1574 = vsyncpa [#allocation4], 1 }
 0xa2a   :  { %1576 = vsyncpa [#allocation4 + $0x1], 1 }

// kernel: tpu_custom_call.1
= control target key start
LH: loop header
LB: loop body
LE: loop exit
PB: predicated region body
PF: predicated region fallthrough
CT: control target
= control target key end

     0   :  { %s1664_s0 = inlined_call_operand.vmem [shape: f32[2,8,32], index: 0, kind: input, shape index: {}]   ;;  %s1665_s1 = inlined_call_operand.vmem [shape: f32[1,32], index: 1, kind: input, shape index: {}]   ;;  %s1666_s2 = inlined_call_operand.vmem [shape: f32[1,32], index: 2, kind: input, shape index: {}]   ;;  %s1667_s3 = inlined_call_operand.vmem [shape: bf16[32,96], index: 3, kind: input, shape index: {}]   ;;  %s1668_s4 = inlined_call_operand.vmem [shape: bf16[32,32], index: 4, kind: input, shape index: {}]   ;;  %s1669_s5 = inlined_call_operand.vmem [shape: f32[1,32], index: 5, kind: input, shape index: {}]   ;;  %s1670_s6 = inlined_call_operand.vmem [shape: f32[1,32], index: 6, kind: input, shape index: {}]   ;;  %s1671_s7 = inlined_call_operand.vmem [shape: f32[1,32], index: 7, kind: input, shape index: {}]   ;;  %s1672_s8 = inlined_call_operand.vmem [shape: bf16[32,128], index: 8, kind: input, shape index: {}]   ;;  %s1673_s9 = inlined_call_operand.vmem [shape: f32[1,128], index: 9, kind: input, shape index: {}]   ;;  %s1674_s10 = inlined_call_operand.vmem [shape: bf16[128,32], index: 10, kind: input, shape index: {}]   ;;  %s1675_s11 = inlined_call_operand.vmem [shape: f32[1,32], index: 11, kind: input, shape index: {}]   ;;  %s1676_s12 = inlined_call_operand.hbm [shape: f32[2,8,32], index: 12, kind: output, shape index: {}]  }
   0x1   :  { %1677 = sst [smem:[#allocation6_spill]] %s1664_s0 }
   0x2   :  { %1678 = sst [smem:[#allocation7_spill]] %s1665_s1 }
   0x3   :  { %17 = vsyncpa [#allocation4], 0 }
   0x4   :  { %19 = vsyncpa [#allocation4 + $0x1], 0  ;;  %s1438_s21 = smov 0   ;;  %s1440_s22 = smov 0  }
   0x5   :  { %s1442_s23 = smov 0   ;;  %s1444_s24 = smov 0  }
   0x6 LB: > { %s1459_s25 = sadd.s32 4294967295, %s1362_s24   ;;  %s1095_s26 = sadd.s32 4294967294, %s1362_s24   ;;  %s1362_s24 = sphi %s1444_s24, %s1686_s24   ;;  %s1358_s23 = sphi %s1442_s23, %s1685_s23   ;;  %s1354_s22 = sphi %s1440_s22, %s1684_s22   ;;  %s1350_s21 = sphi %s1438_s21, %s1683_s21  }
   0x7   : > { %s1463_s27 = sadd.s32 1, %s1362_s24   ;;  %s289_s28 = sadd.s32 1, %s1358_s23 }
   0x8   : > { %s286_s29 = ssub.s32 %s1362_s24, %s1463_s27  ;;  %p299_p0 = scmp.ne.s32.totalorder %s1358_s23, %s1354_s22 }
   0x9   : > { %p287_p1 = scmp.eq.s32.totalorder %s286_s29, 0  ;;  %p300_p2 = scmp.eq.s32.totalorder %s1459_s25, 1 }
   0xa   : > { %p305_p3 = scmp.ne.s32.totalorder %s1354_s22, %s1350_s21  ;;  %p306_p4 = scmp.eq.s32.totalorder %s1095_s26, 1 }
   0xb   : > { %s1474_s30 = scalar_select %p287_p1, %s1358_s23, %s289_s28  }
   0xc   : > { %p1476_p5 = por %p300_p2, %p299_p0  ;;  %p1480_p6 = por %p306_p4, %p305_p3 }
   0xd   : > { %p1098_p7 = scmp.ge.s32.totalorder %s1362_s24, 1  ;;  %p364_p8 = scmp.lt.s32.totalorder %s1362_s24, 3 }
   0xf   : > { %p365_p9 = pnand %p1098_p7, %p364_p8 }
  0x10   : > { %p405_p10 = scmp.lt.s32.totalorder (!%p365_p9), %s1459_s25, 1  ;;  %s1681_s0 = sld [smem:[#allocation6_spill]] (!%p365_p9) }
  0x11   : > { %368 = sbr.rel (%p365_p9) target bundleno = 2425 (0x979), region = 68  ;;  %s1682_s1 = sld [smem:[#allocation7_spill]] (!%p365_p9) }
  0x12   : > { %s1367_s20 = smov (!%p365_p9), 96   ;;  %s1368_s26 = smov (!%p365_p9), 80  }
  0x13   : > { %s1369_s28 = smov (!%p365_p9), 48   ;;  %s1370_s29 = smov (!%p365_p9), 64  }
  0x16   : > { %s406_s15 = scalar_select %p405_p10, %s1459_s25, 1  ;;  %vm413_vm0 = vcmask 261120   ;;  %v1274_v7 = vld [vmem:[%s1667_s3 + $0x8] sm:$0xff]   ;;  %v1364_v8 = vmov 0.0   ;;  %vm1365_vm1 = vmmov 0   ;;  %v1275_v9 = vld [vmem:[%s1667_s3] sm:$0xff]   ;;  %v502_v30 = vlaneseq }
  0x17   : > { %1159 = vmatprep.subr.bf16.mxu0 %v1364_v8  ;;  %1163 = vmatprep.mubr.msk.bf16.mxu0 %vm1365_vm1, %v1364_v8  ;;  %v1101_v14 = vld [vmem:[%s1682_s1] ss:$0 sm:$0xff]  ;;  %vm512_vm2 = vcmask 130048   ;;  %vm559_vm4 = vcmask 64512   ;;  %vm577_vm5 = vcmask 1043456   ;;  %vm736_vm6 = vcmask 261248  }
  0x18   : > { %s1100_s16 = sshll.u32 %s406_s15, 3  ;;  %1160 = vmatpush3.bf16.msra.mxu0 %v1274_v7  ;;  %1179 = vmatprep.subr.bf16.mxu1 %v1364_v8  ;;  %v1102_v16 = vld [vmem:[%s1666_s2] ss:$0 sm:$0xff]  ;;  %v503_v31 = vshrl.u32 %v502_v30, 7  ;;  %v505_v32 = vand.u32 127, %v502_v30 }
  0x19   : > { %s408_s19 = scalar_lea.vmem %s1681_s0, %s1100_s16  ;;  %1161 = vmatprep.subr.bf16.mxu0 %v1364_v8  ;;  %1181 = vmatprep.mubr.msk.bf16.mxu1 %vm1365_vm1, %v1364_v8  ;;  %s1130_s16 = sshll.u32 %s1459_s25, 7 }
  0x1a   : > { %v1491_v0 = vld [vmem:[%s408_s19] sm:$0xff]  ;;  %s1366_s19 = smov 112   ;;  %vm506_vm3 = vcmp.gt.s32.totalorder %v505_v32, %v503_v31  ;;  %v1278_v32 = vld [vmem:[%s1672_s8 + $0x8] sm:$0xff]   ;;  %s1622_s0 = scalar_lea.hbm %s1676_s12, %s1130_s16 }
  0x1b   : > { %v414_v1 = vsel %vm413_vm0, %v1491_v0, 0.0  ;;  %v507_v33 = vsel %vm506_vm3, -1e+30, %v1364_v8 }
  0x1c   : > { %415 = vadd.xlane.f32.xlu0 %v414_v1  ;;  %1162 = vmatpush3.bf16.msra.mxu0 %v1275_v9 }
  0x1d   : > { %1167 = vmatprep.subr.bf16.mxu0 %v1364_v8 }
  0xa5   : > { %v416_v2 = vpop.xlane.xlu0 %415 }
  0xa6   : > { %v418_v3 = vmul.f32 0.03125, %v416_v2 }
  0xa8   : > { %v419_v4 = vsub.f32 %v1491_v0, %v418_v3 }
  0xaa   : > { %v420_v5 = vmul.f32 %v419_v4, %v419_v4 }
  0xac   : > { %v421_v6 = vsel %vm413_vm0, %v420_v5, 0.0  ;;  %v1276_v5 = vld [vmem:[%s1668_s4 + $0x8] sm:$0xff]  }
  0xad   : > { %422 = vadd.xlane.f32.xlu0 %v421_v6  ;;  %v1277_v6 = vld [vmem:[%s1668_s4] sm:$0xff]  }
 0x136   : > { %v423_v10 = vpop.xlane.xlu0 %422 }
 0x137   : > { %v424_v11 = vmul.f32 0.03125, %v423_v10 }
 0x139   : > { %v425_v12 = vadd.f32 1e-05, %v424_v11 }
 0x13b   : > { %1288 = vrsqrt.f32 %v425_v12 }
 0x148   : > { %v1289_v13 = vpop.eup %1288 }
 0x149   : > { %v427_v15 = vmul.f32 %v1289_v13, %v419_v4 }
 0x14b   : > { %v434_v17 = vmul.f32 %v1101_v14, %v427_v15 }
 0x14d   : > { %v441_v18 = vadd.f32 %v1102_v16, %v434_v17 }
 0x14f   : > { %v442_v19 = vpack.c.bf16 %v441_v18, %v441_v18 }
 0x151   : > { %1164 = vmatmul.mubr.msk.bf16.vlgmr.msra.gmra.mxu0 %vm413_vm0, %v442_v19  ;;  %v1110_v19 = vld [vmem:[%s1669_s5] ss:$0 sm:$0xff] }
 0x152   : > { %1169 = vmatprep.mubr.msk.bf16.mxu0 %vm1365_vm1, %v1364_v8 }
 0x211   : > { %v496_v20 = vpop.f32.mrf.mxu0 }
 0x212   : > { %v508_v21 = vpack.c.bf16 %v496_v20, %v496_v20 }
 0x213   : > { %v1165_v22 = vpop.f32.mrf.mxu0 }
 0x214   : > { %622 = vrot.lane.b32.xlu0 %v508_v21, %s1366_s19  ;;  %510 = vrot.lane.b32.xlu1 %v508_v21, %s1367_s20  ;;  %s1371_s19 = smov 16  }
 0x215   : > { %v499_v23 = vpop.f32.mrf.mxu0 }
 0x217   : > { %v1166_v24 = vpop.f32.mrf.mxu0 }
 0x218   : > { %624 = vrot.lane.b32.xlu1 %v508_v21, %s1368_s26  ;;  %s402_s26 = sand.u32 1, %s1354_s22  }
 0x219   : > { %s1023_s25 = scalar_lea.sflag [#allocation4], %s402_s26 }
 0x286   : > { %v511_v25 = vpop.permute.xlu1 %510  ;;  %v623_v29 = vpop.permute.xlu0 %622 }
 0x287   : > { %v517_v26 = vsel %vm512_vm2, %v511_v25, 0 }
 0x288   : > { %1168 = vmatpush3.bf16.xpose.msra.mxu0 %v517_v26 }
 0x289   : > { %1173 = vmatprep.subr.bf16.mxu0 %v1364_v8 }
 0x28a   : > { %v625_v27 = vpop.permute.xlu1 %624 }
 0x28b   : > { %v630_v28 = vsel %vm512_vm2, %v625_v27, 0 }
 0x28c   : > { %1180 = vmatpush3.bf16.xpose.msra.mxu1 %v630_v28 }
 0x28d   : > { %1191 = vmatprep.subr.bf16.mxu1 %v1364_v8 }
 0x28f   : > { %1170 = vmatmul.mubr.msk.bf16.vlgmr.msra.gmra.mxu0 %vm512_vm2, %v508_v21 }
 0x290   : > { %1175 = vmatprep.mubr.msk.bf16.mxu0 %vm1365_vm1, %v1364_v8 }
 0x293   : > { %1182 = vmatmul.mubr.msk.bf16.vlgmr.msra.gmra.mxu1 %vm512_vm2, %v623_v29 }
 0x294   : > { %1195 = vmatprep.mubr.msk.bf16.mxu1 %vm1365_vm1, %v1364_v8  ;;  %1192 = vmatpush3.bf16.msra.mxu1 %v1276_v5 }
 0x295   : > { %1193 = vmatprep.subr.bf16.mxu1 %v1364_v8 }
 0x298   : > { %1194 = vmatpush3.bf16.msra.mxu1 %v1277_v6 }
 0x299   : > { %1207 = vmatprep.subr.bf16.mxu1 %v1364_v8 }
 0x34f   : > { %v553_v34 = vpop.f32.mrf.mxu0 }
 0x350   : > { %v554_v35 = vadd.f32 %v553_v34, %v507_v33  ;;  %v1281_v34 = vld [vmem:[%s1674_s10 + $0x30] sm:$0xff]  }
 0x351   : > { %v1171_v36 = vpop.f32.mrf.mxu0 }
 0x352   : > { %v560_v37 = vsel %vm559_vm4, %v554_v35, -inf }
 0x353   : > { %v666_v38 = vpop.f32.mrf.mxu1  ;;  %561 = vmax.xlane.f32.xlu1 %v560_v37  ;;  %v556_v39 = vpop.f32.mrf.mxu0 }
 0x354   : > { %v667_v40 = vadd.f32 %v666_v38, %v507_v33  ;;  %v1280_v33 = vld [vmem:[%s1674_s10 + $0x38] sm:$0xff]   ;;  %v1114_v39 = vld [vmem:[%s1670_s6] ss:$0 sm:$0xff] }
 0x355   : > { %v1172_v41 = vpop.f32.mrf.mxu0  ;;  %v1183_v42 = vpop.f32.mrf.mxu1 }
 0x356   : > { %v672_v43 = vsel %vm559_vm4, %v667_v40, -inf  ;;  %v1115_v41 = vld [vmem:[%s1671_s7] ss:$0 sm:$0xff] }
 0x357   : > { %673 = vmax.xlane.f32.xlu0 %v672_v43  ;;  %v669_v44 = vpop.f32.mrf.mxu1 }
 0x359   : > { %v1184_v45 = vpop.f32.mrf.mxu1 }
 0x35a   : > { %v1282_v45 = vld [vmem:[%s1674_s10 + $0x28] sm:$0xff]  }
 0x36d   : > { %684 = vrot.lane.b32.xlu0 %v508_v21, %s1369_s28  ;;  %s1099_s28 = sshll.u32 %s402_s26, 3 }
 0x36e   : > { %s404_s17 = scalar_lea.vmem [#allocation3], %s1099_s28 }
 0x36f   : > { %s1036_s18 = sshll.u32 %s404_s17, 4  ;;  %s1624_s18 = int_to_ptr.vmem [resolvable:$true] %s1036_s18 }
 0x370   : > { %s1302_s28 = scalar_lea.vmem %s1624_s18, 128 }
 0x371   : > { %p1303_p11 = scmp.ne.s32.totalorder %s1624_s18, %s1302_s28 }
 0x373   : > { %p1304_p12 = pnand %p1303_p11, %p1476_p5 }
 0x375   : > { %p1305_p13 = pneg %p1304_p12 }
 0x3dc   : > { %v562_v46 = vpop.xlane.xlu1 %561 }
 0x3dd   : > { %v563_v47 = vsub.f32 %v554_v35, %v562_v46  ;;  %v1283_v46 = vld [vmem:[%s1674_s10 + $0x20] sm:$0xff]  }
 0x3df   : > { %v564_v48 = vmul.f32 1.442695, %v563_v47  ;;  %v1284_v47 = vld [vmem:[%s1674_s10 + $0x18] sm:$0xff]  }
 0x3e0   : > { %v674_v49 = vpop.xlane.xlu0 %673 }
 0x3e1   : > { %1290 = vpow2.f32 %v564_v48  ;;  %v675_v50 = vsub.f32 %v667_v40, %v674_v49  ;;  %v1285_v48 = vld [vmem:[%s1674_s10 + $0x10] sm:$0xff]   ;;  %v1286_v49 = vld [vmem:[%s1674_s10 + $0x8] sm:$0xff]  }
 0x3e3   : > { %v676_v51 = vmul.f32 1.442695, %v675_v50  ;;  %v1287_v50 = vld [vmem:[%s1674_s10] sm:$0xff]  }
 0x3e4   : > { %v685_v62 = vpop.permute.xlu0 %684 }
 0x3e5   : > { %1292 = vpow2.f32 %v676_v51  ;;  %v690_v2 = vsel %vm577_vm5, %v685_v62, 0  ;;  %v1116_v51 = vld [vmem:[%s1673_s9] ss:$0 sm:$0xff] }
 0x3e6   : > { %v1120_v62 = vld [vmem:[%s1675_s11] ss:$0 sm:$0xff] }
 0x3ee   : > { %v1291_v52 = vpop.eup %1290 }
 0x3ef   : > { %v566_v53 = vsel %vm559_vm4, %v1291_v52, 0.0 }
 0x3f0   : > { %567 = vadd.xlane.f32.xlu1 %v566_v53 }
 0x3f2   : > { %v1293_v54 = vpop.eup %1292 }
 0x3f3   : > { %v678_v55 = vsel %vm559_vm4, %v1293_v54, 0.0 }
 0x3f4   : > { %679 = vadd.xlane.f32.xlu1 %v678_v55 }
 0x405   : > { %572 = vrot.lane.b32.xlu1 %v508_v21, %s1370_s29  ;;  %s1372_s29 = smov [#allocation3]  }
 0x406   : > { %s1306_s15 = sshll.u32 %s1372_s29, 4  ;;  %s1307_s15 = int_to_ptr.vmem [resolvable:$false] %s1306_s15 }
 0x407   : > { %s1308_s16 = scalar_lea.vmem %s1307_s15, 256  ;;  %p1309_p0 = scmp.lt.s32.totalorder %s1624_s18, %s1307_s15 }
 0x408   : > { %p1310_p1 = scmp.lt.s32.totalorder %s1308_s16, %s1302_s28 }
 0x40a   : > { %p1311_p2 = por %p1310_p1, %p1309_p0 }
 0x40c   : > { %p1312_p3 = pnand %p1311_p2, %p1305_p13 }
 0x479   : > { %v568_v56 = vpop.xlane.xlu1 %567 }
 0x47a   : > { %1294 = vrcp.f32 %v568_v56 }
 0x47d   : > { %v680_v57 = vpop.xlane.xlu1 %679 }
 0x47e   : > { %1296 = vrcp.f32 %v680_v57 }
 0x481   : > { %v573_v58 = vpop.permute.xlu1 %572 }
 0x482   : > { %v579_v59 = vsel %vm577_vm5, %v573_v58, 0 }
 0x483   : > { %1174 = vmatpush3.bf16.msra.mxu0 %v579_v59 }
 0x484   : > { %1185 = vmatprep.subr.bf16.mxu0 %v1364_v8 }
 0x487   : > { %v1295_v60 = vpop.eup %1294 }
 0x488   : > { %v570_v61 = vmul.f32 %v1295_v60, %v1291_v52 }
 0x48a   : > { %v571_v63 = vpack.c.bf16 %v570_v61, %v570_v61 }
 0x48b   : > { %v1297_v1 = vpop.eup %1296 }
 0x48c   : > { %1176 = vmatmul.mubr.msk.bf16.vlgmr.msra.gmra.mxu0 %vm559_vm4, %v571_v63  ;;  %v682_v3 = vmul.f32 %v1297_v1, %v1293_v54 }
 0x48d   : > { %1186 = vmatpush3.bf16.msra.mxu0 %v690_v2  ;;  %1187 = vmatprep.mubr.msk.bf16.mxu0 %vm1365_vm1, %v1364_v8 }
 0x48e   : > { %1199 = vmatprep.subr.bf16.mxu0 %v1364_v8  ;;  %v683_v4 = vpack.c.bf16 %v682_v3, %v682_v3 }
 0x494   : > { %1188 = vmatmul.mubr.msk.bf16.vlgmr.msra.gmra.mxu0 %vm559_vm4, %v683_v4 }
 0x495   : > { %1203 = vmatprep.mubr.msk.bf16.mxu0 %vm1365_vm1, %v1364_v8  ;;  %1200 = vmatpush3.bf16.msra.mxu0 %v1278_v32 }
 0x496   : > { %1201 = vmatprep.subr.bf16.mxu0 %v1364_v8 }
 0x54c   : > { %v615_v7 = vpop.f32.mrf.mxu0 }
 0x54d   : > { %621 = vst.msk [vmem:[#allocation2] sm:$0xff] %vm512_vm2, %v615_v7 }
 0x54e   : > { %v1177_v9 = vpop.f32.mrf.mxu0 }
 0x550   : > { %v618_v10 = vpop.f32.mrf.mxu0 }
 0x552   : > { %v1178_v11 = vpop.f32.mrf.mxu0 }
 0x554   : > { %v726_v12 = vpop.f32.mrf.mxu0 }
 0x555   : > { %733 = vrot.lane.b32.xlu1 %v726_v12, %s1371_s19 }
 0x556   : > { %v1189_v13 = vpop.f32.mrf.mxu0 }
 0x558   : > { %v729_v14 = vpop.f32.mrf.mxu0 }
 0x55a   : > { %v1190_v15 = vpop.f32.mrf.mxu0 }
 0x5c7   : > { %v734_v16 = vpop.permute.xlu1 %733 }
 0x5c8   : > { %737 = vst.msk [vmem:[#allocation2] sm:$0xff] %vm736_vm6, %v734_v16 }
 0x5cf   : > { %v738_v17 = vld [vmem:[#allocation2] sm:$0xff] }
 0x5d0   : > { %v739_v18 = vpack.c.bf16 %v738_v17, %v738_v17 }
 0x5d2   : > { %1196 = vmatmul.mubr.msk.bf16.vlgmr.msra.gmra.mxu1 %vm413_vm0, %v739_v18 }
 0x5d3   : > { %1223 = vmatprep.mubr.msk.bf16.mxu1 %vm1365_vm1, %v1364_v8  ;;  %1208 = vmatpush3.bf16.msra.mxu1 %v1280_v33 }
 0x5d4   : > { %1209 = vmatprep.subr.bf16.mxu1 %v1364_v8 }
 0x5d7   : > { %1210 = vmatpush3.bf16.msra.mxu1 %v1281_v34 }
 0x5d8   : > { %1211 = vmatprep.subr.bf16.mxu1 %v1364_v8 }
 0x5db   : > { %1212 = vmatpush3.bf16.msra.mxu1 %v1282_v45 }
 0x5dc   : > { %1213 = vmatprep.subr.bf16.mxu1 %v1364_v8 }
 0x5df   : > { %1214 = vmatpush3.bf16.msra.mxu1 %v1283_v46 }
 0x5e0   : > { %1215 = vmatprep.subr.bf16.mxu1 %v1364_v8 }
 0x5e3   : > { %1216 = vmatpush3.bf16.msra.mxu1 %v1284_v47 }
 0x5e4   : > { %1217 = vmatprep.subr.bf16.mxu1 %v1364_v8 }
 0x5e7   : > { %1218 = vmatpush3.bf16.msra.mxu1 %v1285_v48 }
 0x5e8   : > { %1219 = vmatprep.subr.bf16.mxu1 %v1364_v8 }
 0x5eb   : > { %1220 = vmatpush3.bf16.msra.mxu1 %v1286_v49 }
 0x5ec   : > { %1221 = vmatprep.subr.bf16.mxu1 %v1364_v8 }
 0x5ef   : > { %1222 = vmatpush3.bf16.msra.mxu1 %v1287_v50 }
 0x692   : > { %v800_v20 = vpop.f32.mrf.mxu1 }
 0x693   : > { %v801_v21 = vadd.f32 %v1110_v19, %v800_v20 }
 0x694   : > { %v1197_v22 = vpop.f32.mrf.mxu1 }
 0x695   : > { %v1559_v23 = vadd.f32 %v801_v21, %v1491_v0  ;;  %v1279_v0 = vld [vmem:[%s1672_s8] sm:$0xff]  }
 0x696   : > { %v803_v24 = vpop.f32.mrf.mxu1  ;;  %1202 = vmatpush3.bf16.msra.mxu0 %v1279_v0 }
 0x697   : > { %v809_v25 = vsel %vm413_vm0, %v1559_v23, 0.0 }
 0x698   : > { %810 = vadd.xlane.f32.xlu1 %v809_v25  ;;  %v1198_v26 = vpop.f32.mrf.mxu1 }
 0x721   : > { %v811_v27 = vpop.xlane.xlu1 %810 }
 0x722   : > { %v812_v28 = vmul.f32 0.03125, %v811_v27 }
 0x724   : > { %v813_v29 = vsub.f32 %v1559_v23, %v812_v28 }
 0x726   : > { %v814_v30 = vmul.f32 %v813_v29, %v813_v29 }
 0x728   : > { %v815_v31 = vsel %vm413_vm0, %v814_v30, 0.0 }
 0x729   : > { %816 = vadd.xlane.f32.xlu0 %v815_v31 }
 0x7b2   : > { %v817_v35 = vpop.xlane.xlu0 %816 }
 0x7b3   : > { %v818_v36 = vmul.f32 0.03125, %v817_v35 }
 0x7b5   : > { %v819_v37 = vadd.f32 1e-05, %v818_v36 }
 0x7b7   : > { %1298 = vrsqrt.f32 %v819_v37 }
 0x7c4   : > { %v1299_v38 = vpop.eup %1298 }
 0x7c5   : > { %v821_v40 = vmul.f32 %v1299_v38, %v813_v29 }
 0x7c7   : > { %v828_v42 = vmul.f32 %v1114_v39, %v821_v40 }
 0x7c9   : > { %v835_v43 = vadd.f32 %v1115_v41, %v828_v42 }
 0x7cb   : > { %v836_v44 = vpack.c.bf16 %v835_v43, %v835_v43 }
 0x7cd   : > { %1204 = vmatmul.mubr.msk.bf16.vlgmr.msra.gmra.mxu0 %vm413_vm0, %v836_v44 }
 0x88d   : > { %v897_v52 = vpop.f32.mrf.mxu0 }
 0x88e   : > { %v898_v53 = vadd.f32 %v1116_v51, %v897_v52 }
 0x88f   : > { %v1205_v54 = vpop.f32.mrf.mxu0 }
 0x890   : > { %v904_v55 = vmul.f32 0.70710677, %v898_v53  ;;  %v903_v8 = vmul.f32 0.5, %v898_v53 }
 0x891   : > { %v900_v56 = vpop.f32.mrf.mxu0 }
 0x892   : > { %1300 = verf.f32 %v904_v55 }
 0x893   : > { %v1206_v57 = vpop.f32.mrf.mxu0 }
 0x89f   : > { %v1301_v58 = vpop.eup %1300 }
 0x8a0   : > { %v906_v59 = vadd.f32 1.0, %v1301_v58 }
 0x8a2   : > { %v907_v60 = vmul.f32 %v906_v59, %v903_v8 }
 0x8a4   : > { %v908_v61 = vpack.c.bf16 %v907_v60, %v907_v60 }
 0x8a6   : > { %1224 = vmatmul.mubr.bf16.vlgmr.msra.gmra.mxu1 %v908_v61 }
 0x966   : > { %v1014_v63 = vpop.f32.mrf.mxu1 }
 0x967   : > { %v1015_v1 = vadd.f32 %v1120_v62, %v1014_v63 }
 0x968   : > { %v1225_v2 = vpop.f32.mrf.mxu1 }
 0x969   : > { %v1020_v3 = vadd.f32 %v1015_v1, %v1559_v23 }
 0x96a   : > { %v1017_v4 = vpop.f32.mrf.mxu1 }
 0x96b   : > { %1021 = vst.msk [vmem:[%s404_s17] sm:$0xff] %vm413_vm0, %v1020_v3 }
 0x96c   : > { %v1226_v5 = vpop.f32.mrf.mxu1 }
 0x96d   : > { %1315 = shalt.err (!%p1312_p3)
}
 0x96e   : > { %s1316_s17 = scalar_lea.hbm %s1622_s0, 128  ;;  %s1320_s20 = scalar_lea.hbm %s1676_s12, 256 }
 0x96f   : > { %p1317_p4 = scmp.ne.s32.totalorder %s1622_s0, %s1316_s17  ;;  %p1321_p9 = scmp.lt.s32.totalorder %s1622_s0, %s1676_s12 }
 0x970   : > { %p1322_p10 = scmp.lt.s32.totalorder %s1320_s20, %s1316_s17 }
 0x971   : > { %p1318_p7 = pnand %p1317_p4, %p1476_p5 }
 0x972   : > { %p1323_p11 = por %p1322_p10, %p1321_p9 }
 0x973   : > { %p1319_p8 = pneg %p1318_p7 }
 0x975   : > { %p1324_p12 = pnand %p1323_p11, %p1319_p8 }
 0x977   : > { %1327 = shalt.err (!%p1324_p12)
}
 0x978   : > { %1227 = dma.vmem_to_hbm [thread:$0]  (%p1476_p5), %s1624_s18, 128, %s1622_s0, %s1023_s25  }
 0x979 PF: > { %p1233_p13 = scmp.ge.s32.totalorder %s1362_s24, 2  ;;  %s1048_s28 = sand.u32 1, %s1350_s21  }
 0x97a   : > { %s1049_s1 = scalar_lea.sflag [#allocation4], %s1048_s28 }
 0x97b   : > { %p1230_p0 = pnand %p1233_p13, %p1480_p6 }
 0x97d   : > { %p1231_p1 = pneg %p1230_p0 }
 0x97f   : > { %1345 = dma.done.wait (%p1231_p1), %s1049_s1, 128  }
 0x980   : > { %1347 = vsyncadd (%p1231_p1), %s1049_s1, 4294967168  ;;  %p22_p2 = scmp.ge.s32.totalorder %s1463_s27, 4   ;;  %s1683_s21 = smov %s1354_s22 }
 0x981   : > { %s1684_s22 = smov %s1358_s23  ;;  %s1685_s23 = smov %s1474_s30 }
 0x982   : > { %s1686_s24 = smov %s1463_s27  ;;  %24 = sbr.rel (!%p22_p2) target bundleno = 6 (0x6), region = 103 }
 0x987   :  { %1054 = vsyncpa [#allocation4], 1 }
 0x988   :  { %1056 = vsyncpa [#allocation4 + $0x1], 1 }

// kernel: tpu_custom_call.1
= control target key start
LH: loop header
LB: loop body
LE: loop exit
PB: predicated region body
PF: predicated region fallthrough
CT: control target
= control target key end

     0   :  { %s2295_s0 = inlined_call_operand.vmem [shape: f32[2,8,32], index: 0, kind: input, shape index: {}]   ;;  %s2296_s1 = inlined_call_operand.vmem [shape: f32[1,32], index: 1, kind: input, shape index: {}]   ;;  %s2297_s2 = inlined_call_operand.vmem [shape: f32[1,32], index: 2, kind: input, shape index: {}]   ;;  %s2298_s3 = inlined_call_operand.vmem [shape: bf16[32,96], index: 3, kind: input, shape index: {}]   ;;  %s2299_s4 = inlined_call_operand.vmem [shape: bf16[32,32], index: 4, kind: input, shape index: {}]   ;;  %s2300_s5 = inlined_call_operand.vmem [shape: f32[1,32], index: 5, kind: input, shape index: {}]   ;;  %s2301_s6 = inlined_call_operand.vmem [shape: f32[1,32], index: 6, kind: input, shape index: {}]   ;;  %s2302_s7 = inlined_call_operand.vmem [shape: f32[1,32], index: 7, kind: input, shape index: {}]   ;;  %s2303_s8 = inlined_call_operand.vmem [shape: bf16[32,128], index: 8, kind: input, shape index: {}]   ;;  %s2304_s9 = inlined_call_operand.vmem [shape: f32[1,128], index: 9, kind: input, shape index: {}]   ;;  %s2305_s10 = inlined_call_operand.vmem [shape: bf16[128,32], index: 10, kind: input, shape index: {}]   ;;  %s2306_s11 = inlined_call_operand.vmem [shape: f32[1,32], index: 11, kind: input, shape index: {}]   ;;  %s2307_s12 = inlined_call_operand.hbm [shape: f32[2,8,32], index: 12, kind: output, shape index: {}]  }
   0x1   :  { %2308 = sst [smem:[#allocation6_spill]] %s2295_s0 }
   0x2   :  { %2309 = sst [smem:[#allocation7_spill]] %s2296_s1 }
   0x3   :  { %17 = vsyncpa [#allocation4], 0 }
   0x4   :  { %19 = vsyncpa [#allocation4 + $0x1], 0  ;;  %s1962_s21 = smov 0   ;;  %s1964_s22 = smov 0  }
   0x5   :  { %s1966_s23 = smov 0   ;;  %s1968_s24 = smov 0  }
   0x6 LB: > { %s1983_s25 = sadd.s32 4294967295, %s1885_s24   ;;  %s1615_s26 = sadd.s32 4294967294, %s1885_s24   ;;  %s1885_s24 = sphi %s1968_s24, %s2317_s24   ;;  %s1881_s23 = sphi %s1966_s23, %s2316_s23   ;;  %s1877_s22 = sphi %s1964_s22, %s2315_s22   ;;  %s1873_s21 = sphi %s1962_s21, %s2314_s21  }
   0x7   : > { %s1987_s27 = sadd.s32 1, %s1885_s24   ;;  %s289_s28 = sadd.s32 1, %s1881_s23 }
   0x8   : > { %s286_s29 = ssub.s32 %s1885_s24, %s1987_s27  ;;  %p299_p0 = scmp.ne.s32.totalorder %s1881_s23, %s1877_s22 }
   0x9   : > { %p287_p1 = scmp.eq.s32.totalorder %s286_s29, 0  ;;  %p300_p2 = scmp.eq.s32.totalorder %s1983_s25, 1 }
   0xa   : > { %p305_p3 = scmp.ne.s32.totalorder %s1877_s22, %s1873_s21  ;;  %p306_p4 = scmp.eq.s32.totalorder %s1615_s26, 1 }
   0xb   : > { %s1998_s30 = scalar_select %p287_p1, %s1881_s23, %s289_s28  }
   0xc   : > { %p2000_p5 = por %p300_p2, %p299_p0  ;;  %p2004_p6 = por %p306_p4, %p305_p3 }
   0xd   : > { %p1618_p7 = scmp.ge.s32.totalorder %s1885_s24, 1  ;;  %p364_p8 = scmp.lt.s32.totalorder %s1885_s24, 3 }
   0xf   : > { %p365_p9 = pnand %p1618_p7, %p364_p8 }
  0x10   : > { %p405_p10 = scmp.lt.s32.totalorder (!%p365_p9), %s1983_s25, 1  ;;  %s2312_s0 = sld [smem:[#allocation6_spill]] (!%p365_p9) }
  0x11   : > { %368 = sbr.rel (%p365_p9) target bundleno = 2587 (0xa1b), region = 68  ;;  %s2313_s1 = sld [smem:[#allocation7_spill]] (!%p365_p9) }
  0x12   : > { %s1890_s20 = smov (!%p365_p9), 96   ;;  %s1894_s26 = smov (!%p365_p9), 64  }
  0x13   : > { %s1895_s17 = smov (!%p365_p9), 16   ;;  %s1652_s29 = sshll.u32 (!%p365_p9), %s1983_s25, 7 }
  0x16   : > { %s406_s15 = scalar_select %p405_p10, %s1983_s25, 1  ;;  %vm413_vm0 = vcmask 261120   ;;  %v1797_v7 = vld [vmem:[%s2298_s3 + $0x8] sm:$0xff]   ;;  %v1887_v8 = vmov 0.0   ;;  %vm1888_vm1 = vmmov 0   ;;  %v1798_v9 = vld [vmem:[%s2298_s3] sm:$0xff]   ;;  %v502_v26 = vlaneseq }
  0x17   : > { %1681 = vmatprep.subr.bf16.mxu0 %v1887_v8  ;;  %1685 = vmatprep.mubr.msk.bf16.mxu0 %vm1888_vm1, %v1887_v8  ;;  %v1621_v14 = vld [vmem:[%s2313_s1] ss:$0 sm:$0xff]  ;;  %v1891_v27 = vmov 1983009808   ;;  %v1892_v32 = vmov 1934713408  }
  0x18   : > { %s1620_s16 = sshll.u32 %s406_s15, 3  ;;  %1682 = vmatpush3.bf16.msra.mxu0 %v1797_v7  ;;  %1701 = vmatprep.subr.bf16.mxu1 %v1887_v8  ;;  %v1622_v16 = vld [vmem:[%s2297_s2] ss:$0 sm:$0xff]  ;;  %v513_v28 = vunpack.c.l.s4 %v1891_v27  ;;  %v2052_v29 = vshrl.u32 %v502_v26, 7  ;;  %v521_v33 = vunpack.c.l.s4 %v1892_v32  ;;  %v1893_v37 = vmov 0  }
  0x19   : > { %s408_s19 = scalar_lea.vmem %s2312_s0, %s1620_s16  ;;  %1683 = vmatprep.subr.bf16.mxu0 %v1887_v8  ;;  %1703 = vmatprep.mubr.msk.bf16.mxu1 %vm1888_vm1, %v1887_v8  ;;  %vm927_vm2 = vcmask 130048   ;;  %vm1020_vm4 = vcmask 64512   ;;  %vm1048_vm5 = vcmask 1043456   ;;  %s2253_s0 = scalar_lea.hbm %s2307_s12, %s1652_s29 }
  0x1a   : > { %v2015_v0 = vld [vmem:[%s408_s19] sm:$0xff]  ;;  %s1889_s19 = smov 112   ;;  %v514_v30 = vunpack.c.0.s8 %v513_v28  ;;  %v522_v36 = vunpack.c.0.s8 %v521_v33 }
  0x1b   : > { %v414_v1 = vsel %vm413_vm0, %v2015_v0, 0.0 }
  0x1c   : > { %415 = vadd.xlane.f32.xlu0 %v414_v1  ;;  %1684 = vmatpush3.bf16.msra.mxu0 %v1798_v9  ;;  %v2055_v31 = vsub.s32 %v514_v30, %v2052_v29  ;;  %v2064_v41 = vsub.s32 %v522_v36, %v2052_v29 }
  0x1d   : > { %1689 = vmatprep.subr.bf16.mxu0 %v1887_v8 }
  0xa5   : > { %v416_v2 = vpop.xlane.xlu0 %415 }
  0xa6   : > { %v418_v3 = vmul.f32 0.03125, %v416_v2 }
  0xa8   : > { %v419_v4 = vsub.f32 %v2015_v0, %v418_v3 }
  0xaa   : > { %v420_v5 = vmul.f32 %v419_v4, %v419_v4 }
  0xac   : > { %v421_v6 = vsel %vm413_vm0, %v420_v5, 0.0 }
  0xad   : > { %422 = vadd.xlane.f32.xlu0 %v421_v6 }
 0x136   : > { %v423_v10 = vpop.xlane.xlu0 %422 }
 0x137   : > { %v424_v11 = vmul.f32 0.03125, %v423_v10 }
 0x139   : > { %v425_v12 = vadd.f32 1e-05, %v424_v11 }
 0x13b   : > { %1811 = vrsqrt.f32 %v425_v12 }
 0x148   : > { %v1812_v13 = vpop.eup %1811 }
 0x149   : > { %v427_v15 = vmul.f32 %v1812_v13, %v419_v4 }
 0x14b   : > { %v434_v17 = vmul.f32 %v1621_v14, %v427_v15 }
 0x14d   : > { %v441_v18 = vadd.f32 %v1622_v16, %v434_v17 }
 0x14f   : > { %v442_v19 = vpack.c.bf16 %v441_v18, %v441_v18 }
 0x151   : > { %1686 = vmatmul.mubr.msk.bf16.vlgmr.msra.gmra.mxu0 %vm413_vm0, %v442_v19 }
 0x152   : > { %1691 = vmatprep.mubr.msk.bf16.mxu0 %vm1888_vm1, %v1887_v8 }
 0x211   : > { %v496_v20 = vpop.f32.mrf.mxu0 }
 0x212   : > { %v2044_v21 = vpack.c.bf16 %v496_v20, %v496_v20 }
 0x213   : > { %v1687_v22 = vpop.f32.mrf.mxu0 }
 0x214   : > { %510 = vrot.lane.b32.xlu1 %v2044_v21, %s1889_s19  ;;  %v518_v35 = vrot.slane %v2044_v21, %v2055_v31  ;;  %s402_s19 = sand.u32 1, %s1877_s22  }
 0x215   : > { %v499_v23 = vpop.f32.mrf.mxu0  ;;  %s1543_s25 = scalar_lea.sflag [#allocation4], %s402_s19 }
 0x216   : > { %v519_v40 = vcombine.high %v518_v35, %v1893_v37  ;;  %v2074_v45 = vrot.slane %v518_v35, %v2064_v41 }
 0x217   : > { %v1688_v24 = vpop.f32.mrf.mxu0 }
 0x218   : > { %593 = vrot.lane.b32.xlu1 %v2044_v21, %s1890_s20  ;;  %v533_v46 = vrot.slane %v519_v40, %v2064_v41  ;;  %v534_v51 = vcombine.high %v2074_v45, %v1893_v37  ;;  %v565_v61 = vshrl.u32 %v2074_v45, 16 }
 0x21a   : > { %v535_v52 = vcombine.high %v533_v46, %v1893_v37  ;;  %v573_v62 = vshrl.u32 %v534_v51, 16  ;;  %v581_v63 = vshrl.u32 %v533_v46, 16 }
 0x21c   : > { %v589_v1 = vshrl.u32 %v535_v52, 16 }
 0x286   : > { %v2048_v25 = vpop.permute.xlu1 %510 }
 0x287   : > { %595 = vrot.lane.b32.xlu0 %v2048_v25, %s1890_s20  ;;  %v543_v34 = vrot.slane %v2048_v25, %v2055_v31  ;;  %s1619_s20 = sshll.u32 %s402_s19, 3 }
 0x288   : > { %s404_s15 = scalar_lea.vmem [#allocation3], %s1619_s20 }
 0x289   : > { %v544_v38 = vcombine.high %v543_v34, %v1893_v37  ;;  %v2068_v43 = vrot.slane %v543_v34, %v2064_v41  ;;  %s1556_s16 = sshll.u32 %s404_s15, 4  ;;  %s2255_s16 = int_to_ptr.vmem [resolvable:$true] %s1556_s16 }
 0x28a   : > { %v594_v39 = vpop.permute.xlu1 %593  ;;  %s1825_s20 = scalar_lea.vmem %s2255_s16, 128 }
 0x28b   : > { %v604_v42 = vrot.slane %v594_v39, %v2055_v31  ;;  %v2071_v44 = vrot.slane %v544_v38, %v2064_v41  ;;  %v559_v48 = vcombine.high %v2068_v43, %v1893_v37  ;;  %v566_v2 = vshrl.u32 %v2068_v43, 16  ;;  %p1826_p11 = scmp.ne.s32.totalorder %s2255_s16, %s1825_s20 }
 0x28d   : > { %v605_v47 = vcombine.high %v604_v42, %v1893_v37  ;;  %v560_v49 = vcombine.high %v2071_v44, %v1893_v37  ;;  %v612_v50 = vrot.slane %v604_v42, %v2064_v41  ;;  %v574_v56 = vshrl.u32 %v559_v48, 16  ;;  %p1827_p12 = pnand %p1826_p11, %p2000_p5 }
 0x28e   : > { %v582_v7 = vshrl.u32 %v2071_v44, 16  ;;  %v567_v36 = vpack.i.b16 %v566_v2, %v565_v61  ;;  %v571_v38 = vpack.i.b16 %v559_v48, %v534_v51  ;;  %v579_v39 = vpack.i.b16 %v2071_v44, %v533_v46 }
 0x28f   : > { %v619_v54 = vrot.slane %v605_v47, %v2064_v41  ;;  %v590_v57 = vshrl.u32 %v560_v49, 16  ;;  %v620_v58 = vcombine.high %v612_v50, %v1893_v37  ;;  %v575_v6 = vpack.i.b16 %v574_v56, %v573_v62  ;;  %p1828_p13 = pneg %p1827_p12 }
 0x290   : > { %v651_v11 = vshrl.u32 %v612_v50, 16  ;;  %v587_v24 = vpack.i.b16 %v560_v49, %v535_v52  ;;  %v583_v32 = vpack.i.b16 %v582_v7, %v581_v63  ;;  %v563_v49 = vpack.i.b16 %v2068_v43, %v2074_v45 }
 0x291   : > { %v621_v3 = vcombine.high %v619_v54, %v1893_v37  ;;  %v591_v9 = vpack.i.b16 %v590_v57, %v589_v1  ;;  %v659_v12 = vshrl.u32 %v620_v58, 16  ;;  %v667_v15 = vshrl.u32 %v619_v54, 16 }
 0x292   : > { %v773_v52 = vcombine.low %v571_v38, %v587_v24  ;;  %v765_v48 = vcombine.low %v563_v49, %v579_v39 }
 0x293   : > { %v675_v19 = vshrl.u32 %v621_v3, 16  ;;  %v797_v42 = vcombine.low %v575_v6, %v591_v9 }
 0x294   : > { %v780_v46 = vrot.slane %v773_v52, %v2055_v31  ;;  %v772_v43 = vrot.slane %v765_v48, %v2055_v31 }
 0x295   : > { %v804_v44 = vrot.slane %v797_v42, %v2055_v31 }
 0x296   : > { %v781_v63 = vcombine.low %v772_v43, %v780_v46 }
 0x2f9   : > { %v596_v53 = vpop.permute.xlu0 %595 }
 0x2fa   : > { %v629_v55 = vrot.slane %v596_v53, %v2055_v31 }
 0x2fc   : > { %v630_v59 = vcombine.high %v629_v55, %v1893_v37  ;;  %v637_v60 = vrot.slane %v629_v55, %v2064_v41 }
 0x2fe   : > { %v644_v4 = vrot.slane %v630_v59, %v2064_v41  ;;  %v645_v5 = vcombine.high %v637_v60, %v1893_v37  ;;  %v652_v10 = vshrl.u32 %v637_v60, 16  ;;  %v649_v16 = vpack.i.b16 %v637_v60, %v612_v50 }
 0x300   : > { %v646_v13 = vcombine.high %v644_v4, %v1893_v37  ;;  %v660_v14 = vshrl.u32 %v645_v5, 16  ;;  %v665_v17 = vpack.i.b16 %v644_v4, %v619_v54  ;;  %v668_v18 = vshrl.u32 %v644_v4, 16 }
 0x301   : > { %v657_v20 = vpack.i.b16 %v645_v5, %v620_v58  ;;  %v653_v27 = vpack.i.b16 %v652_v10, %v651_v11  ;;  %v789_v54 = vcombine.low %v567_v36, %v583_v32  ;;  %v788_v4 = vrot.slane %v781_v63, %v2064_v41 }
 0x302   : > { %v673_v22 = vpack.i.b16 %v646_v13, %v621_v3  ;;  %v676_v23 = vshrl.u32 %v646_v13, 16  ;;  %v669_v28 = vpack.i.b16 %v668_v18, %v667_v15  ;;  %v819_v30 = vcombine.low %v649_v16, %v665_v17 }
 0x303   : > { %v661_v33 = vpack.i.b16 %v660_v14, %v659_v12  ;;  %v796_v58 = vrot.slane %v789_v54, %v2055_v31  ;;  %v816_v10 = vshrl.u32 %v788_v4, 16  ;;  %v505_v12 = vand.u32 127, %v502_v26 }
 0x304   : > { %v677_v34 = vpack.i.b16 %v676_v23, %v675_v19  ;;  %v827_v35 = vcombine.low %v657_v20, %v673_v22  ;;  %v843_v40 = vcombine.low %v653_v27, %v669_v28  ;;  %v826_v47 = vrot.slane %v819_v30, %v2055_v31 }
 0x305   : > { %v805_v61 = vcombine.low %v796_v58, %v804_v44  ;;  %vm506_vm3 = vcmp.gt.s32.totalorder %v505_v12, %v2052_v29 }
 0x306   : > { %v851_v50 = vcombine.low %v661_v33, %v677_v34  ;;  %v834_v53 = vrot.slane %v827_v35, %v2055_v31  ;;  %v850_v56 = vrot.slane %v843_v40, %v2055_v31  ;;  %v507_v13 = vsel %vm506_vm3, -1e+30, %v1887_v8 }
 0x307   : > { %v812_v2 = vrot.slane %v805_v61, %v2064_v41 }
 0x308   : > { %v835_v55 = vcombine.low %v826_v47, %v834_v53  ;;  %v858_v57 = vrot.slane %v851_v50, %v2055_v31 }
 0x309   : > { %v815_v6 = vpack.i.b16 %v812_v2, %v788_v4  ;;  %v817_v9 = vshrl.u32 %v812_v2, 16 }
 0x30a   : > { %v859_v51 = vcombine.low %v850_v56, %v858_v57  ;;  %v842_v59 = vrot.slane %v835_v55, %v2064_v41 }
 0x30b   : > { %v818_v11 = vpack.i.b16 %v817_v9, %v816_v10 }
 0x30c   : > { %v866_v60 = vrot.slane %v859_v51, %v2064_v41  ;;  %v870_v3 = vshrl.u32 %v842_v59, 16 }
 0x30e   : > { %v869_v45 = vpack.i.b16 %v866_v60, %v842_v59  ;;  %v871_v1 = vshrl.u32 %v866_v60, 16 }
 0x310   : > { %v932_v62 = vsel %vm927_vm2, %v869_v45, 0  ;;  %v872_v5 = vpack.i.b16 %v871_v1, %v870_v3 }
 0x311   : > { %1690 = vmatpush3.bf16.xpose.msra.mxu0 %v932_v62 }
 0x312   : > { %1695 = vmatprep.subr.bf16.mxu0 %v1887_v8  ;;  %v978_v7 = vsel %vm927_vm2, %v872_v5, 0 }
 0x318   : > { %1692 = vmatmul.mubr.msk.bf16.vlgmr.msra.gmra.mxu0 %vm927_vm2, %v815_v6 }
 0x319   : > { %1696 = vmatpush3.bf16.xpose.msra.mxu0 %v978_v7  ;;  %1697 = vmatprep.mubr.msk.bf16.mxu0 %vm1888_vm1, %v1887_v8 }
 0x31a   : > { %1707 = vmatprep.subr.bf16.mxu0 %v1887_v8 }
 0x320   : > { %1698 = vmatmul.mubr.msk.bf16.vlgmr.msra.gmra.mxu0 %vm927_vm2, %v818_v11 }
 0x321   : > { %1709 = vmatprep.mubr.msk.bf16.mxu0 %vm1888_vm1, %v1887_v8 }
 0x3d8   : > { %v968_v14 = vpop.f32.mrf.mxu0 }
 0x3d9   : > { %v969_v15 = vadd.f32 %v968_v14, %v507_v13 }
 0x3da   : > { %v1693_v16 = vpop.f32.mrf.mxu0 }
 0x3db   : > { %v1021_v17 = vsel %vm1020_vm4, %v969_v15, -inf }
 0x3dc   : > { %1022 = vmax.xlane.f32.xlu1 %v1021_v17  ;;  %v971_v18 = vpop.f32.mrf.mxu0 }
 0x3de   : > { %v1694_v19 = vpop.f32.mrf.mxu0 }
 0x3e0   : > { %v1014_v20 = vpop.f32.mrf.mxu0 }
 0x3e1   : > { %v1015_v22 = vadd.f32 %v1014_v20, %v507_v13 }
 0x3e2   : > { %v1699_v23 = vpop.f32.mrf.mxu0 }
 0x3e3   : > { %v1024_v24 = vsel %vm1020_vm4, %v1015_v22, -inf }
 0x3e4   : > { %1025 = vmax.xlane.f32.xlu0 %v1024_v24  ;;  %v1017_v26 = vpop.f32.mrf.mxu0 }
 0x3e6   : > { %v1700_v27 = vpop.f32.mrf.mxu0 }
 0x3fa   : > { %681 = vrot.lane.b32.xlu0 %v2048_v25, %s1894_s26 }
 0x465   : > { %v1023_v29 = vpop.xlane.xlu1 %1022 }
 0x466   : > { %v1027_v28 = vsub.f32 %v969_v15, %v1023_v29 }
 0x468   : > { %v1029_v30 = vmul.f32 1.442695, %v1027_v28 }
 0x46a   : > { %1813 = vpow2.f32 %v1029_v30 }
 0x46d   : > { %v1026_v32 = vpop.xlane.xlu0 %1025 }
 0x46e   : > { %v1028_v33 = vsub.f32 %v1015_v22, %v1026_v32 }
 0x470   : > { %v1031_v34 = vmul.f32 1.442695, %v1028_v33 }
 0x471   : > { %v682_v40 = vpop.permute.xlu0 %681 }
 0x472   : > { %1815 = vpow2.f32 %v1031_v34  ;;  %v715_v42 = vrot.slane %v682_v40, %v2055_v31 }
 0x474   : > { %v716_v50 = vcombine.high %v715_v42, %v1893_v37  ;;  %v723_v53 = vrot.slane %v715_v42, %v2064_v41 }
 0x476   : > { %v730_v52 = vrot.slane %v716_v50, %v2064_v41  ;;  %v731_v55 = vcombine.high %v723_v53, %v1893_v37  ;;  %v738_v44 = vshrl.u32 %v723_v53, 16 }
 0x477   : > { %v1814_v35 = vpop.eup %1813 }
 0x478   : > { %v1033_v36 = vsel %vm1020_vm4, %v1814_v35, 0.0  ;;  %v732_v57 = vcombine.high %v730_v52, %v1893_v37  ;;  %v746_v58 = vshrl.u32 %v731_v55, 16  ;;  %v754_v43 = vshrl.u32 %v730_v52, 16 }
 0x479   : > { %1034 = vadd.xlane.f32.xlu1 %v1033_v36 }
 0x47a   : > { %v762_v63 = vshrl.u32 %v732_v57, 16 }
 0x47f   : > { %v1816_v38 = vpop.eup %1815 }
 0x480   : > { %v1036_v39 = vsel %vm1020_vm4, %v1816_v38, 0.0 }
 0x481   : > { %1037 = vadd.xlane.f32.xlu1 %v1036_v39 }
 0x492   : > { %679 = vrot.lane.b32.xlu1 %v2044_v21, %s1894_s26  ;;  %s1896_s26 = smov [#allocation3]  }
 0x493   : > { %s1829_s28 = sshll.u32 %s1896_s26, 4  ;;  %s1830_s28 = int_to_ptr.vmem [resolvable:$false] %s1829_s28 }
 0x494   : > { %s1831_s29 = scalar_lea.vmem %s1830_s28, 256  ;;  %p1832_p0 = scmp.lt.s32.totalorder %s2255_s16, %s1830_s28 }
 0x495   : > { %p1833_p1 = scmp.lt.s32.totalorder %s1831_s29, %s1825_s20 }
 0x497   : > { %p1834_p2 = por %p1833_p1, %p1832_p0 }
 0x499   : > { %p1835_p3 = pnand %p1834_p2, %p1828_p13 }
 0x502   : > { %v1035_v25 = vpop.xlane.xlu1 %1034 }
 0x503   : > { %1817 = vrcp.f32 %v1035_v25 }
 0x50a   : > { %v1038_v47 = vpop.xlane.xlu1 %1037 }
 0x50b   : > { %1819 = vrcp.f32 %v1038_v47 }
 0x50e   : > { %v680_v49 = vpop.permute.xlu1 %679 }
 0x50f   : > { %v690_v54 = vrot.slane %v680_v49, %v2055_v31 }
 0x510   : > { %v1818_v19 = vpop.eup %1817 }
 0x511   : > { %v691_v56 = vcombine.high %v690_v54, %v1893_v37  ;;  %v698_v21 = vrot.slane %v690_v54, %v2064_v41  ;;  %v1041_v27 = vmul.f32 %v1818_v19, %v1814_v35  ;;  %v1799_v35 = vld [vmem:[%s2299_s4 + $0x8] sm:$0xff]  }
 0x513   : > { %v705_v48 = vrot.slane %v691_v56, %v2064_v41  ;;  %v706_v51 = vcombine.high %v698_v21, %v1893_v37  ;;  %v737_v46 = vshrl.u32 %v698_v21, 16  ;;  %v735_v45 = vpack.i.b16 %v723_v53, %v698_v21 }
 0x514   : > { %v1043_v33 = vpack.c.bf16 %v1041_v27, %v1041_v27  ;;  %v1803_v27 = vld [vmem:[%s2305_s10 + $0x38] sm:$0xff]  }
 0x515   : > { %v707_v59 = vcombine.high %v705_v48, %v1893_v37  ;;  %v745_v60 = vshrl.u32 %v706_v51, 16  ;;  %v751_v61 = vpack.i.b16 %v730_v52, %v705_v48  ;;  %v753_v62 = vshrl.u32 %v705_v48, 16 }
 0x516   : > { %v743_v1 = vpack.i.b16 %v731_v55, %v706_v51  ;;  %v739_v4 = vpack.i.b16 %v738_v44, %v737_v46 }
 0x517   : > { %v759_v2 = vpack.i.b16 %v732_v57, %v707_v59  ;;  %v761_v3 = vshrl.u32 %v707_v59, 16  ;;  %v755_v5 = vpack.i.b16 %v754_v43, %v753_v62  ;;  %v873_v6 = vcombine.low %v735_v45, %v751_v61 }
 0x518   : > { %v747_v7 = vpack.i.b16 %v746_v58, %v745_v60  ;;  %v1820_v22 = vpop.eup %1819  ;;  %v1800_v58 = vld [vmem:[%s2299_s4] sm:$0xff]  }
 0x519   : > { %v763_v9 = vpack.i.b16 %v762_v63, %v761_v3  ;;  %v881_v10 = vcombine.low %v743_v1, %v759_v2  ;;  %v897_v11 = vcombine.low %v739_v4, %v755_v5  ;;  %v880_v12 = vrot.slane %v873_v6, %v2055_v31 }
 0x51a   : > { %v1042_v30 = vmul.f32 %v1820_v22, %v1816_v38 }
 0x51b   : > { %v888_v37 = vrot.slane %v881_v10, %v2055_v31  ;;  %v905_v13 = vcombine.low %v747_v7, %v763_v9  ;;  %v904_v15 = vrot.slane %v897_v11, %v2055_v31 }
 0x51c   : > { %v1044_v34 = vpack.c.bf16 %v1042_v30, %v1042_v30 }
 0x51d   : > { %v889_v14 = vcombine.low %v880_v12, %v888_v37  ;;  %v912_v16 = vrot.slane %v905_v13, %v2055_v31 }
 0x51f   : > { %v896_v17 = vrot.slane %v889_v14, %v2064_v41  ;;  %v913_v18 = vcombine.low %v904_v15, %v912_v16 }
 0x521   : > { %v920_v20 = vrot.slane %v913_v18, %v2064_v41  ;;  %v924_v24 = vshrl.u32 %v896_v17, 16 }
 0x523   : > { %v923_v23 = vpack.i.b16 %v920_v20, %v896_v17  ;;  %v925_v26 = vshrl.u32 %v920_v20, 16 }
 0x525   : > { %v926_v29 = vpack.i.b16 %v925_v26, %v924_v24  ;;  %v1050_v28 = vsel %vm1048_vm5, %v923_v23, 0  ;;  %v1801_v26 = vld [vmem:[%s2303_s8 + $0x8] sm:$0xff]  }
 0x526   : > { %1702 = vmatpush3.bf16.msra.mxu1 %v1050_v28 }
 0x527   : > { %v1096_v32 = vsel %vm1048_vm5, %v926_v29, 0  ;;  %1713 = vmatprep.subr.bf16.mxu1 %v1887_v8  ;;  %v1804_v29 = vld [vmem:[%s2305_s10 + $0x30] sm:$0xff]  }
 0x528   : > { %1708 = vmatpush3.bf16.msra.mxu0 %v1096_v32 }
 0x529   : > { %1704 = vmatmul.mubr.msk.bf16.vlgmr.msra.gmra.mxu1 %vm1020_vm4, %v1043_v33  ;;  %1721 = vmatprep.subr.bf16.mxu0 %v1887_v8 }
 0x52a   : > { %1717 = vmatprep.mubr.msk.bf16.mxu1 %vm1888_vm1, %v1887_v8  ;;  %1714 = vmatpush3.bf16.msra.mxu1 %v1799_v35 }
 0x52b   : > { %1710 = vmatmul.mubr.msk.bf16.vlgmr.msra.gmra.mxu0 %vm1020_vm4, %v1044_v34  ;;  %1715 = vmatprep.subr.bf16.mxu1 %v1887_v8  ;;  %v1636_v34 = vld [vmem:[%s2301_s6] ss:$0 sm:$0xff] }
 0x52c   : > { %1725 = vmatprep.mubr.msk.bf16.mxu0 %vm1888_vm1, %v1887_v8  ;;  %1722 = vmatpush3.bf16.msra.mxu0 %v1801_v26 }
 0x52d   : > { %1723 = vmatprep.subr.bf16.mxu0 %v1887_v8 }
 0x52e   : > { %1716 = vmatpush3.bf16.msra.mxu1 %v1800_v58 }
 0x52f   : > { %1729 = vmatprep.subr.bf16.mxu1 %v1887_v8 }
 0x5e9   : > { %v1086_v36 = vpop.f32.mrf.mxu1 }
 0x5ea   : > { %v1138_v38 = vcombine.high %v1086_v36, %v1887_v8  ;;  %v1145_v25 = vrot.slane %v1086_v36, %v2055_v31  ;;  %v1637_v36 = vld [vmem:[%s2302_s7] ss:$0 sm:$0xff] }
 0x5eb   : > { %v1705_v39 = vpop.f32.mrf.mxu1  ;;  %v1132_v40 = vpop.f32.mrf.mxu0 }
 0x5ec   : > { %v1153_v42 = vcombine.high %v1132_v40, %v1887_v8  ;;  %v1160_v47 = vrot.slane %v1132_v40, %v2055_v31  ;;  %v1152_v49 = vrot.slane %v1138_v38, %v2055_v31 }
 0x5ed   : > { %v1089_v50 = vpop.f32.mrf.mxu1  ;;  %v1711_v53 = vpop.f32.mrf.mxu0 }
 0x5ee   : > { %v1167_v52 = vrot.slane %v1153_v42, %v2055_v31  ;;  %v1168_v54 = vcombine.low %v1145_v25, %v1160_v47  ;;  %v1169_v55 = vcombine.high %v1145_v25, %v1160_v47  ;;  %v1805_v25 = vld [vmem:[%s2305_s10 + $0x28] sm:$0xff]   ;;  %v1806_v42 = vld [vmem:[%s2305_s10 + $0x20] sm:$0xff]   ;;  %v1807_v47 = vld [vmem:[%s2305_s10 + $0x18] sm:$0xff]  }
 0x5ef   : > { %v1706_v56 = vpop.f32.mrf.mxu1  ;;  %v1135_v21 = vpop.f32.mrf.mxu0  ;;  %v1808_v50 = vld [vmem:[%s2305_s10 + $0x10] sm:$0xff]   ;;  %v1809_v53 = vld [vmem:[%s2305_s10 + $0x8] sm:$0xff]  }
 0x5f0   : > { %v1176_v57 = vrot.slane %v1168_v54, %v2064_v41  ;;  %v1183_v48 = vrot.slane %v1169_v55, %v2064_v41  ;;  %v1184_v51 = vcombine.low %v1152_v49, %v1167_v52  ;;  %v1185_v44 = vcombine.high %v1152_v49, %v1167_v52  ;;  %v1810_v49 = vld [vmem:[%s2305_s10] sm:$0xff]  }
 0x5f1   : > { %v1712_v46 = vpop.f32.mrf.mxu0  ;;  %v1638_v52 = vld [vmem:[%s2304_s9] ss:$0 sm:$0xff] }
 0x5f2   : > { %v1192_v59 = vrot.slane %v1184_v51, %v2064_v41  ;;  %v1199_v60 = vrot.slane %v1185_v44, %v2064_v41  ;;  %v1204_v43 = vcombine.low %v1176_v57, %v1183_v48  ;;  %v1630_v45 = vcombine.high %v1176_v57, %v1183_v48 }
 0x5f4   : > { %v1211_v61 = vrot.slane %v1204_v43, %v2055_v31  ;;  %v1219_v62 = vrot.slane %v1630_v45, %v2055_v31  ;;  %v1220_v63 = vcombine.low %v1192_v59, %v1199_v60  ;;  %v1631_v1 = vcombine.high %v1192_v59, %v1199_v60  ;;  %v1642_v59 = vld [vmem:[%s2306_s11] ss:$0 sm:$0xff] }
 0x5f6   : > { %v1227_v2 = vrot.slane %v1220_v63, %v2055_v31  ;;  %v1235_v3 = vrot.slane %v1631_v1, %v2055_v31  ;;  %v1236_v4 = vcombine.low %v1211_v61, %v1219_v62  ;;  %v1632_v31 = vld [vmem:[%s2300_s5] ss:$0 sm:$0xff] }
 0x5f8   : > { %v1244_v5 = vcombine.low %v1227_v2, %v1235_v3  ;;  %v1243_v6 = vrot.slane %v1236_v4, %v2064_v41 }
 0x5fa   : > { %v1251_v7 = vrot.slane %v1244_v5, %v2064_v41 }
 0x5fc   : > { %v1253_v9 = vcombine.high %v1243_v6, %v1251_v7  ;;  %v1252_v10 = vcombine.low %v1243_v6, %v1251_v7 }
 0x5fe   : > { %1255 = vrot.lane.b32.xlu1 %v1253_v9, %s1895_s17 }
 0x670   : > { %v1256_v11 = vpop.permute.xlu1 %1255 }
 0x671   : > { %v1258_v12 = vsel %vm927_vm2, %v1252_v10, %v1256_v11 }
 0x672   : > { %v1259_v37 = vpack.c.bf16 %v1258_v12, %v1258_v12 }
 0x674   : > { %1718 = vmatmul.mubr.msk.bf16.vlgmr.msra.gmra.mxu1 %vm413_vm0, %v1259_v37 }
 0x675   : > { %1745 = vmatprep.mubr.msk.bf16.mxu1 %vm1888_vm1, %v1887_v8  ;;  %1730 = vmatpush3.bf16.msra.mxu1 %v1803_v27 }
 0x676   : > { %1731 = vmatprep.subr.bf16.mxu1 %v1887_v8 }
 0x679   : > { %1732 = vmatpush3.bf16.msra.mxu1 %v1804_v29 }
 0x67a   : > { %1733 = vmatprep.subr.bf16.mxu1 %v1887_v8 }
 0x67d   : > { %1734 = vmatpush3.bf16.msra.mxu1 %v1805_v25 }
 0x67e   : > { %1735 = vmatprep.subr.bf16.mxu1 %v1887_v8 }
 0x681   : > { %1736 = vmatpush3.bf16.msra.mxu1 %v1806_v42 }
 0x682   : > { %1737 = vmatprep.subr.bf16.mxu1 %v1887_v8 }
 0x685   : > { %1738 = vmatpush3.bf16.msra.mxu1 %v1807_v47 }
 0x686   : > { %1739 = vmatprep.subr.bf16.mxu1 %v1887_v8 }
 0x689   : > { %1740 = vmatpush3.bf16.msra.mxu1 %v1808_v50 }
 0x68a   : > { %1741 = vmatprep.subr.bf16.mxu1 %v1887_v8 }
 0x68d   : > { %1742 = vmatpush3.bf16.msra.mxu1 %v1809_v53 }
 0x68e   : > { %1743 = vmatprep.subr.bf16.mxu1 %v1887_v8 }
 0x691   : > { %1744 = vmatpush3.bf16.msra.mxu1 %v1810_v49 }
 0x734   : > { %v1320_v13 = vpop.f32.mrf.mxu1 }
 0x735   : > { %v1321_v14 = vadd.f32 %v1632_v31, %v1320_v13 }
 0x736   : > { %v1719_v41 = vpop.f32.mrf.mxu1 }
 0x737   : > { %v2190_v15 = vadd.f32 %v1321_v14, %v2015_v0  ;;  %v1802_v0 = vld [vmem:[%s2303_s8] sm:$0xff]  }
 0x738   : > { %v1323_v16 = vpop.f32.mrf.mxu1  ;;  %1724 = vmatpush3.bf16.msra.mxu0 %v1802_v0 }
 0x739   : > { %v1329_v17 = vsel %vm413_vm0, %v2190_v15, 0.0 }
 0x73a   : > { %1330 = vadd.xlane.f32.xlu1 %v1329_v17  ;;  %v1720_v18 = vpop.f32.mrf.mxu1 }
 0x7c3   : > { %v1331_v19 = vpop.xlane.xlu1 %1330 }
 0x7c4   : > { %v1332_v20 = vmul.f32 0.03125, %v1331_v19 }
 0x7c6   : > { %v1333_v22 = vsub.f32 %v2190_v15, %v1332_v20 }
 0x7c8   : > { %v1334_v23 = vmul.f32 %v1333_v22, %v1333_v22 }
 0x7ca   : > { %v1335_v24 = vsel %vm413_vm0, %v1334_v23, 0.0 }
 0x7cb   : > { %1336 = vadd.xlane.f32.xlu0 %v1335_v24 }
 0x854   : > { %v1337_v28 = vpop.xlane.xlu0 %1336 }
 0x855   : > { %v1338_v30 = vmul.f32 0.03125, %v1337_v28 }
 0x857   : > { %v1339_v32 = vadd.f32 1e-05, %v1338_v30 }
 0x859   : > { %1821 = vrsqrt.f32 %v1339_v32 }
 0x866   : > { %v1822_v33 = vpop.eup %1821 }
 0x867   : > { %v1341_v35 = vmul.f32 %v1822_v33, %v1333_v22 }
 0x869   : > { %v1348_v38 = vmul.f32 %v1636_v34, %v1341_v35 }
 0x86b   : > { %v1355_v39 = vadd.f32 %v1637_v36, %v1348_v38 }
 0x86d   : > { %v1356_v40 = vpack.c.bf16 %v1355_v39, %v1355_v39 }
 0x86f   : > { %1726 = vmatmul.mubr.msk.bf16.vlgmr.msra.gmra.mxu0 %vm413_vm0, %v1356_v40 }
 0x92f   : > { %v1417_v54 = vpop.f32.mrf.mxu0 }
 0x930   : > { %v1418_v55 = vadd.f32 %v1638_v52, %v1417_v54 }
 0x931   : > { %v1727_v56 = vpop.f32.mrf.mxu0 }
 0x932   : > { %v1424_v21 = vmul.f32 0.70710677, %v1418_v55  ;;  %v1423_v8 = vmul.f32 0.5, %v1418_v55 }
 0x933   : > { %v1420_v57 = vpop.f32.mrf.mxu0 }
 0x934   : > { %1823 = verf.f32 %v1424_v21 }
 0x935   : > { %v1728_v48 = vpop.f32.mrf.mxu0 }
 0x941   : > { %v1824_v51 = vpop.eup %1823 }
 0x942   : > { %v1426_v44 = vadd.f32 1.0, %v1824_v51 }
 0x944   : > { %v1427_v46 = vmul.f32 %v1426_v44, %v1423_v8 }
 0x946   : > { %v1428_v58 = vpack.c.bf16 %v1427_v46, %v1427_v46 }
 0x948   : > { %1746 = vmatmul.mubr.bf16.vlgmr.msra.gmra.mxu1 %v1428_v58 }
 0xa08   : > { %v1534_v60 = vpop.f32.mrf.mxu1 }
 0xa09   : > { %v1535_v43 = vadd.f32 %v1642_v59, %v1534_v60 }
 0xa0a   : > { %v1747_v45 = vpop.f32.mrf.mxu1 }
 0xa0b   : > { %v1540_v61 = vadd.f32 %v1535_v43, %v2190_v15 }
 0xa0c   : > { %v1537_v62 = vpop.f32.mrf.mxu1 }
 0xa0d   : > { %1541 = vst.msk [vmem:[%s404_s15] sm:$0xff] %vm413_vm0, %v1540_v61 }
 0xa0e   : > { %v1748_v63 = vpop.f32.mrf.mxu1 }
 0xa0f   : > { %1838 = shalt.err (!%p1835_p3)
}
 0xa10   : > { %s1839_s15 = scalar_lea.hbm %s2253_s0, 128  ;;  %s1843_s18 = scalar_lea.hbm %s2307_s12, 256 }
 0xa11   : > { %p1840_p4 = scmp.ne.s32.totalorder %s2253_s0, %s1839_s15  ;;  %p1844_p9 = scmp.lt.s32.totalorder %s2253_s0, %s2307_s12 }
 0xa12   : > { %p1845_p10 = scmp.lt.s32.totalorder %s1843_s18, %s1839_s15 }
 0xa13   : > { %p1841_p7 = pnand %p1840_p4, %p2000_p5 }
 0xa14   : > { %p1846_p11 = por %p1845_p10, %p1844_p9 }
 0xa15   : > { %p1842_p8 = pneg %p1841_p7 }
 0xa17   : > { %p1847_p12 = pnand %p1846_p11, %p1842_p8 }
 0xa19   : > { %1850 = shalt.err (!%p1847_p12)
}
 0xa1a   : > { %1749 = dma.vmem_to_hbm [thread:$0]  (%p2000_p5), %s2255_s16, 128, %s2253_s0, %s1543_s25  }
 0xa1b PF: > { %p1755_p13 = scmp.ge.s32.totalorder %s1885_s24, 2  ;;  %s1568_s20 = sand.u32 1, %s1873_s21  }
 0xa1c   : > { %s1569_s1 = scalar_lea.sflag [#allocation4], %s1568_s20 }
 0xa1d   : > { %p1752_p0 = pnand %p1755_p13, %p2004_p6 }
 0xa1f   : > { %p1753_p1 = pneg %p1752_p0 }
 0xa21   : > { %1868 = dma.done.wait (%p1753_p1), %s1569_s1, 128  }
 0xa22   : > { %1870 = vsyncadd (%p1753_p1), %s1569_s1, 4294967168  ;;  %p22_p2 = scmp.ge.s32.totalorder %s1987_s27, 4   ;;  %s2314_s21 = smov %s1877_s22 }
 0xa23   : > { %s2315_s22 = smov %s1881_s23  ;;  %s2316_s23 = smov %s1998_s30 }
 0xa24   : > { %s2317_s24 = smov %s1987_s27  ;;  %24 = sbr.rel (!%p22_p2) target bundleno = 6 (0x6), region = 103 }
 0xa29   :  { %1574 = vsyncpa [#allocation4], 1 }
 0xa2a   :  { %1576 = vsyncpa [#allocation4 + $0x1], 1 }

// kernel: tpu_custom_call.1
= control target key start
LH: loop header
LB: loop body
LE: loop exit
PB: predicated region body
PF: predicated region fallthrough
CT: control target
= control target key end

     0   :  { %s1664_s0 = inlined_call_operand.vmem [shape: f32[2,8,32], index: 0, kind: input, shape index: {}]   ;;  %s1665_s1 = inlined_call_operand.vmem [shape: f32[1,32], index: 1, kind: input, shape index: {}]   ;;  %s1666_s2 = inlined_call_operand.vmem [shape: f32[1,32], index: 2, kind: input, shape index: {}]   ;;  %s1667_s3 = inlined_call_operand.vmem [shape: bf16[32,96], index: 3, kind: input, shape index: {}]   ;;  %s1668_s4 = inlined_call_operand.vmem [shape: bf16[32,32], index: 4, kind: input, shape index: {}]   ;;  %s1669_s5 = inlined_call_operand.vmem [shape: f32[1,32], index: 5, kind: input, shape index: {}]   ;;  %s1670_s6 = inlined_call_operand.vmem [shape: f32[1,32], index: 6, kind: input, shape index: {}]   ;;  %s1671_s7 = inlined_call_operand.vmem [shape: f32[1,32], index: 7, kind: input, shape index: {}]   ;;  %s1672_s8 = inlined_call_operand.vmem [shape: bf16[32,128], index: 8, kind: input, shape index: {}]   ;;  %s1673_s9 = inlined_call_operand.vmem [shape: f32[1,128], index: 9, kind: input, shape index: {}]   ;;  %s1674_s10 = inlined_call_operand.vmem [shape: bf16[128,32], index: 10, kind: input, shape index: {}]   ;;  %s1675_s11 = inlined_call_operand.vmem [shape: f32[1,32], index: 11, kind: input, shape index: {}]   ;;  %s1676_s12 = inlined_call_operand.hbm [shape: f32[2,8,32], index: 12, kind: output, shape index: {}]  }
   0x1   :  { %1677 = sst [smem:[#allocation6_spill]] %s1664_s0 }
   0x2   :  { %1678 = sst [smem:[#allocation7_spill]] %s1665_s1 }
   0x3   :  { %17 = vsyncpa [#allocation4], 0 }
   0x4   :  { %19 = vsyncpa [#allocation4 + $0x1], 0  ;;  %s1438_s21 = smov 0   ;;  %s1440_s22 = smov 0  }
   0x5   :  { %s1442_s23 = smov 0   ;;  %s1444_s24 = smov 0  }
   0x6 LB: > { %s1459_s25 = sadd.s32 4294967295, %s1362_s24   ;;  %s1095_s26 = sadd.s32 4294967294, %s1362_s24   ;;  %s1362_s24 = sphi %s1444_s24, %s1686_s24   ;;  %s1358_s23 = sphi %s1442_s23, %s1685_s23   ;;  %s1354_s22 = sphi %s1440_s22, %s1684_s22   ;;  %s1350_s21 = sphi %s1438_s21, %s1683_s21  }
   0x7   : > { %s1463_s27 = sadd.s32 1, %s1362_s24   ;;  %s289_s28 = sadd.s32 1, %s1358_s23 }
   0x8   : > { %s286_s29 = ssub.s32 %s1362_s24, %s1463_s27  ;;  %p299_p0 = scmp.ne.s32.totalorder %s1358_s23, %s1354_s22 }
   0x9   : > { %p287_p1 = scmp.eq.s32.totalorder %s286_s29, 0  ;;  %p300_p2 = scmp.eq.s32.totalorder %s1459_s25, 1 }
   0xa   : > { %p305_p3 = scmp.ne.s32.totalorder %s1354_s22, %s1350_s21  ;;  %p306_p4 = scmp.eq.s32.totalorder %s1095_s26, 1 }
   0xb   : > { %s1474_s30 = scalar_select %p287_p1, %s1358_s23, %s289_s28  }
   0xc   : > { %p1476_p5 = por %p300_p2, %p299_p0  ;;  %p1480_p6 = por %p306_p4, %p305_p3 }
   0xd   : > { %p1098_p7 = scmp.ge.s32.totalorder %s1362_s24, 1  ;;  %p364_p8 = scmp.lt.s32.totalorder %s1362_s24, 3 }
   0xf   : > { %p365_p9 = pnand %p1098_p7, %p364_p8 }
  0x10   : > { %p405_p10 = scmp.lt.s32.totalorder (!%p365_p9), %s1459_s25, 1  ;;  %s1681_s0 = sld [smem:[#allocation6_spill]] (!%p365_p9) }
  0x11   : > { %368 = sbr.rel (%p365_p9) target bundleno = 2425 (0x979), region = 68  ;;  %s1682_s1 = sld [smem:[#allocation7_spill]] (!%p365_p9) }
  0x12   : > { %s1367_s20 = smov (!%p365_p9), 96   ;;  %s1368_s26 = smov (!%p365_p9), 80  }
  0x13   : > { %s1369_s28 = smov (!%p365_p9), 48   ;;  %s1370_s29 = smov (!%p365_p9), 64  }
  0x16   : > { %s406_s15 = scalar_select %p405_p10, %s1459_s25, 1  ;;  %vm413_vm0 = vcmask 261120   ;;  %v1274_v7 = vld [vmem:[%s1667_s3 + $0x8] sm:$0xff]   ;;  %v1364_v8 = vmov 0.0   ;;  %vm1365_vm1 = vmmov 0   ;;  %v1275_v9 = vld [vmem:[%s1667_s3] sm:$0xff]   ;;  %v502_v30 = vlaneseq }
  0x17   : > { %1159 = vmatprep.subr.bf16.mxu0 %v1364_v8  ;;  %1163 = vmatprep.mubr.msk.bf16.mxu0 %vm1365_vm1, %v1364_v8  ;;  %v1101_v14 = vld [vmem:[%s1682_s1] ss:$0 sm:$0xff]  ;;  %vm512_vm2 = vcmask 130048   ;;  %vm559_vm4 = vcmask 64512   ;;  %vm577_vm5 = vcmask 1043456   ;;  %vm736_vm6 = vcmask 261248  }
  0x18   : > { %s1100_s16 = sshll.u32 %s406_s15, 3  ;;  %1160 = vmatpush3.bf16.msra.mxu0 %v1274_v7  ;;  %1179 = vmatprep.subr.bf16.mxu1 %v1364_v8  ;;  %v1102_v16 = vld [vmem:[%s1666_s2] ss:$0 sm:$0xff]  ;;  %v503_v31 = vshrl.u32 %v502_v30, 7  ;;  %v505_v32 = vand.u32 127, %v502_v30 }
  0x19   : > { %s408_s19 = scalar_lea.vmem %s1681_s0, %s1100_s16  ;;  %1161 = vmatprep.subr.bf16.mxu0 %v1364_v8  ;;  %1181 = vmatprep.mubr.msk.bf16.mxu1 %vm1365_vm1, %v1364_v8  ;;  %s1130_s16 = sshll.u32 %s1459_s25, 7 }
  0x1a   : > { %v1491_v0 = vld [vmem:[%s408_s19] sm:$0xff]  ;;  %s1366_s19 = smov 112   ;;  %vm506_vm3 = vcmp.gt.s32.totalorder %v505_v32, %v503_v31  ;;  %v1278_v32 = vld [vmem:[%s1672_s8 + $0x8] sm:$0xff]   ;;  %s1622_s0 = scalar_lea.hbm %s1676_s12, %s1130_s16 }
  0x1b   : > { %v414_v1 = vsel %vm413_vm0, %v1491_v0, 0.0  ;;  %v507_v33 = vsel %vm506_vm3, -1e+30, %v1364_v8 }
  0x1c   : > { %415 = vadd.xlane.f32.xlu0 %v414_v1  ;;  %1162 = vmatpush3.bf16.msra.mxu0 %v1275_v9 }
  0x1d   : > { %1167 = vmatprep.subr.bf16.mxu0 %v1364_v8 }
  0xa5   : > { %v416_v2 = vpop.xlane.xlu0 %415 }
  0xa6   : > { %v418_v3 = vmul.f32 0.03125, %v416_v2 }
  0xa8   : > { %v419_v4 = vsub.f32 %v1491_v0, %v418_v3 }
  0xaa   : > { %v420_v5 = vmul.f32 %v419_v4, %v419_v4 }
  0xac   : > { %v421_v6 = vsel %vm413_vm0, %v420_v5, 0.0  ;;  %v1276_v5 = vld [vmem:[%s1668_s4 + $0x8] sm:$0xff]  }
  0xad   : > { %422 = vadd.xlane.f32.xlu0 %v421_v6  ;;  %v1277_v6 = vld [vmem:[%s1668_s4] sm:$0xff]  }
 0x136   : > { %v423_v10 = vpop.xlane.xlu0 %422 }
 0x137   : > { %v424_v11 = vmul.f32 0.03125, %v423_v10 }
 0x139   : > { %v425_v12 = vadd.f32 1e-05, %v424_v11 }
 0x13b   : > { %1288 = vrsqrt.f32 %v425_v12 }
 0x148   : > { %v1289_v13 = vpop.eup %1288 }
 0x149   : > { %v427_v15 = vmul.f32 %v1289_v13, %v419_v4 }
 0x14b   : > { %v434_v17 = vmul.f32 %v1101_v14, %v427_v15 }
 0x14d   : > { %v441_v18 = vadd.f32 %v1102_v16, %v434_v17 }
 0x14f   : > { %v442_v19 = vpack.c.bf16 %v441_v18, %v441_v18 }
 0x151   : > { %1164 = vmatmul.mubr.msk.bf16.vlgmr.msra.gmra.mxu0 %vm413_vm0, %v442_v19  ;;  %v1110_v19 = vld [vmem:[%s1669_s5] ss:$0 sm:$0xff] }
 0x152   : > { %1169 = vmatprep.mubr.msk.bf16.mxu0 %vm1365_vm1, %v1364_v8 }
 0x211   : > { %v496_v20 = vpop.f32.mrf.mxu0 }
 0x212   : > { %v508_v21 = vpack.c.bf16 %v496_v20, %v496_v20 }
 0x213   : > { %v1165_v22 = vpop.f32.mrf.mxu0 }
 0x214   : > { %622 = vrot.lane.b32.xlu0 %v508_v21, %s1366_s19  ;;  %510 = vrot.lane.b32.xlu1 %v508_v21, %s1367_s20  ;;  %s1371_s19 = smov 16  }
 0x215   : > { %v499_v23 = vpop.f32.mrf.mxu0 }
 0x217   : > { %v1166_v24 = vpop.f32.mrf.mxu0 }
 0x218   : > { %624 = vrot.lane.b32.xlu1 %v508_v21, %s1368_s26  ;;  %s402_s26 = sand.u32 1, %s1354_s22  }
 0x219   : > { %s1023_s25 = scalar_lea.sflag [#allocation4], %s402_s26 }
 0x286   : > { %v511_v25 = vpop.permute.xlu1 %510  ;;  %v623_v29 = vpop.permute.xlu0 %622 }
 0x287   : > { %v517_v26 = vsel %vm512_vm2, %v511_v25, 0 }
 0x288   : > { %1168 = vmatpush3.bf16.xpose.msra.mxu0 %v517_v26 }
 0x289   : > { %1173 = vmatprep.subr.bf16.mxu0 %v1364_v8 }
 0x28a   : > { %v625_v27 = vpop.permute.xlu1 %624 }
 0x28b   : > { %v630_v28 = vsel %vm512_vm2, %v625_v27, 0 }
 0x28c   : > { %1180 = vmatpush3.bf16.xpose.msra.mxu1 %v630_v28 }
 0x28d   : > { %1191 = vmatprep.subr.bf16.mxu1 %v1364_v8 }
 0x28f   : > { %1170 = vmatmul.mubr.msk.bf16.vlgmr.msra.gmra.mxu0 %vm512_vm2, %v508_v21 }
 0x290   : > { %1175 = vmatprep.mubr.msk.bf16.mxu0 %vm1365_vm1, %v1364_v8 }
 0x293   : > { %1182 = vmatmul.mubr.msk.bf16.vlgmr.msra.gmra.mxu1 %vm512_vm2, %v623_v29 }
 0x294   : > { %1195 = vmatprep.mubr.msk.bf16.mxu1 %vm1365_vm1, %v1364_v8  ;;  %1192 = vmatpush3.bf16.msra.mxu1 %v1276_v5 }
 0x295   : > { %1193 = vmatprep.subr.bf16.mxu1 %v1364_v8 }
 0x298   : > { %1194 = vmatpush3.bf16.msra.mxu1 %v1277_v6 }
 0x299   : > { %1207 = vmatprep.subr.bf16.mxu1 %v1364_v8 }
 0x34f   : > { %v553_v34 = vpop.f32.mrf.mxu0 }
 0x350   : > { %v554_v35 = vadd.f32 %v553_v34, %v507_v33  ;;  %v1281_v34 = vld [vmem:[%s1674_s10 + $0x30] sm:$0xff]  }
 0x351   : > { %v1171_v36 = vpop.f32.mrf.mxu0 }
 0x352   : > { %v560_v37 = vsel %vm559_vm4, %v554_v35, -inf }
 0x353   : > { %v666_v38 = vpop.f32.mrf.mxu1  ;;  %561 = vmax.xlane.f32.xlu1 %v560_v37  ;;  %v556_v39 = vpop.f32.mrf.mxu0 }
 0x354   : > { %v667_v40 = vadd.f32 %v666_v38, %v507_v33  ;;  %v1280_v33 = vld [vmem:[%s1674_s10 + $0x38] sm:$0xff]   ;;  %v1114_v39 = vld [vmem:[%s1670_s6] ss:$0 sm:$0xff] }
 0x355   : > { %v1172_v41 = vpop.f32.mrf.mxu0  ;;  %v1183_v42 = vpop.f32.mrf.mxu1 }
 0x356   : > { %v672_v43 = vsel %vm559_vm4, %v667_v40, -inf  ;;  %v1115_v41 = vld [vmem:[%s1671_s7] ss:$0 sm:$0xff] }
 0x357   : > { %673 = vmax.xlane.f32.xlu0 %v672_v43  ;;  %v669_v44 = vpop.f32.mrf.mxu1 }
 0x359   : > { %v1184_v45 = vpop.f32.mrf.mxu1 }
 0x35a   : > { %v1282_v45 = vld [vmem:[%s1674_s10 + $0x28] sm:$0xff]  }
 0x36d   : > { %684 = vrot.lane.b32.xlu0 %v508_v21, %s1369_s28  ;;  %s1099_s28 = sshll.u32 %s402_s26, 3 }
 0x36e   : > { %s404_s17 = scalar_lea.vmem [#allocation3], %s1099_s28 }
 0x36f   : > { %s1036_s18 = sshll.u32 %s404_s17, 4  ;;  %s1624_s18 = int_to_ptr.vmem [resolvable:$true] %s1036_s18 }
 0x370   : > { %s1302_s28 = scalar_lea.vmem %s1624_s18, 128 }
 0x371   : > { %p1303_p11 = scmp.ne.s32.totalorder %s1624_s18, %s1302_s28 }
 0x373   : > { %p1304_p12 = pnand %p1303_p11, %p1476_p5 }
 0x375   : > { %p1305_p13 = pneg %p1304_p12 }
 0x3dc   : > { %v562_v46 = vpop.xlane.xlu1 %561 }
 0x3dd   : > { %v563_v47 = vsub.f32 %v554_v35, %v562_v46  ;;  %v1283_v46 = vld [vmem:[%s1674_s10 + $0x20] sm:$0xff]  }
 0x3df   : > { %v564_v48 = vmul.f32 1.442695, %v563_v47  ;;  %v1284_v47 = vld [vmem:[%s1674_s10 + $0x18] sm:$0xff]  }
 0x3e0   : > { %v674_v49 = vpop.xlane.xlu0 %673 }
 0x3e1   : > { %1290 = vpow2.f32 %v564_v48  ;;  %v675_v50 = vsub.f32 %v667_v40, %v674_v49  ;;  %v1285_v48 = vld [vmem:[%s1674_s10 + $0x10] sm:$0xff]   ;;  %v1286_v49 = vld [vmem:[%s1674_s10 + $0x8] sm:$0xff]  }
 0x3e3   : > { %v676_v51 = vmul.f32 1.442695, %v675_v50  ;;  %v1287_v50 = vld [vmem:[%s1674_s10] sm:$0xff]  }
 0x3e4   : > { %v685_v62 = vpop.permute.xlu0 %684 }
 0x3e5   : > { %1292 = vpow2.f32 %v676_v51  ;;  %v690_v2 = vsel %vm577_vm5, %v685_v62, 0  ;;  %v1116_v51 = vld [vmem:[%s1673_s9] ss:$0 sm:$0xff] }
 0x3e6   : > { %v1120_v62 = vld [vmem:[%s1675_s11] ss:$0 sm:$0xff] }
 0x3ee   : > { %v1291_v52 = vpop.eup %1290 }
 0x3ef   : > { %v566_v53 = vsel %vm559_vm4, %v1291_v52, 0.0 }
 0x3f0   : > { %567 = vadd.xlane.f32.xlu1 %v566_v53 }
 0x3f2   : > { %v1293_v54 = vpop.eup %1292 }
 0x3f3   : > { %v678_v55 = vsel %vm559_vm4, %v1293_v54, 0.0 }
 0x3f4   : > { %679 = vadd.xlane.f32.xlu1 %v678_v55 }
 0x405   : > { %572 = vrot.lane.b32.xlu1 %v508_v21, %s1370_s29  ;;  %s1372_s29 = smov [#allocation3]  }
 0x406   : > { %s1306_s15 = sshll.u32 %s1372_s29, 4  ;;  %s1307_s15 = int_to_ptr.vmem [resolvable:$false] %s1306_s15 }
 0x407   : > { %s1308_s16 = scalar_lea.vmem %s1307_s15, 256  ;;  %p1309_p0 = scmp.lt.s32.totalorder %s1624_s18, %s1307_s15 }
 0x408   : > { %p1310_p1 = scmp.lt.s32.totalorder %s1308_s16, %s1302_s28 }
 0x40a   : > { %p1311_p2 = por %p1310_p1, %p1309_p0 }
 0x40c   : > { %p1312_p3 = pnand %p1311_p2, %p1305_p13 }
 0x479   : > { %v568_v56 = vpop.xlane.xlu1 %567 }
 0x47a   : > { %1294 = vrcp.f32 %v568_v56 }
 0x47d   : > { %v680_v57 = vpop.xlane.xlu1 %679 }
 0x47e   : > { %1296 = vrcp.f32 %v680_v57 }
 0x481   : > { %v573_v58 = vpop.permute.xlu1 %572 }
 0x482   : > { %v579_v59 = vsel %vm577_vm5, %v573_v58, 0 }
 0x483   : > { %1174 = vmatpush3.bf16.msra.mxu0 %v579_v59 }
 0x484   : > { %1185 = vmatprep.subr.bf16.mxu0 %v1364_v8 }
 0x487   : > { %v1295_v60 = vpop.eup %1294 }
 0x488   : > { %v570_v61 = vmul.f32 %v1295_v60, %v1291_v52 }
 0x48a   : > { %v571_v63 = vpack.c.bf16 %v570_v61, %v570_v61 }
 0x48b   : > { %v1297_v1 = vpop.eup %1296 }
 0x48c   : > { %1176 = vmatmul.mubr.msk.bf16.vlgmr.msra.gmra.mxu0 %vm559_vm4, %v571_v63  ;;  %v682_v3 = vmul.f32 %v1297_v1, %v1293_v54 }
 0x48d   : > { %1186 = vmatpush3.bf16.msra.mxu0 %v690_v2  ;;  %1187 = vmatprep.mubr.msk.bf16.mxu0 %vm1365_vm1, %v1364_v8 }
 0x48e   : > { %1199 = vmatprep.subr.bf16.mxu0 %v1364_v8  ;;  %v683_v4 = vpack.c.bf16 %v682_v3, %v682_v3 }
 0x494   : > { %1188 = vmatmul.mubr.msk.bf16.vlgmr.msra.gmra.mxu0 %vm559_vm4, %v683_v4 }
 0x495   : > { %1203 = vmatprep.mubr.msk.bf16.mxu0 %vm1365_vm1, %v1364_v8  ;;  %1200 = vmatpush3.bf16.msra.mxu0 %v1278_v32 }
 0x496   : > { %1201 = vmatprep.subr.bf16.mxu0 %v1364_v8 }
 0x54c   : > { %v615_v7 = vpop.f32.mrf.mxu0 }
 0x54d   : > { %621 = vst.msk [vmem:[#allocation2] sm:$0xff] %vm512_vm2, %v615_v7 }
 0x54e   : > { %v1177_v9 = vpop.f32.mrf.mxu0 }
 0x550   : > { %v618_v10 = vpop.f32.mrf.mxu0 }
 0x552   : > { %v1178_v11 = vpop.f32.mrf.mxu0 }
 0x554   : > { %v726_v12 = vpop.f32.mrf.mxu0 }
 0x555   : > { %733 = vrot.lane.b32.xlu1 %v726_v12, %s1371_s19 }
 0x556   : > { %v1189_v13 = vpop.f32.mrf.mxu0 }
 0x558   : > { %v729_v14 = vpop.f32.mrf.mxu0 }
 0x55a   : > { %v1190_v15 = vpop.f32.mrf.mxu0 }
 0x5c7   : > { %v734_v16 = vpop.permute.xlu1 %733 }
 0x5c8   : > { %737 = vst.msk [vmem:[#allocation2] sm:$0xff] %vm736_vm6, %v734_v16 }
 0x5cf   : > { %v738_v17 = vld [vmem:[#allocation2] sm:$0xff] }
 0x5d0   : > { %v739_v18 = vpack.c.bf16 %v738_v17, %v738_v17 }
 0x5d2   : > { %1196 = vmatmul.mubr.msk.bf16.vlgmr.msra.gmra.mxu1 %vm413_vm0, %v739_v18 }
 0x5d3   : > { %1223 = vmatprep.mubr.msk.bf16.mxu1 %vm1365_vm1, %v1364_v8  ;;  %1208 = vmatpush3.bf16.msra.mxu1 %v1280_v33 }
 0x5d4   : > { %1209 = vmatprep.subr.bf16.mxu1 %v1364_v8 }
 0x5d7   : > { %1210 = vmatpush3.bf16.msra.mxu1 %v1281_v34 }
 0x5d8   : > { %1211 = vmatprep.subr.bf16.mxu1 %v1364_v8 }
 0x5db   : > { %1212 = vmatpush3.bf16.msra.mxu1 %v1282_v45 }
 0x5dc   : > { %1213 = vmatprep.subr.bf16.mxu1 %v1364_v8 }
 0x5df   : > { %1214 = vmatpush3.bf16.msra.mxu1 %v1283_v46 }
 0x5e0   : > { %1215 = vmatprep.subr.bf16.mxu1 %v1364_v8 }
 0x5e3   : > { %1216 = vmatpush3.bf16.msra.mxu1 %v1284_v47 }
 0x5e4   : > { %1217 = vmatprep.subr.bf16.mxu1 %v1364_v8 }
 0x5e7   : > { %1218 = vmatpush3.bf16.msra.mxu1 %v1285_v48 }
 0x5e8   : > { %1219 = vmatprep.subr.bf16.mxu1 %v1364_v8 }
 0x5eb   : > { %1220 = vmatpush3.bf16.msra.mxu1 %v1286_v49 }
 0x5ec   : > { %1221 = vmatprep.subr.bf16.mxu1 %v1364_v8 }
 0x5ef   : > { %1222 = vmatpush3.bf16.msra.mxu1 %v1287_v50 }
 0x692   : > { %v800_v20 = vpop.f32.mrf.mxu1 }
 0x693   : > { %v801_v21 = vadd.f32 %v1110_v19, %v800_v20 }
 0x694   : > { %v1197_v22 = vpop.f32.mrf.mxu1 }
 0x695   : > { %v1559_v23 = vadd.f32 %v801_v21, %v1491_v0  ;;  %v1279_v0 = vld [vmem:[%s1672_s8] sm:$0xff]  }
 0x696   : > { %v803_v24 = vpop.f32.mrf.mxu1  ;;  %1202 = vmatpush3.bf16.msra.mxu0 %v1279_v0 }
 0x697   : > { %v809_v25 = vsel %vm413_vm0, %v1559_v23, 0.0 }
 0x698   : > { %810 = vadd.xlane.f32.xlu1 %v809_v25  ;;  %v1198_v26 = vpop.f32.mrf.mxu1 }
 0x721   : > { %v811_v27 = vpop.xlane.xlu1 %810 }
 0x722   : > { %v812_v28 = vmul.f32 0.03125, %v811_v27 }
 0x724   : > { %v813_v29 = vsub.f32 %v1559_v23, %v812_v28 }
 0x726   : > { %v814_v30 = vmul.f32 %v813_v29, %v813_v29 }
 0x728   : > { %v815_v31 = vsel %vm413_vm0, %v814_v30, 0.0 }
 0x729   : > { %816 = vadd.xlane.f32.xlu0 %v815_v31 }
 0x7b2   : > { %v817_v35 = vpop.xlane.xlu0 %816 }
 0x7b3   : > { %v818_v36 = vmul.f32 0.03125, %v817_v35 }
 0x7b5   : > { %v819_v37 = vadd.f32 1e-05, %v818_v36 }
 0x7b7   : > { %1298 = vrsqrt.f32 %v819_v37 }
 0x7c4   : > { %v1299_v38 = vpop.eup %1298 }
 0x7c5   : > { %v821_v40 = vmul.f32 %v1299_v38, %v813_v29 }
 0x7c7   : > { %v828_v42 = vmul.f32 %v1114_v39, %v821_v40 }
 0x7c9   : > { %v835_v43 = vadd.f32 %v1115_v41, %v828_v42 }
 0x7cb   : > { %v836_v44 = vpack.c.bf16 %v835_v43, %v835_v43 }
 0x7cd   : > { %1204 = vmatmul.mubr.msk.bf16.vlgmr.msra.gmra.mxu0 %vm413_vm0, %v836_v44 }
 0x88d   : > { %v897_v52 = vpop.f32.mrf.mxu0 }
 0x88e   : > { %v898_v53 = vadd.f32 %v1116_v51, %v897_v52 }
 0x88f   : > { %v1205_v54 = vpop.f32.mrf.mxu0 }
 0x890   : > { %v904_v55 = vmul.f32 0.70710677, %v898_v53  ;;  %v903_v8 = vmul.f32 0.5, %v898_v53 }
 0x891   : > { %v900_v56 = vpop.f32.mrf.mxu0 }
 0x892   : > { %1300 = verf.f32 %v904_v55 }
 0x893   : > { %v1206_v57 = vpop.f32.mrf.mxu0 }
 0x89f   : > { %v1301_v58 = vpop.eup %1300 }
 0x8a0   : > { %v906_v59 = vadd.f32 1.0, %v1301_v58 }
 0x8a2   : > { %v907_v60 = vmul.f32 %v906_v59, %v903_v8 }
 0x8a4   : > { %v908_v61 = vpack.c.bf16 %v907_v60, %v907_v60 }
 0x8a6   : > { %1224 = vmatmul.mubr.bf16.vlgmr.msra.gmra.mxu1 %v908_v61 }
 0x966   : > { %v1014_v63 = vpop.f32.mrf.mxu1 }
 0x967   : > { %v1015_v1 = vadd.f32 %v1120_v62, %v1014_v63 }
 0x968   : > { %v1225_v2 = vpop.f32.mrf.mxu1 }
 0x969   : > { %v1020_v3 = vadd.f32 %v1015_v1, %v1559_v23 }
 0x96a   : > { %v1017_v4 = vpop.f32.mrf.mxu1 }
 0x96b   : > { %1021 = vst.msk [vmem:[%s404_s17] sm:$0xff] %vm413_vm0, %v1020_v3 }
 0x96c   : > { %v1226_v5 = vpop.f32.mrf.mxu1 }
 0x96d   : > { %1315 = shalt.err (!%p1312_p3)
}
 0x96e   : > { %s1316_s17 = scalar_lea.hbm %s1622_s0, 128  ;;  %s1320_s20 = scalar_lea.hbm %s1676_s12, 256 }
 0x96f   : > { %p1317_p4 = scmp.ne.s32.totalorder %s1622_s0, %s1316_s17  ;;  %p1321_p9 = scmp.lt.s32.totalorder %s1622_s0, %s1676_s12 }
 0x970   : > { %p1322_p10 = scmp.lt.s32.totalorder %s1320_s20, %s1316_s17 }
 0x971   : > { %p1318_p7 = pnand %p1317_p4, %p1476_p5 }
 0x972   : > { %p1323_p11 = por %p1322_p10, %p1321_p9 }
 0x973   : > { %p1319_p8 = pneg %p1318_p7 }
 0x975   : > { %p1324_p12 = pnand %p1323_p11, %p1319_p8 }
 0x977   : > { %1327 = shalt.err (!%p1324_p12)
}
 0x978   : > { %1227 = dma.vmem_to_hbm [thread:$0]  (%p1476_p5), %s1624_s18, 128, %s1622_s0, %s1023_s25  }
 0x979 PF: > { %p1233_p13 = scmp.ge.s32.totalorder %s1362_s24, 2  ;;  %s1048_s28 = sand.u32 1, %s1350_s21  }
 0x97a   : > { %s1049_s1 = scalar_lea.sflag [#allocation4], %s1048_s28 }
 0x97b   : > { %p1230_p0 = pnand %p1233_p13, %p1480_p6 }
 0x97d   : > { %p1231_p1 = pneg %p1230_p0 }
 0x97f   : > { %1345 = dma.done.wait (%p1231_p1), %s1049_s1, 128  }
 0x980   : > { %1347 = vsyncadd (%p1231_p1), %s1049_s1, 4294967168  ;;  %p22_p2 = scmp.ge.s32.totalorder %s1463_s27, 4   ;;  %s1683_s21 = smov %s1354_s22 }
 0x981   : > { %s1684_s22 = smov %s1358_s23  ;;  %s1685_s23 = smov %s1474_s30 }
 0x982   : > { %s1686_s24 = smov %s1463_s27  ;;  %24 = sbr.rel (!%p22_p2) target bundleno = 6 (0x6), region = 103 }
 0x987   :  { %1054 = vsyncpa [#allocation4], 1 }
 0x988   :  { %1056 = vsyncpa [#allocation4 + $0x1], 1 }

</bundles_post_ra>
